<compile_context>
chip_gen: v7x
topology: tpu7x:2x2x1
jax: 0.10.0
libtpu: 0.0.40
codegen_flags: <defaults>
</compile_context>

<pallas_src>
import functools

import jax
import jax.numpy as jnp
from jax.experimental import pallas as pl
from jax.experimental.pallas import tpu as pltpu


def _round_up(n, m):
    return ((n + m - 1) // m) * m


# --------------------------------------------------------------------------
# Fused whole-Block kernel
# --------------------------------------------------------------------------
def _block_kernel(H, W, C, OFS, x_ref, w_ref, b_ref, mask_ref, o_ref,
                  buf_ref, xcol_ref):
    """Run the full 10-layer Block for one batch element.

    x_ref   : (1, C, H*W)        input image, flattened NCHW
    w_ref   : (10, C, 9*2*C)     packed dense im2col weights (VMEM-resident)
    b_ref   : (10, C, 1)         biases (resident)
    mask_ref: (2, H*W)           [left_ok, right_ok] horizontal-border masks
    o_ref   : (1, 2*C, H*W)      output: [residual10 ; residual1]
    buf_ref : (10, 2*C, L)       VMEM: [residual ; skip-partner] with halos
    xcol_ref: (9*2*C, H*W)       VMEM: im2col staging buffer (K = 72)
    """
    HW = H * W
    C2 = 2 * C
    L = 2 * OFS + HW

    # Hoisted border masks at full tap width (computed once, reused ~60x).
    left_ok = jnp.broadcast_to(mask_ref[0:1, :], (C2, HW))
    right_ok = jnp.broadcast_to(mask_ref[1:2, :], (C2, HW))

    # Per-image scratch init. Must run on every grid step: on v7x the
    # "parallel" grid is sharded across two TensorCores, each with its own
    # scratch, so gating this on program_id==0 would leave one core with
    # garbage halos. Only the halo columns and the skip halves of buffers
    # 0..5 (whose weights are zero but whose stale bits could be NaN) need
    # zeroing; all other regions are overwritten before use. xcol needs no
    # zero-fill at all.
    zero_halo = jnp.zeros((C2, OFS), jnp.float32)
    zero_skip = jnp.zeros((C, HW), jnp.float32)
    for i in range(10):
        buf_ref[i, :, 0:OFS] = zero_halo
        buf_ref[i, :, OFS + HW:L] = zero_halo
    for i in range(6):
        buf_ref[i, C:C2, OFS:OFS + HW] = zero_skip

    def write_act(idx, act, partner=None):
        # New residual -> upper half of its own buffer; if it is also the
        # concat skip of a later dual-input layer, write it into that
        # buffer's lower half now (value is already in registers).
        buf_ref[idx, 0:C, OFS:OFS + HW] = act
        if partner is not None:
            buf_ref[partner, C:C2, OFS:OFS + HW] = act

    def layer(li, idx):
        # relu( conv3x3(cat(primary, skip)) + bias + primary )
        # cat(primary, skip) is already materialized as buf[idx] rows 0:2C.
        for ky in range(3):
            for kx in range(3):
                start = OFS + (ky - 1) * W + (kx - 1)
                s = buf_ref[idx, :, start:start + HW]       # (2C, HW) shifted
                if kx == 0:        # left neighbour of column 0 wraps -> mask
                    s = s * left_ok
                elif kx == 2:      # right neighbour of column W-1 wraps
                    s = s * right_ok
                r0 = (ky * 3 + kx) * C2
                xcol_ref[r0:r0 + C2, :] = s                 # full-tile store
        acc = jnp.dot(w_ref[li], xcol_ref[...],
                      preferred_element_type=jnp.float32)   # (C, HW)
        res = buf_ref[idx, 0:C, OFS:OFS + HW]
        return jnp.maximum(acc + b_ref[li] + res, 0.0)

    # buffer 0, upper half = input image (skip half stays zero).
    buf_ref[0, 0:C, OFS:OFS + HW] = x_ref[0].astype(jnp.float32)

    # residual index -> dual-layer buffer that consumes it as the skip half:
    # residual5 -> deconv2 (buf 6), residual4 -> deconv3 (buf 7),
    # residual3 -> deconv4 (buf 8), residual2 -> deconv5 (buf 9).
    partner = {2: 9, 3: 8, 4: 7, 5: 6}

    for li in range(9):                      # layers 0..8 -> residual1..9
        write_act(li + 1, layer(li, li), partner.get(li + 1))
    r10 = layer(9, 9)                        # residual10 stays in registers

    # com5 = cat(residual10, residual1) along channels -> one dense block.
    o_ref[0, 0:C, :] = r10.astype(o_ref.dtype)
    o_ref[0, C:C2, :] = buf_ref[1, 0:C, OFS:OFS + HW].astype(o_ref.dtype)


# --------------------------------------------------------------------------
# Wrapper
# --------------------------------------------------------------------------
def block_forward(prepped, x):
    """Forward pass of `Block` in NCHW. x: (N, C, H, W) -> (N, 2C, H, W)."""
    N, C, H, W = x.shape
    HW = H * W
    OFS = _round_up(W + 1, 128)              # lane-aligned halo width
    L = 2 * OFS + HW

    w_all = prepped["w"]                     # (10, C, 9*2*C)
    b_all = prepped["b"]                     # (10, C, 1)

    col = jnp.arange(HW, dtype=jnp.int32) % W
    masks = jnp.stack([(col != 0), (col != W - 1)]).astype(jnp.float32)

    x2 = x.reshape(N, C, HW)                 # contiguous, free

    kernel = functools.partial(_block_kernel, H, W, C, OFS)
    out = pl.pallas_call(
        kernel,
        out_shape=jax.ShapeDtypeStruct((N, 2 * C, HW), x.dtype),
        grid_spec=pltpu.PrefetchScalarGridSpec(
            num_scalar_prefetch=0,
            grid=(N,),
            in_specs=[
                pl.BlockSpec((1, C, HW), lambda n: (n, 0, 0)),
                pl.BlockSpec((10, C, 9 * 2 * C), lambda n: (0, 0, 0)),
                pl.BlockSpec((10, C, 1), lambda n: (0, 0, 0)),
                pl.BlockSpec((2, HW), lambda n: (0, 0)),
            ],
            out_specs=pl.BlockSpec((1, 2 * C, HW), lambda n: (n, 0, 0)),
            scratch_shapes=[
                pltpu.VMEM((10, 2 * C, L), jnp.float32),     # residual+skip
                pltpu.VMEM((9 * 2 * C, HW), jnp.float32),    # im2col (K=72)
            ],
        ),
        compiler_params=pltpu.CompilerParams(
            dimension_semantics=("parallel",),
        ),
    )(x2, w_all, b_all, masks)
    return out.reshape(N, 2 * C, H, W)


# --------------------------------------------------------------------------
# One-time parameter packing (weight transforms hoisted out of the forward)
# --------------------------------------------------------------------------
def deconv_to_conv_weight(w_tconv):
    """ConvTranspose2d weight (Cin, Cout, 3, 3) -> equivalent Conv2d weight
    (Cout, Cin, 3, 3) for stride=1, padding=1 (transpose(0,1) + spatial flip)."""
    return jnp.transpose(w_tconv, (1, 0, 2, 3))[:, :, ::-1, ::-1]


def _pack_conv_weight(w_conv, C):
    """OIHW (Cout, Cin_act, 3, 3) -> (Cout, 9*2*C) dense im2col layout:
    tap (ky,kx) major, then concat-half (primary, skip), then channel.
    Layers with a single input get zero weights on the skip half (which is
    also kept at zero data in the kernel, so no NaN hazard)."""
    cout, cin = w_conv.shape[:2]
    n_half = cin // C                                    # 1 or 2
    wt = jnp.transpose(w_conv, (0, 2, 3, 1))             # (Cout, 3, 3, Cin)
    wt = wt.reshape(cout, 3, 3, n_half, C)
    wt = jnp.pad(wt, ((0, 0), (0, 0), (0, 0), (0, 2 - n_half), (0, 0)))
    return wt.reshape(cout, 9 * 2 * C)


def prepare_block_params(params):
    """Pack raw module parameters into the fused-kernel layout (done once)."""
    C = params["conv1_w"].shape[0]
    ws, bs = [], []
    for i in range(1, 6):                                # conv1..conv5
        ws.append(_pack_conv_weight(params[f"conv{i}_w"], C))
        bs.append(params[f"conv{i}_b"])
    for i in range(1, 6):                                # deconv1..deconv5
        wc = deconv_to_conv_weight(params[f"deconv{i}_w"])
        ws.append(_pack_conv_weight(wc, C))
        bs.append(params[f"deconv{i}_b"])
    return {
        "w": jnp.stack(ws).astype(jnp.float32),              # (10, C, 18C)
        "b": jnp.stack(bs).astype(jnp.float32)[..., None],   # (10, C, 1)
    }


def init_block_params(key, channels):
    """Deterministic synthetic parameters matching the module's __init__ shapes."""
    C = channels
    params = {}
    keys = jax.random.split(key, 20)
    ki = 0

    def nxt():
        nonlocal ki
        k = keys[ki]
        ki += 1
        return k

    for i in range(1, 6):  # conv1..conv5: Conv2d(C, C, 3)
        params[f"conv{i}_w"] = 0.1 * jax.random.normal(nxt(), (C, C, 3, 3), jnp.float32)
        params[f"conv{i}_b"] = 0.1 * jax.random.normal(nxt(), (C,), jnp.float32)

    # deconv1: ConvTranspose2d(C, C, 3); deconv2..5: ConvTranspose2d(2C, C, 3)
    in_chs = [C, 2 * C, 2 * C, 2 * C, 2 * C]
    for i, cin in enumerate(in_chs, start=1):
        params[f"deconv{i}_w"] = 0.1 * jax.random.normal(
            nxt(), (cin, C, 3, 3), jnp.float32
        )
        params[f"deconv{i}_b"] = 0.1 * jax.random.normal(nxt(), (C,), jnp.float32)
    return params


# --------------------------------------------------------------------------
# Pure-JAX reference (NCHW, mirrors the PyTorch forward)
# --------------------------------------------------------------------------
def _ref_conv_add_relu(x, w_conv, b, residual):
    y = jax.lax.conv_general_dilated(
        x, w_conv, window_strides=(1, 1), padding=((1, 1), (1, 1)),
        dimension_numbers=("NCHW", "OIHW", "NCHW"),
    )
    return jnp.maximum(y + b[None, :, None, None] + residual, 0.0)


def block_forward_ref(params, x):
    p = params
    r1 = _ref_conv_add_relu(x, p["conv1_w"], p["conv1_b"], x)
    r2 = _ref_conv_add_relu(r1, p["conv2_w"], p["conv2_b"], r1)
    r3 = _ref_conv_add_relu(r2, p["conv3_w"], p["conv3_b"], r2)
    r4 = _ref_conv_add_relu(r3, p["conv4_w"], p["conv4_b"], r3)
    r5 = _ref_conv_add_relu(r4, p["conv5_w"], p["conv5_b"], r4)
    r6 = _ref_conv_add_relu(r5, deconv_to_conv_weight(p["deconv1_w"]), p["deconv1_b"], r5)
    c1 = jnp.concatenate([r6, r5], axis=1)
    r7 = _ref_conv_add_relu(c1, deconv_to_conv_weight(p["deconv2_w"]), p["deconv2_b"], r6)
    c2 = jnp.concatenate([r7, r4], axis=1)
    r8 = _ref_conv_add_relu(c2, deconv_to_conv_weight(p["deconv3_w"]), p["deconv3_b"], r7)
    c3 = jnp.concatenate([r8, r3], axis=1)
    r9 = _ref_conv_add_relu(c3, deconv_to_conv_weight(p["deconv4_w"]), p["deconv4_b"], r8)
    c4 = jnp.concatenate([r9, r2], axis=1)
    r10 = _ref_conv_add_relu(c4, deconv_to_conv_weight(p["deconv5_w"]), p["deconv5_b"], r9)
    return jnp.concatenate([r10, r1], axis=1)


if __name__ == "__main__":
    N, C, H, W = 2, 4, 16, 16  # NCHW, matching the PyTorch module

    key = jax.random.PRNGKey(0)
    k_x, k_p = jax.random.split(key)
    x = jax.random.normal(k_x, (N, C, H, W), jnp.float32)
    params = init_block_params(k_p, C)
    prepped = prepare_block_params(params)   # one-time weight packing

    out = jax.block_until_ready(jax.jit(block_forward)(prepped, x))
    ref = jax.block_until_ready(jax.jit(block_forward_ref)(params, x))

    assert out.shape == (N, 2 * C, H, W), out.shape
    # Tolerance allows for default MXU matmul precision / summation order.
    max_err = float(jnp.max(jnp.abs(out - ref)))
    assert jnp.allclose(out, ref, atol=2e-4, rtol=2e-4), max_err

    print("KERNEL_OK")
</pallas_src>

<mosaic_0001>
module attributes {stable_mosaic.version = 11 : i64} {
  func.func @_block_kernel(%arg0: i32, %arg1: memref<1x4x256xf32, #tpu.memory_space<vmem>>, %arg2: memref<10x4x72xf32, #tpu.memory_space<vmem>>, %arg3: memref<10x4x1xf32, #tpu.memory_space<vmem>>, %arg4: memref<2x256xf32, #tpu.memory_space<vmem>>, %arg5: memref<1x8x256xf32, #tpu.memory_space<vmem>>, %arg6: memref<10x8x512xf32, #tpu.memory_space<vmem>>, %arg7: memref<72x256xf32, #tpu.memory_space<vmem>>) attributes {dimension_semantics = [#tpu.dimension_semantics<parallel>], iteration_bounds = array<i64: 2>, scalar_prefetch = 0 : i64, scratch_operands = 2 : i64, tpu.core_type = #tpu.core_type<tc>, window_params = [{transform_indices = @transform_0, window_bounds = array<i64: 1, 4, 256>}, {pipeline_mode = #tpu.pipeline_mode<synchronous>, transform_indices = @transform_1, window_bounds = array<i64: 10, 4, 72>}, {pipeline_mode = #tpu.pipeline_mode<synchronous>, transform_indices = @transform_2, window_bounds = array<i64: 10, 4, 1>}, {pipeline_mode = #tpu.pipeline_mode<synchronous>, transform_indices = @transform_3, window_bounds = array<i64: 2, 256>}, {transform_indices = @transform_4, window_bounds = array<i64: 1, 8, 256>}]} {
    %c0 = arith.constant 0 : index
    %c0_0 = arith.constant 0 : index
    %0 = vector.load %arg4[%c0, %c0_0] : memref<2x256xf32, #tpu.memory_space<vmem>>, vector<1x256xf32>
    %1 = vector.shape_cast %0 : vector<1x256xf32> to vector<1x256xf32>
    %2 = vector.broadcast %1 : vector<1x256xf32> to vector<8x256xf32>
    %c1 = arith.constant 1 : index
    %c0_1 = arith.constant 0 : index
    %3 = vector.load %arg4[%c1, %c0_1] : memref<2x256xf32, #tpu.memory_space<vmem>>, vector<1x256xf32>
    %4 = vector.shape_cast %3 : vector<1x256xf32> to vector<1x256xf32>
    %5 = vector.broadcast %4 : vector<1x256xf32> to vector<8x256xf32>
    %cst = arith.constant 0.000000e+00 : f32
    %6 = vector.broadcast %cst : f32 to vector<8x128xf32>
    %cst_2 = arith.constant 0.000000e+00 : f32
    %7 = vector.broadcast %cst_2 : f32 to vector<4x256xf32>
    %c0_3 = arith.constant 0 : index
    %c0_4 = arith.constant 0 : index
    %c0_5 = arith.constant 0 : index
    %8 = vector.load %arg6[%c0_3, %c0_4, %c0_5] : memref<10x8x512xf32, #tpu.memory_space<vmem>>, vector<1x8x128xf32>
    %9 = vector.shape_cast %8 : vector<1x8x128xf32> to vector<8x128xf32>
    %10 = vector.shape_cast %6 : vector<8x128xf32> to vector<1x8x128xf32>
    tpu.vector_store %arg6[%c0_3, %c0_4, %c0_5], %10 {strides = array<i32>} : memref<10x8x512xf32, #tpu.memory_space<vmem>>, vector<1x8x128xf32>,
    %c0_6 = arith.constant 0 : index
    %c0_7 = arith.constant 0 : index
    %c384 = arith.constant 384 : index
    %11 = vector.load %arg6[%c0_6, %c0_7, %c384] : memref<10x8x512xf32, #tpu.memory_space<vmem>>, vector<1x8x128xf32>
    %12 = vector.shape_cast %11 : vector<1x8x128xf32> to vector<8x128xf32>
    %13 = vector.shape_cast %6 : vector<8x128xf32> to vector<1x8x128xf32>
    tpu.vector_store %arg6[%c0_6, %c0_7, %c384], %13 {strides = array<i32>} : memref<10x8x512xf32, #tpu.memory_space<vmem>>, vector<1x8x128xf32>,
    %c1_8 = arith.constant 1 : index
    %c0_9 = arith.constant 0 : index
    %c0_10 = arith.constant 0 : index
    %14 = vector.load %arg6[%c1_8, %c0_9, %c0_10] : memref<10x8x512xf32, #tpu.memory_space<vmem>>, vector<1x8x128xf32>
    %15 = vector.shape_cast %14 : vector<1x8x128xf32> to vector<8x128xf32>
    %16 = vector.shape_cast %6 : vector<8x128xf32> to vector<1x8x128xf32>
    tpu.vector_store %arg6[%c1_8, %c0_9, %c0_10], %16 {strides = array<i32>} : memref<10x8x512xf32, #tpu.memory_space<vmem>>, vector<1x8x128xf32>,
    %c1_11 = arith.constant 1 : index
    %c0_12 = arith.constant 0 : index
    %c384_13 = arith.constant 384 : index
    %17 = vector.load %arg6[%c1_11, %c0_12, %c384_13] : memref<10x8x512xf32, #tpu.memory_space<vmem>>, vector<1x8x128xf32>
    %18 = vector.shape_cast %17 : vector<1x8x128xf32> to vector<8x128xf32>
    %19 = vector.shape_cast %6 : vector<8x128xf32> to vector<1x8x128xf32>
    tpu.vector_store %arg6[%c1_11, %c0_12, %c384_13], %19 {strides = array<i32>} : memref<10x8x512xf32, #tpu.memory_space<vmem>>, vector<1x8x128xf32>,
    %c2 = arith.constant 2 : index
    %c0_14 = arith.constant 0 : index
    %c0_15 = arith.constant 0 : index
    %20 = vector.load %arg6[%c2, %c0_14, %c0_15] : memref<10x8x512xf32, #tpu.memory_space<vmem>>, vector<1x8x128xf32>
    %21 = vector.shape_cast %20 : vector<1x8x128xf32> to vector<8x128xf32>
    %22 = vector.shape_cast %6 : vector<8x128xf32> to vector<1x8x128xf32>
    tpu.vector_store %arg6[%c2, %c0_14, %c0_15], %22 {strides = array<i32>} : memref<10x8x512xf32, #tpu.memory_space<vmem>>, vector<1x8x128xf32>,
    %c2_16 = arith.constant 2 : index
    %c0_17 = arith.constant 0 : index
    %c384_18 = arith.constant 384 : index
    %23 = vector.load %arg6[%c2_16, %c0_17, %c384_18] : memref<10x8x512xf32, #tpu.memory_space<vmem>>, vector<1x8x128xf32>
    %24 = vector.shape_cast %23 : vector<1x8x128xf32> to vector<8x128xf32>
    %25 = vector.shape_cast %6 : vector<8x128xf32> to vector<1x8x128xf32>
    tpu.vector_store %arg6[%c2_16, %c0_17, %c384_18], %25 {strides = array<i32>} : memref<10x8x512xf32, #tpu.memory_space<vmem>>, vector<1x8x128xf32>,
    %c3 = arith.constant 3 : index
    %c0_19 = arith.constant 0 : index
    %c0_20 = arith.constant 0 : index
    %26 = vector.load %arg6[%c3, %c0_19, %c0_20] : memref<10x8x512xf32, #tpu.memory_space<vmem>>, vector<1x8x128xf32>
    %27 = vector.shape_cast %26 : vector<1x8x128xf32> to vector<8x128xf32>
    %28 = vector.shape_cast %6 : vector<8x128xf32> to vector<1x8x128xf32>
    tpu.vector_store %arg6[%c3, %c0_19, %c0_20], %28 {strides = array<i32>} : memref<10x8x512xf32, #tpu.memory_space<vmem>>, vector<1x8x128xf32>,
    %c3_21 = arith.constant 3 : index
    %c0_22 = arith.constant 0 : index
    %c384_23 = arith.constant 384 : index
    %29 = vector.load %arg6[%c3_21, %c0_22, %c384_23] : memref<10x8x512xf32, #tpu.memory_space<vmem>>, vector<1x8x128xf32>
    %30 = vector.shape_cast %29 : vector<1x8x128xf32> to vector<8x128xf32>
    %31 = vector.shape_cast %6 : vector<8x128xf32> to vector<1x8x128xf32>
    tpu.vector_store %arg6[%c3_21, %c0_22, %c384_23], %31 {strides = array<i32>} : memref<10x8x512xf32, #tpu.memory_space<vmem>>, vector<1x8x128xf32>,
    %c4 = arith.constant 4 : index
    %c0_24 = arith.constant 0 : index
    %c0_25 = arith.constant 0 : index
    %32 = vector.load %arg6[%c4, %c0_24, %c0_25] : memref<10x8x512xf32, #tpu.memory_space<vmem>>, vector<1x8x128xf32>
    %33 = vector.shape_cast %32 : vector<1x8x128xf32> to vector<8x128xf32>
    %34 = vector.shape_cast %6 : vector<8x128xf32> to vector<1x8x128xf32>
    tpu.vector_store %arg6[%c4, %c0_24, %c0_25], %34 {strides = array<i32>} : memref<10x8x512xf32, #tpu.memory_space<vmem>>, vector<1x8x128xf32>,
    %c4_26 = arith.constant 4 : index
    %c0_27 = arith.constant 0 : index
    %c384_28 = arith.constant 384 : index
    %35 = vector.load %arg6[%c4_26, %c0_27, %c384_28] : memref<10x8x512xf32, #tpu.memory_space<vmem>>, vector<1x8x128xf32>
    %36 = vector.shape_cast %35 : vector<1x8x128xf32> to vector<8x128xf32>
    %37 = vector.shape_cast %6 : vector<8x128xf32> to vector<1x8x128xf32>
    tpu.vector_store %arg6[%c4_26, %c0_27, %c384_28], %37 {strides = array<i32>} : memref<10x8x512xf32, #tpu.memory_space<vmem>>, vector<1x8x128xf32>,
    %c5 = arith.constant 5 : index
    %c0_29 = arith.constant 0 : index
    %c0_30 = arith.constant 0 : index
    %38 = vector.load %arg6[%c5, %c0_29, %c0_30] : memref<10x8x512xf32, #tpu.memory_space<vmem>>, vector<1x8x128xf32>
    %39 = vector.shape_cast %38 : vector<1x8x128xf32> to vector<8x128xf32>
    %40 = vector.shape_cast %6 : vector<8x128xf32> to vector<1x8x128xf32>
    tpu.vector_store %arg6[%c5, %c0_29, %c0_30], %40 {strides = array<i32>} : memref<10x8x512xf32, #tpu.memory_space<vmem>>, vector<1x8x128xf32>,
    %c5_31 = arith.constant 5 : index
    %c0_32 = arith.constant 0 : index
    %c384_33 = arith.constant 384 : index
    %41 = vector.load %arg6[%c5_31, %c0_32, %c384_33] : memref<10x8x512xf32, #tpu.memory_space<vmem>>, vector<1x8x128xf32>
    %42 = vector.shape_cast %41 : vector<1x8x128xf32> to vector<8x128xf32>
    %43 = vector.shape_cast %6 : vector<8x128xf32> to vector<1x8x128xf32>
    tpu.vector_store %arg6[%c5_31, %c0_32, %c384_33], %43 {strides = array<i32>} : memref<10x8x512xf32, #tpu.memory_space<vmem>>, vector<1x8x128xf32>,
    %c6 = arith.constant 6 : index
    %c0_34 = arith.constant 0 : index
    %c0_35 = arith.constant 0 : index
    %44 = vector.load %arg6[%c6, %c0_34, %c0_35] : memref<10x8x512xf32, #tpu.memory_space<vmem>>, vector<1x8x128xf32>
    %45 = vector.shape_cast %44 : vector<1x8x128xf32> to vector<8x128xf32>
    %46 = vector.shape_cast %6 : vector<8x128xf32> to vector<1x8x128xf32>
    tpu.vector_store %arg6[%c6, %c0_34, %c0_35], %46 {strides = array<i32>} : memref<10x8x512xf32, #tpu.memory_space<vmem>>, vector<1x8x128xf32>,
    %c6_36 = arith.constant 6 : index
    %c0_37 = arith.constant 0 : index
    %c384_38 = arith.constant 384 : index
    %47 = vector.load %arg6[%c6_36, %c0_37, %c384_38] : memref<10x8x512xf32, #tpu.memory_space<vmem>>, vector<1x8x128xf32>
    %48 = vector.shape_cast %47 : vector<1x8x128xf32> to vector<8x128xf32>
    %49 = vector.shape_cast %6 : vector<8x128xf32> to vector<1x8x128xf32>
    tpu.vector_store %arg6[%c6_36, %c0_37, %c384_38], %49 {strides = array<i32>} : memref<10x8x512xf32, #tpu.memory_space<vmem>>, vector<1x8x128xf32>,
    %c7 = arith.constant 7 : index
    %c0_39 = arith.constant 0 : index
    %c0_40 = arith.constant 0 : index
    %50 = vector.load %arg6[%c7, %c0_39, %c0_40] : memref<10x8x512xf32, #tpu.memory_space<vmem>>, vector<1x8x128xf32>
    %51 = vector.shape_cast %50 : vector<1x8x128xf32> to vector<8x128xf32>
    %52 = vector.shape_cast %6 : vector<8x128xf32> to vector<1x8x128xf32>
    tpu.vector_store %arg6[%c7, %c0_39, %c0_40], %52 {strides = array<i32>} : memref<10x8x512xf32, #tpu.memory_space<vmem>>, vector<1x8x128xf32>,
    %c7_41 = arith.constant 7 : index
    %c0_42 = arith.constant 0 : index
    %c384_43 = arith.constant 384 : index
    %53 = vector.load %arg6[%c7_41, %c0_42, %c384_43] : memref<10x8x512xf32, #tpu.memory_space<vmem>>, vector<1x8x128xf32>
    %54 = vector.shape_cast %53 : vector<1x8x128xf32> to vector<8x128xf32>
    %55 = vector.shape_cast %6 : vector<8x128xf32> to vector<1x8x128xf32>
    tpu.vector_store %arg6[%c7_41, %c0_42, %c384_43], %55 {strides = array<i32>} : memref<10x8x512xf32, #tpu.memory_space<vmem>>, vector<1x8x128xf32>,
    %c8 = arith.constant 8 : index
    %c0_44 = arith.constant 0 : index
    %c0_45 = arith.constant 0 : index
    %56 = vector.load %arg6[%c8, %c0_44, %c0_45] : memref<10x8x512xf32, #tpu.memory_space<vmem>>, vector<1x8x128xf32>
    %57 = vector.shape_cast %56 : vector<1x8x128xf32> to vector<8x128xf32>
    %58 = vector.shape_cast %6 : vector<8x128xf32> to vector<1x8x128xf32>
    tpu.vector_store %arg6[%c8, %c0_44, %c0_45], %58 {strides = array<i32>} : memref<10x8x512xf32, #tpu.memory_space<vmem>>, vector<1x8x128xf32>,
    %c8_46 = arith.constant 8 : index
    %c0_47 = arith.constant 0 : index
    %c384_48 = arith.constant 384 : index
    %59 = vector.load %arg6[%c8_46, %c0_47, %c384_48] : memref<10x8x512xf32, #tpu.memory_space<vmem>>, vector<1x8x128xf32>
    %60 = vector.shape_cast %59 : vector<1x8x128xf32> to vector<8x128xf32>
    %61 = vector.shape_cast %6 : vector<8x128xf32> to vector<1x8x128xf32>
    tpu.vector_store %arg6[%c8_46, %c0_47, %c384_48], %61 {strides = array<i32>} : memref<10x8x512xf32, #tpu.memory_space<vmem>>, vector<1x8x128xf32>,
    %c9 = arith.constant 9 : index
    %c0_49 = arith.constant 0 : index
    %c0_50 = arith.constant 0 : index
    %62 = vector.load %arg6[%c9, %c0_49, %c0_50] : memref<10x8x512xf32, #tpu.memory_space<vmem>>, vector<1x8x128xf32>
    %63 = vector.shape_cast %62 : vector<1x8x128xf32> to vector<8x128xf32>
    %64 = vector.shape_cast %6 : vector<8x128xf32> to vector<1x8x128xf32>
    tpu.vector_store %arg6[%c9, %c0_49, %c0_50], %64 {strides = array<i32>} : memref<10x8x512xf32, #tpu.memory_space<vmem>>, vector<1x8x128xf32>,
    %c9_51 = arith.constant 9 : index
    %c0_52 = arith.constant 0 : index
    %c384_53 = arith.constant 384 : index
    %65 = vector.load %arg6[%c9_51, %c0_52, %c384_53] : memref<10x8x512xf32, #tpu.memory_space<vmem>>, vector<1x8x128xf32>
    %66 = vector.shape_cast %65 : vector<1x8x128xf32> to vector<8x128xf32>
    %67 = vector.shape_cast %6 : vector<8x128xf32> to vector<1x8x128xf32>
    tpu.vector_store %arg6[%c9_51, %c0_52, %c384_53], %67 {strides = array<i32>} : memref<10x8x512xf32, #tpu.memory_space<vmem>>, vector<1x8x128xf32>,
    %c0_54 = arith.constant 0 : index
    %c4_55 = arith.constant 4 : index
    %c128 = arith.constant 128 : index
    %68 = vector.load %arg6[%c0_54, %c4_55, %c128] : memref<10x8x512xf32, #tpu.memory_space<vmem>>, vector<1x4x256xf32>
    %69 = vector.shape_cast %68 : vector<1x4x256xf32> to vector<4x256xf32>
    %70 = vector.shape_cast %7 : vector<4x256xf32> to vector<1x4x256xf32>
    tpu.vector_store %arg6[%c0_54, %c4_55, %c128], %70 {strides = array<i32>} : memref<10x8x512xf32, #tpu.memory_space<vmem>>, vector<1x4x256xf32>,
    %c1_56 = arith.constant 1 : index
    %c4_57 = arith.constant 4 : index
    %c128_58 = arith.constant 128 : index
    %71 = vector.load %arg6[%c1_56, %c4_57, %c128_58] : memref<10x8x512xf32, #tpu.memory_space<vmem>>, vector<1x4x256xf32>
    %72 = vector.shape_cast %71 : vector<1x4x256xf32> to vector<4x256xf32>
    %73 = vector.shape_cast %7 : vector<4x256xf32> to vector<1x4x256xf32>
    tpu.vector_store %arg6[%c1_56, %c4_57, %c128_58], %73 {strides = array<i32>} : memref<10x8x512xf32, #tpu.memory_space<vmem>>, vector<1x4x256xf32>,
    %c2_59 = arith.constant 2 : index
    %c4_60 = arith.constant 4 : index
    %c128_61 = arith.constant 128 : index
    %74 = vector.load %arg6[%c2_59, %c4_60, %c128_61] : memref<10x8x512xf32, #tpu.memory_space<vmem>>, vector<1x4x256xf32>
    %75 = vector.shape_cast %74 : vector<1x4x256xf32> to vector<4x256xf32>
    %76 = vector.shape_cast %7 : vector<4x256xf32> to vector<1x4x256xf32>
    tpu.vector_store %arg6[%c2_59, %c4_60, %c128_61], %76 {strides = array<i32>} : memref<10x8x512xf32, #tpu.memory_space<vmem>>, vector<1x4x256xf32>,
    %c3_62 = arith.constant 3 : index
    %c4_63 = arith.constant 4 : index
    %c128_64 = arith.constant 128 : index
    %77 = vector.load %arg6[%c3_62, %c4_63, %c128_64] : memref<10x8x512xf32, #tpu.memory_space<vmem>>, vector<1x4x256xf32>
    %78 = vector.shape_cast %77 : vector<1x4x256xf32> to vector<4x256xf32>
    %79 = vector.shape_cast %7 : vector<4x256xf32> to vector<1x4x256xf32>
    tpu.vector_store %arg6[%c3_62, %c4_63, %c128_64], %79 {strides = array<i32>} : memref<10x8x512xf32, #tpu.memory_space<vmem>>, vector<1x4x256xf32>,
    %c4_65 = arith.constant 4 : index
    %c4_66 = arith.constant 4 : index
    %c128_67 = arith.constant 128 : index
    %80 = vector.load %arg6[%c4_65, %c4_66, %c128_67] : memref<10x8x512xf32, #tpu.memory_space<vmem>>, vector<1x4x256xf32>
    %81 = vector.shape_cast %80 : vector<1x4x256xf32> to vector<4x256xf32>
    %82 = vector.shape_cast %7 : vector<4x256xf32> to vector<1x4x256xf32>
    tpu.vector_store %arg6[%c4_65, %c4_66, %c128_67], %82 {strides = array<i32>} : memref<10x8x512xf32, #tpu.memory_space<vmem>>, vector<1x4x256xf32>,
    %c5_68 = arith.constant 5 : index
    %c4_69 = arith.constant 4 : index
    %c128_70 = arith.constant 128 : index
    %83 = vector.load %arg6[%c5_68, %c4_69, %c128_70] : memref<10x8x512xf32, #tpu.memory_space<vmem>>, vector<1x4x256xf32>
    %84 = vector.shape_cast %83 : vector<1x4x256xf32> to vector<4x256xf32>
    %85 = vector.shape_cast %7 : vector<4x256xf32> to vector<1x4x256xf32>
    tpu.vector_store %arg6[%c5_68, %c4_69, %c128_70], %85 {strides = array<i32>} : memref<10x8x512xf32, #tpu.memory_space<vmem>>, vector<1x4x256xf32>,
    %c0_71 = arith.constant 0 : index
    %c0_72 = arith.constant 0 : index
    %c0_73 = arith.constant 0 : index
    %86 = vector.load %arg1[%c0_71, %c0_72, %c0_73] : memref<1x4x256xf32, #tpu.memory_space<vmem>>, vector<1x4x256xf32>
    %87 = vector.shape_cast %86 : vector<1x4x256xf32> to vector<4x256xf32>
    %c0_74 = arith.constant 0 : index
    %c0_75 = arith.constant 0 : index
    %c128_76 = arith.constant 128 : index
    %88 = vector.load %arg6[%c0_74, %c0_75, %c128_76] : memref<10x8x512xf32, #tpu.memory_space<vmem>>, vector<1x4x256xf32>
    %89 = vector.shape_cast %88 : vector<1x4x256xf32> to vector<4x256xf32>
    %90 = vector.shape_cast %87 : vector<4x256xf32> to vector<1x4x256xf32>
    tpu.vector_store %arg6[%c0_74, %c0_75, %c128_76], %90 {strides = array<i32>} : memref<10x8x512xf32, #tpu.memory_space<vmem>>, vector<1x4x256xf32>,
    %c0_77 = arith.constant 0 : index
    %c0_78 = arith.constant 0 : index
    %c111 = arith.constant 111 : index
    %91 = vector.load %arg6[%c0_77, %c0_78, %c111] : memref<10x8x512xf32, #tpu.memory_space<vmem>>, vector<1x8x256xf32>
    %92 = vector.shape_cast %91 : vector<1x8x256xf32> to vector<8x256xf32>
    %93 = arith.mulf %92, %2 : vector<8x256xf32>
    %c0_79 = arith.constant 0 : index
    %c0_80 = arith.constant 0 : index
    %94 = vector.load %arg7[%c0_79, %c0_80] : memref<72x256xf32, #tpu.memory_space<vmem>>, vector<8x256xf32>
    tpu.vector_store %arg7[%c0_79, %c0_80], %93 {strides = array<i32>} : memref<72x256xf32, #tpu.memory_space<vmem>>, vector<8x256xf32>,
    %c0_81 = arith.constant 0 : index
    %c0_82 = arith.constant 0 : index
    %c112 = arith.constant 112 : index
    %95 = vector.load %arg6[%c0_81, %c0_82, %c112] : memref<10x8x512xf32, #tpu.memory_space<vmem>>, vector<1x8x256xf32>
    %96 = vector.shape_cast %95 : vector<1x8x256xf32> to vector<8x256xf32>
    %c8_83 = arith.constant 8 : index
    %c0_84 = arith.constant 0 : index
    %97 = vector.load %arg7[%c8_83, %c0_84] : memref<72x256xf32, #tpu.memory_space<vmem>>, vector<8x256xf32>
    tpu.vector_store %arg7[%c8_83, %c0_84], %96 {strides = array<i32>} : memref<72x256xf32, #tpu.memory_space<vmem>>, vector<8x256xf32>,
    %c0_85 = arith.constant 0 : index
    %c0_86 = arith.constant 0 : index
    %c113 = arith.constant 113 : index
    %98 = vector.load %arg6[%c0_85, %c0_86, %c113] : memref<10x8x512xf32, #tpu.memory_space<vmem>>, vector<1x8x256xf32>
    %99 = vector.shape_cast %98 : vector<1x8x256xf32> to vector<8x256xf32>
    %100 = arith.mulf %99, %5 : vector<8x256xf32>
    %c16 = arith.constant 16 : index
    %c0_87 = arith.constant 0 : index
    %101 = vector.load %arg7[%c16, %c0_87] : memref<72x256xf32, #tpu.memory_space<vmem>>, vector<8x256xf32>
    tpu.vector_store %arg7[%c16, %c0_87], %100 {strides = array<i32>} : memref<72x256xf32, #tpu.memory_space<vmem>>, vector<8x256xf32>,
    %c0_88 = arith.constant 0 : index
    %c0_89 = arith.constant 0 : index
    %c127 = arith.constant 127 : index
    %102 = vector.load %arg6[%c0_88, %c0_89, %c127] : memref<10x8x512xf32, #tpu.memory_space<vmem>>, vector<1x8x256xf32>
    %103 = vector.shape_cast %102 : vector<1x8x256xf32> to vector<8x256xf32>
    %104 = arith.mulf %103, %2 : vector<8x256xf32>
    %c24 = arith.constant 24 : index
    %c0_90 = arith.constant 0 : index
    %105 = vector.load %arg7[%c24, %c0_90] : memref<72x256xf32, #tpu.memory_space<vmem>>, vector<8x256xf32>
    tpu.vector_store %arg7[%c24, %c0_90], %104 {strides = array<i32>} : memref<72x256xf32, #tpu.memory_space<vmem>>, vector<8x256xf32>,
    %c0_91 = arith.constant 0 : index
    %c0_92 = arith.constant 0 : index
    %c128_93 = arith.constant 128 : index
    %106 = vector.load %arg6[%c0_91, %c0_92, %c128_93] : memref<10x8x512xf32, #tpu.memory_space<vmem>>, vector<1x8x256xf32>
    %107 = vector.shape_cast %106 : vector<1x8x256xf32> to vector<8x256xf32>
    %c32 = arith.constant 32 : index
    %c0_94 = arith.constant 0 : index
    %108 = vector.load %arg7[%c32, %c0_94] : memref<72x256xf32, #tpu.memory_space<vmem>>, vector<8x256xf32>
    tpu.vector_store %arg7[%c32, %c0_94], %107 {strides = array<i32>} : memref<72x256xf32, #tpu.memory_space<vmem>>, vector<8x256xf32>,
    %c0_95 = arith.constant 0 : index
    %c0_96 = arith.constant 0 : index
    %c129 = arith.constant 129 : index
    %109 = vector.load %arg6[%c0_95, %c0_96, %c129] : memref<10x8x512xf32, #tpu.memory_space<vmem>>, vector<1x8x256xf32>
    %110 = vector.shape_cast %109 : vector<1x8x256xf32> to vector<8x256xf32>
    %111 = arith.mulf %110, %5 : vector<8x256xf32>
    %c40 = arith.constant 40 : index
    %c0_97 = arith.constant 0 : index
    %112 = vector.load %arg7[%c40, %c0_97] : memref<72x256xf32, #tpu.memory_space<vmem>>, vector<8x256xf32>
    tpu.vector_store %arg7[%c40, %c0_97], %111 {strides = array<i32>} : memref<72x256xf32, #tpu.memory_space<vmem>>, vector<8x256xf32>,
    %c0_98 = arith.constant 0 : index
    %c0_99 = arith.constant 0 : index
    %c143 = arith.constant 143 : index
    %113 = vector.load %arg6[%c0_98, %c0_99, %c143] : memref<10x8x512xf32, #tpu.memory_space<vmem>>, vector<1x8x256xf32>
    %114 = vector.shape_cast %113 : vector<1x8x256xf32> to vector<8x256xf32>
    %115 = arith.mulf %114, %2 : vector<8x256xf32>
    %c48 = arith.constant 48 : index
    %c0_100 = arith.constant 0 : index
    %116 = vector.load %arg7[%c48, %c0_100] : memref<72x256xf32, #tpu.memory_space<vmem>>, vector<8x256xf32>
    tpu.vector_store %arg7[%c48, %c0_100], %115 {strides = array<i32>} : memref<72x256xf32, #tpu.memory_space<vmem>>, vector<8x256xf32>,
    %c0_101 = arith.constant 0 : index
    %c0_102 = arith.constant 0 : index
    %c144 = arith.constant 144 : index
    %117 = vector.load %arg6[%c0_101, %c0_102, %c144] : memref<10x8x512xf32, #tpu.memory_space<vmem>>, vector<1x8x256xf32>
    %118 = vector.shape_cast %117 : vector<1x8x256xf32> to vector<8x256xf32>
    %c56 = arith.constant 56 : index
    %c0_103 = arith.constant 0 : index
    %119 = vector.load %arg7[%c56, %c0_103] : memref<72x256xf32, #tpu.memory_space<vmem>>, vector<8x256xf32>
    tpu.vector_store %arg7[%c56, %c0_103], %118 {strides = array<i32>} : memref<72x256xf32, #tpu.memory_space<vmem>>, vector<8x256xf32>,
    %c0_104 = arith.constant 0 : index
    %c0_105 = arith.constant 0 : index
    %c145 = arith.constant 145 : index
    %120 = vector.load %arg6[%c0_104, %c0_105, %c145] : memref<10x8x512xf32, #tpu.memory_space<vmem>>, vector<1x8x256xf32>
    %121 = vector.shape_cast %120 : vector<1x8x256xf32> to vector<8x256xf32>
    %122 = arith.mulf %121, %5 : vector<8x256xf32>
    %c64 = arith.constant 64 : index
    %c0_106 = arith.constant 0 : index
    %123 = vector.load %arg7[%c64, %c0_106] : memref<72x256xf32, #tpu.memory_space<vmem>>, vector<8x256xf32>
    tpu.vector_store %arg7[%c64, %c0_106], %122 {strides = array<i32>} : memref<72x256xf32, #tpu.memory_space<vmem>>, vector<8x256xf32>,
    %c0_107 = arith.constant 0 : index
    %c0_108 = arith.constant 0 : index
    %c0_109 = arith.constant 0 : index
    %124 = vector.load %arg2[%c0_107, %c0_108, %c0_109] : memref<10x4x72xf32, #tpu.memory_space<vmem>>, vector<1x4x72xf32>
    %125 = vector.shape_cast %124 : vector<1x4x72xf32> to vector<4x72xf32>
    %c0_110 = arith.constant 0 : index
    %c0_111 = arith.constant 0 : index
    %126 = vector.load %arg7[%c0_110, %c0_111] : memref<72x256xf32, #tpu.memory_space<vmem>>, vector<72x256xf32>
    %cst_112 = arith.constant dense<0.000000e+00> : vector<4x256xf32>
    %127 = tpu.matmul %125, %126, %cst_112 {dimension_numbers = #tpu.dot_dimension_numbers<[1], [0], [0], [1], [0, 0, 1, 1], [], []>} : vector<4x72xf32>, vector<72x256xf32>, vector<4x256xf32> -> vector<4x256xf32>
    %c0_113 = arith.constant 0 : index
    %c0_114 = arith.constant 0 : index
    %c128_115 = arith.constant 128 : index
    %128 = vector.load %arg6[%c0_113, %c0_114, %c128_115] : memref<10x8x512xf32, #tpu.memory_space<vmem>>, vector<1x4x256xf32>
    %129 = vector.shape_cast %128 : vector<1x4x256xf32> to vector<4x256xf32>
    %c0_116 = arith.constant 0 : index
    %c0_117 = arith.constant 0 : index
    %c0_118 = arith.constant 0 : index
    %130 = vector.load %arg3[%c0_116, %c0_117, %c0_118] : memref<10x4x1xf32, #tpu.memory_space<vmem>>, vector<1x4x1xf32>
    %131 = vector.shape_cast %130 : vector<1x4x1xf32> to vector<4x1xf32>
    %132 = vector.broadcast %131 : vector<4x1xf32> to vector<4x256xf32>
    %133 = arith.addf %127, %132 : vector<4x256xf32>
    %134 = arith.addf %133, %129 : vector<4x256xf32>
    %cst_119 = arith.constant 0.000000e+00 : f32
    %135 = vector.broadcast %cst_119 : f32 to vector<4x256xf32>
    %136 = arith.maximumf %134, %135 : vector<4x256xf32>
    %c1_120 = arith.constant 1 : index
    %c0_121 = arith.constant 0 : index
    %c128_122 = arith.constant 128 : index
    %137 = vector.load %arg6[%c1_120, %c0_121, %c128_122] : memref<10x8x512xf32, #tpu.memory_space<vmem>>, vector<1x4x256xf32>
    %138 = vector.shape_cast %137 : vector<1x4x256xf32> to vector<4x256xf32>
    %139 = vector.shape_cast %136 : vector<4x256xf32> to vector<1x4x256xf32>
    tpu.vector_store %arg6[%c1_120, %c0_121, %c128_122], %139 {strides = array<i32>} : memref<10x8x512xf32, #tpu.memory_space<vmem>>, vector<1x4x256xf32>,
    %c1_123 = arith.constant 1 : index
    %c0_124 = arith.constant 0 : index
    %c111_125 = arith.constant 111 : index
    %140 = vector.load %arg6[%c1_123, %c0_124, %c111_125] : memref<10x8x512xf32, #tpu.memory_space<vmem>>, vector<1x8x256xf32>
    %141 = vector.shape_cast %140 : vector<1x8x256xf32> to vector<8x256xf32>
    %142 = arith.mulf %141, %2 : vector<8x256xf32>
    %c0_126 = arith.constant 0 : index
    %c0_127 = arith.constant 0 : index
    %143 = vector.load %arg7[%c0_126, %c0_127] : memref<72x256xf32, #tpu.memory_space<vmem>>, vector<8x256xf32>
    tpu.vector_store %arg7[%c0_126, %c0_127], %142 {strides = array<i32>} : memref<72x256xf32, #tpu.memory_space<vmem>>, vector<8x256xf32>,
    %c1_128 = arith.constant 1 : index
    %c0_129 = arith.constant 0 : index
    %c112_130 = arith.constant 112 : index
    %144 = vector.load %arg6[%c1_128, %c0_129, %c112_130] : memref<10x8x512xf32, #tpu.memory_space<vmem>>, vector<1x8x256xf32>
    %145 = vector.shape_cast %144 : vector<1x8x256xf32> to vector<8x256xf32>
    %c8_131 = arith.constant 8 : index
    %c0_132 = arith.constant 0 : index
    %146 = vector.load %arg7[%c8_131, %c0_132] : memref<72x256xf32, #tpu.memory_space<vmem>>, vector<8x256xf32>
    tpu.vector_store %arg7[%c8_131, %c0_132], %145 {strides = array<i32>} : memref<72x256xf32, #tpu.memory_space<vmem>>, vector<8x256xf32>,
    %c1_133 = arith.constant 1 : index
    %c0_134 = arith.constant 0 : index
    %c113_135 = arith.constant 113 : index
    %147 = vector.load %arg6[%c1_133, %c0_134, %c113_135] : memref<10x8x512xf32, #tpu.memory_space<vmem>>, vector<1x8x256xf32>
    %148 = vector.shape_cast %147 : vector<1x8x256xf32> to vector<8x256xf32>
    %149 = arith.mulf %148, %5 : vector<8x256xf32>
    %c16_136 = arith.constant 16 : index
    %c0_137 = arith.constant 0 : index
    %150 = vector.load %arg7[%c16_136, %c0_137] : memref<72x256xf32, #tpu.memory_space<vmem>>, vector<8x256xf32>
    tpu.vector_store %arg7[%c16_136, %c0_137], %149 {strides = array<i32>} : memref<72x256xf32, #tpu.memory_space<vmem>>, vector<8x256xf32>,
    %c1_138 = arith.constant 1 : index
    %c0_139 = arith.constant 0 : index
    %c127_140 = arith.constant 127 : index
    %151 = vector.load %arg6[%c1_138, %c0_139, %c127_140] : memref<10x8x512xf32, #tpu.memory_space<vmem>>, vector<1x8x256xf32>
    %152 = vector.shape_cast %151 : vector<1x8x256xf32> to vector<8x256xf32>
    %153 = arith.mulf %152, %2 : vector<8x256xf32>
    %c24_141 = arith.constant 24 : index
    %c0_142 = arith.constant 0 : index
    %154 = vector.load %arg7[%c24_141, %c0_142] : memref<72x256xf32, #tpu.memory_space<vmem>>, vector<8x256xf32>
    tpu.vector_store %arg7[%c24_141, %c0_142], %153 {strides = array<i32>} : memref<72x256xf32, #tpu.memory_space<vmem>>, vector<8x256xf32>,
    %c1_143 = arith.constant 1 : index
    %c0_144 = arith.constant 0 : index
    %c128_145 = arith.constant 128 : index
    %155 = vector.load %arg6[%c1_143, %c0_144, %c128_145] : memref<10x8x512xf32, #tpu.memory_space<vmem>>, vector<1x8x256xf32>
    %156 = vector.shape_cast %155 : vector<1x8x256xf32> to vector<8x256xf32>
    %c32_146 = arith.constant 32 : index
    %c0_147 = arith.constant 0 : index
    %157 = vector.load %arg7[%c32_146, %c0_147] : memref<72x256xf32, #tpu.memory_space<vmem>>, vector<8x256xf32>
    tpu.vector_store %arg7[%c32_146, %c0_147], %156 {strides = array<i32>} : memref<72x256xf32, #tpu.memory_space<vmem>>, vector<8x256xf32>,
    %c1_148 = arith.constant 1 : index
    %c0_149 = arith.constant 0 : index
    %c129_150 = arith.constant 129 : index
    %158 = vector.load %arg6[%c1_148, %c0_149, %c129_150] : memref<10x8x512xf32, #tpu.memory_space<vmem>>, vector<1x8x256xf32>
    %159 = vector.shape_cast %158 : vector<1x8x256xf32> to vector<8x256xf32>
    %160 = arith.mulf %159, %5 : vector<8x256xf32>
    %c40_151 = arith.constant 40 : index
    %c0_152 = arith.constant 0 : index
    %161 = vector.load %arg7[%c40_151, %c0_152] : memref<72x256xf32, #tpu.memory_space<vmem>>, vector<8x256xf32>
    tpu.vector_store %arg7[%c40_151, %c0_152], %160 {strides = array<i32>} : memref<72x256xf32, #tpu.memory_space<vmem>>, vector<8x256xf32>,
    %c1_153 = arith.constant 1 : index
    %c0_154 = arith.constant 0 : index
    %c143_155 = arith.constant 143 : index
    %162 = vector.load %arg6[%c1_153, %c0_154, %c143_155] : memref<10x8x512xf32, #tpu.memory_space<vmem>>, vector<1x8x256xf32>
    %163 = vector.shape_cast %162 : vector<1x8x256xf32> to vector<8x256xf32>
    %164 = arith.mulf %163, %2 : vector<8x256xf32>
    %c48_156 = arith.constant 48 : index
    %c0_157 = arith.constant 0 : index
    %165 = vector.load %arg7[%c48_156, %c0_157] : memref<72x256xf32, #tpu.memory_space<vmem>>, vector<8x256xf32>
    tpu.vector_store %arg7[%c48_156, %c0_157], %164 {strides = array<i32>} : memref<72x256xf32, #tpu.memory_space<vmem>>, vector<8x256xf32>,
    %c1_158 = arith.constant 1 : index
    %c0_159 = arith.constant 0 : index
    %c144_160 = arith.constant 144 : index
    %166 = vector.load %arg6[%c1_158, %c0_159, %c144_160] : memref<10x8x512xf32, #tpu.memory_space<vmem>>, vector<1x8x256xf32>
    %167 = vector.shape_cast %166 : vector<1x8x256xf32> to vector<8x256xf32>
    %c56_161 = arith.constant 56 : index
    %c0_162 = arith.constant 0 : index
    %168 = vector.load %arg7[%c56_161, %c0_162] : memref<72x256xf32, #tpu.memory_space<vmem>>, vector<8x256xf32>
    tpu.vector_store %arg7[%c56_161, %c0_162], %167 {strides = array<i32>} : memref<72x256xf32, #tpu.memory_space<vmem>>, vector<8x256xf32>,
    %c1_163 = arith.constant 1 : index
    %c0_164 = arith.constant 0 : index
    %c145_165 = arith.constant 145 : index
    %169 = vector.load %arg6[%c1_163, %c0_164, %c145_165] : memref<10x8x512xf32, #tpu.memory_space<vmem>>, vector<1x8x256xf32>
    %170 = vector.shape_cast %169 : vector<1x8x256xf32> to vector<8x256xf32>
    %171 = arith.mulf %170, %5 : vector<8x256xf32>
    %c64_166 = arith.constant 64 : index
    %c0_167 = arith.constant 0 : index
    %172 = vector.load %arg7[%c64_166, %c0_167] : memref<72x256xf32, #tpu.memory_space<vmem>>, vector<8x256xf32>
    tpu.vector_store %arg7[%c64_166, %c0_167], %171 {strides = array<i32>} : memref<72x256xf32, #tpu.memory_space<vmem>>, vector<8x256xf32>,
    %c1_168 = arith.constant 1 : index
    %c0_169 = arith.constant 0 : index
    %c0_170 = arith.constant 0 : index
    %173 = vector.load %arg2[%c1_168, %c0_169, %c0_170] : memref<10x4x72xf32, #tpu.memory_space<vmem>>, vector<1x4x72xf32>
    %174 = vector.shape_cast %173 : vector<1x4x72xf32> to vector<4x72xf32>
    %c0_171 = arith.constant 0 : index
    %c0_172 = arith.constant 0 : index
    %175 = vector.load %arg7[%c0_171, %c0_172] : memref<72x256xf32, #tpu.memory_space<vmem>>, vector<72x256xf32>
    %cst_173 = arith.constant dense<0.000000e+00> : vector<4x256xf32>
    %176 = tpu.matmul %174, %175, %cst_173 {dimension_numbers = #tpu.dot_dimension_numbers<[1], [0], [0], [1], [0, 0, 1, 1], [], []>} : vector<4x72xf32>, vector<72x256xf32>, vector<4x256xf32> -> vector<4x256xf32>
    %c1_174 = arith.constant 1 : index
    %c0_175 = arith.constant 0 : index
    %c128_176 = arith.constant 128 : index
    %177 = vector.load %arg6[%c1_174, %c0_175, %c128_176] : memref<10x8x512xf32, #tpu.memory_space<vmem>>, vector<1x4x256xf32>
    %178 = vector.shape_cast %177 : vector<1x4x256xf32> to vector<4x256xf32>
    %c1_177 = arith.constant 1 : index
    %c0_178 = arith.constant 0 : index
    %c0_179 = arith.constant 0 : index
    %179 = vector.load %arg3[%c1_177, %c0_178, %c0_179] : memref<10x4x1xf32, #tpu.memory_space<vmem>>, vector<1x4x1xf32>
    %180 = vector.shape_cast %179 : vector<1x4x1xf32> to vector<4x1xf32>
    %181 = vector.broadcast %180 : vector<4x1xf32> to vector<4x256xf32>
    %182 = arith.addf %176, %181 : vector<4x256xf32>
    %183 = arith.addf %182, %178 : vector<4x256xf32>
    %cst_180 = arith.constant 0.000000e+00 : f32
    %184 = vector.broadcast %cst_180 : f32 to vector<4x256xf32>
    %185 = arith.maximumf %183, %184 : vector<4x256xf32>
    %c2_181 = arith.constant 2 : index
    %c0_182 = arith.constant 0 : index
    %c128_183 = arith.constant 128 : index
    %186 = vector.load %arg6[%c2_181, %c0_182, %c128_183] : memref<10x8x512xf32, #tpu.memory_space<vmem>>, vector<1x4x256xf32>
    %187 = vector.shape_cast %186 : vector<1x4x256xf32> to vector<4x256xf32>
    %188 = vector.shape_cast %185 : vector<4x256xf32> to vector<1x4x256xf32>
    tpu.vector_store %arg6[%c2_181, %c0_182, %c128_183], %188 {strides = array<i32>} : memref<10x8x512xf32, #tpu.memory_space<vmem>>, vector<1x4x256xf32>,
    %c9_184 = arith.constant 9 : index
    %c4_185 = arith.constant 4 : index
    %c128_186 = arith.constant 128 : index
    %189 = vector.load %arg6[%c9_184, %c4_185, %c128_186] : memref<10x8x512xf32, #tpu.memory_space<vmem>>, vector<1x4x256xf32>
    %190 = vector.shape_cast %189 : vector<1x4x256xf32> to vector<4x256xf32>
    %191 = vector.shape_cast %185 : vector<4x256xf32> to vector<1x4x256xf32>
    tpu.vector_store %arg6[%c9_184, %c4_185, %c128_186], %191 {strides = array<i32>} : memref<10x8x512xf32, #tpu.memory_space<vmem>>, vector<1x4x256xf32>,
    %c2_187 = arith.constant 2 : index
    %c0_188 = arith.constant 0 : index
    %c111_189 = arith.constant 111 : index
    %192 = vector.load %arg6[%c2_187, %c0_188, %c111_189] : memref<10x8x512xf32, #tpu.memory_space<vmem>>, vector<1x8x256xf32>
    %193 = vector.shape_cast %192 : vector<1x8x256xf32> to vector<8x256xf32>
    %194 = arith.mulf %193, %2 : vector<8x256xf32>
    %c0_190 = arith.constant 0 : index
    %c0_191 = arith.constant 0 : index
    %195 = vector.load %arg7[%c0_190, %c0_191] : memref<72x256xf32, #tpu.memory_space<vmem>>, vector<8x256xf32>
    tpu.vector_store %arg7[%c0_190, %c0_191], %194 {strides = array<i32>} : memref<72x256xf32, #tpu.memory_space<vmem>>, vector<8x256xf32>,
    %c2_192 = arith.constant 2 : index
    %c0_193 = arith.constant 0 : index
    %c112_194 = arith.constant 112 : index
    %196 = vector.load %arg6[%c2_192, %c0_193, %c112_194] : memref<10x8x512xf32, #tpu.memory_space<vmem>>, vector<1x8x256xf32>
    %197 = vector.shape_cast %196 : vector<1x8x256xf32> to vector<8x256xf32>
    %c8_195 = arith.constant 8 : index
    %c0_196 = arith.constant 0 : index
    %198 = vector.load %arg7[%c8_195, %c0_196] : memref<72x256xf32, #tpu.memory_space<vmem>>, vector<8x256xf32>
    tpu.vector_store %arg7[%c8_195, %c0_196], %197 {strides = array<i32>} : memref<72x256xf32, #tpu.memory_space<vmem>>, vector<8x256xf32>,
    %c2_197 = arith.constant 2 : index
    %c0_198 = arith.constant 0 : index
    %c113_199 = arith.constant 113 : index
    %199 = vector.load %arg6[%c2_197, %c0_198, %c113_199] : memref<10x8x512xf32, #tpu.memory_space<vmem>>, vector<1x8x256xf32>
    %200 = vector.shape_cast %199 : vector<1x8x256xf32> to vector<8x256xf32>
    %201 = arith.mulf %200, %5 : vector<8x256xf32>
    %c16_200 = arith.constant 16 : index
    %c0_201 = arith.constant 0 : index
    %202 = vector.load %arg7[%c16_200, %c0_201] : memref<72x256xf32, #tpu.memory_space<vmem>>, vector<8x256xf32>
    tpu.vector_store %arg7[%c16_200, %c0_201], %201 {strides = array<i32>} : memref<72x256xf32, #tpu.memory_space<vmem>>, vector<8x256xf32>,
    %c2_202 = arith.constant 2 : index
    %c0_203 = arith.constant 0 : index
    %c127_204 = arith.constant 127 : index
    %203 = vector.load %arg6[%c2_202, %c0_203, %c127_204] : memref<10x8x512xf32, #tpu.memory_space<vmem>>, vector<1x8x256xf32>
    %204 = vector.shape_cast %203 : vector<1x8x256xf32> to vector<8x256xf32>
    %205 = arith.mulf %204, %2 : vector<8x256xf32>
    %c24_205 = arith.constant 24 : index
    %c0_206 = arith.constant 0 : index
    %206 = vector.load %arg7[%c24_205, %c0_206] : memref<72x256xf32, #tpu.memory_space<vmem>>, vector<8x256xf32>
    tpu.vector_store %arg7[%c24_205, %c0_206], %205 {strides = array<i32>} : memref<72x256xf32, #tpu.memory_space<vmem>>, vector<8x256xf32>,
    %c2_207 = arith.constant 2 : index
    %c0_208 = arith.constant 0 : index
    %c128_209 = arith.constant 128 : index
    %207 = vector.load %arg6[%c2_207, %c0_208, %c128_209] : memref<10x8x512xf32, #tpu.memory_space<vmem>>, vector<1x8x256xf32>
    %208 = vector.shape_cast %207 : vector<1x8x256xf32> to vector<8x256xf32>
    %c32_210 = arith.constant 32 : index
    %c0_211 = arith.constant 0 : index
    %209 = vector.load %arg7[%c32_210, %c0_211] : memref<72x256xf32, #tpu.memory_space<vmem>>, vector<8x256xf32>
    tpu.vector_store %arg7[%c32_210, %c0_211], %208 {strides = array<i32>} : memref<72x256xf32, #tpu.memory_space<vmem>>, vector<8x256xf32>,
    %c2_212 = arith.constant 2 : index
    %c0_213 = arith.constant 0 : index
    %c129_214 = arith.constant 129 : index
    %210 = vector.load %arg6[%c2_212, %c0_213, %c129_214] : memref<10x8x512xf32, #tpu.memory_space<vmem>>, vector<1x8x256xf32>
    %211 = vector.shape_cast %210 : vector<1x8x256xf32> to vector<8x256xf32>
    %212 = arith.mulf %211, %5 : vector<8x256xf32>
    %c40_215 = arith.constant 40 : index
    %c0_216 = arith.constant 0 : index
    %213 = vector.load %arg7[%c40_215, %c0_216] : memref<72x256xf32, #tpu.memory_space<vmem>>, vector<8x256xf32>
    tpu.vector_store %arg7[%c40_215, %c0_216], %212 {strides = array<i32>} : memref<72x256xf32, #tpu.memory_space<vmem>>, vector<8x256xf32>,
    %c2_217 = arith.constant 2 : index
    %c0_218 = arith.constant 0 : index
    %c143_219 = arith.constant 143 : index
    %214 = vector.load %arg6[%c2_217, %c0_218, %c143_219] : memref<10x8x512xf32, #tpu.memory_space<vmem>>, vector<1x8x256xf32>
    %215 = vector.shape_cast %214 : vector<1x8x256xf32> to vector<8x256xf32>
    %216 = arith.mulf %215, %2 : vector<8x256xf32>
    %c48_220 = arith.constant 48 : index
    %c0_221 = arith.constant 0 : index
    %217 = vector.load %arg7[%c48_220, %c0_221] : memref<72x256xf32, #tpu.memory_space<vmem>>, vector<8x256xf32>
    tpu.vector_store %arg7[%c48_220, %c0_221], %216 {strides = array<i32>} : memref<72x256xf32, #tpu.memory_space<vmem>>, vector<8x256xf32>,
    %c2_222 = arith.constant 2 : index
    %c0_223 = arith.constant 0 : index
    %c144_224 = arith.constant 144 : index
    %218 = vector.load %arg6[%c2_222, %c0_223, %c144_224] : memref<10x8x512xf32, #tpu.memory_space<vmem>>, vector<1x8x256xf32>
    %219 = vector.shape_cast %218 : vector<1x8x256xf32> to vector<8x256xf32>
    %c56_225 = arith.constant 56 : index
    %c0_226 = arith.constant 0 : index
    %220 = vector.load %arg7[%c56_225, %c0_226] : memref<72x256xf32, #tpu.memory_space<vmem>>, vector<8x256xf32>
    tpu.vector_store %arg7[%c56_225, %c0_226], %219 {strides = array<i32>} : memref<72x256xf32, #tpu.memory_space<vmem>>, vector<8x256xf32>,
    %c2_227 = arith.constant 2 : index
    %c0_228 = arith.constant 0 : index
    %c145_229 = arith.constant 145 : index
    %221 = vector.load %arg6[%c2_227, %c0_228, %c145_229] : memref<10x8x512xf32, #tpu.memory_space<vmem>>, vector<1x8x256xf32>
    %222 = vector.shape_cast %221 : vector<1x8x256xf32> to vector<8x256xf32>
    %223 = arith.mulf %222, %5 : vector<8x256xf32>
    %c64_230 = arith.constant 64 : index
    %c0_231 = arith.constant 0 : index
    %224 = vector.load %arg7[%c64_230, %c0_231] : memref<72x256xf32, #tpu.memory_space<vmem>>, vector<8x256xf32>
    tpu.vector_store %arg7[%c64_230, %c0_231], %223 {strides = array<i32>} : memref<72x256xf32, #tpu.memory_space<vmem>>, vector<8x256xf32>,
    %c2_232 = arith.constant 2 : index
    %c0_233 = arith.constant 0 : index
    %c0_234 = arith.constant 0 : index
    %225 = vector.load %arg2[%c2_232, %c0_233, %c0_234] : memref<10x4x72xf32, #tpu.memory_space<vmem>>, vector<1x4x72xf32>
    %226 = vector.shape_cast %225 : vector<1x4x72xf32> to vector<4x72xf32>
    %c0_235 = arith.constant 0 : index
    %c0_236 = arith.constant 0 : index
    %227 = vector.load %arg7[%c0_235, %c0_236] : memref<72x256xf32, #tpu.memory_space<vmem>>, vector<72x256xf32>
    %cst_237 = arith.constant dense<0.000000e+00> : vector<4x256xf32>
    %228 = tpu.matmul %226, %227, %cst_237 {dimension_numbers = #tpu.dot_dimension_numbers<[1], [0], [0], [1], [0, 0, 1, 1], [], []>} : vector<4x72xf32>, vector<72x256xf32>, vector<4x256xf32> -> vector<4x256xf32>
    %c2_238 = arith.constant 2 : index
    %c0_239 = arith.constant 0 : index
    %c128_240 = arith.constant 128 : index
    %229 = vector.load %arg6[%c2_238, %c0_239, %c128_240] : memref<10x8x512xf32, #tpu.memory_space<vmem>>, vector<1x4x256xf32>
    %230 = vector.shape_cast %229 : vector<1x4x256xf32> to vector<4x256xf32>
    %c2_241 = arith.constant 2 : index
    %c0_242 = arith.constant 0 : index
    %c0_243 = arith.constant 0 : index
    %231 = vector.load %arg3[%c2_241, %c0_242, %c0_243] : memref<10x4x1xf32, #tpu.memory_space<vmem>>, vector<1x4x1xf32>
    %232 = vector.shape_cast %231 : vector<1x4x1xf32> to vector<4x1xf32>
    %233 = vector.broadcast %232 : vector<4x1xf32> to vector<4x256xf32>
    %234 = arith.addf %228, %233 : vector<4x256xf32>
    %235 = arith.addf %234, %230 : vector<4x256xf32>
    %cst_244 = arith.constant 0.000000e+00 : f32
    %236 = vector.broadcast %cst_244 : f32 to vector<4x256xf32>
    %237 = arith.maximumf %235, %236 : vector<4x256xf32>
    %c3_245 = arith.constant 3 : index
    %c0_246 = arith.constant 0 : index
    %c128_247 = arith.constant 128 : index
    %238 = vector.load %arg6[%c3_245, %c0_246, %c128_247] : memref<10x8x512xf32, #tpu.memory_space<vmem>>, vector<1x4x256xf32>
    %239 = vector.shape_cast %238 : vector<1x4x256xf32> to vector<4x256xf32>
    %240 = vector.shape_cast %237 : vector<4x256xf32> to vector<1x4x256xf32>
    tpu.vector_store %arg6[%c3_245, %c0_246, %c128_247], %240 {strides = array<i32>} : memref<10x8x512xf32, #tpu.memory_space<vmem>>, vector<1x4x256xf32>,
    %c8_248 = arith.constant 8 : index
    %c4_249 = arith.constant 4 : index
    %c128_250 = arith.constant 128 : index
    %241 = vector.load %arg6[%c8_248, %c4_249, %c128_250] : memref<10x8x512xf32, #tpu.memory_space<vmem>>, vector<1x4x256xf32>
    %242 = vector.shape_cast %241 : vector<1x4x256xf32> to vector<4x256xf32>
    %243 = vector.shape_cast %237 : vector<4x256xf32> to vector<1x4x256xf32>
    tpu.vector_store %arg6[%c8_248, %c4_249, %c128_250], %243 {strides = array<i32>} : memref<10x8x512xf32, #tpu.memory_space<vmem>>, vector<1x4x256xf32>,
    %c3_251 = arith.constant 3 : index
    %c0_252 = arith.constant 0 : index
    %c111_253 = arith.constant 111 : index
    %244 = vector.load %arg6[%c3_251, %c0_252, %c111_253] : memref<10x8x512xf32, #tpu.memory_space<vmem>>, vector<1x8x256xf32>
    %245 = vector.shape_cast %244 : vector<1x8x256xf32> to vector<8x256xf32>
    %246 = arith.mulf %245, %2 : vector<8x256xf32>
    %c0_254 = arith.constant 0 : index
    %c0_255 = arith.constant 0 : index
    %247 = vector.load %arg7[%c0_254, %c0_255] : memref<72x256xf32, #tpu.memory_space<vmem>>, vector<8x256xf32>
    tpu.vector_store %arg7[%c0_254, %c0_255], %246 {strides = array<i32>} : memref<72x256xf32, #tpu.memory_space<vmem>>, vector<8x256xf32>,
    %c3_256 = arith.constant 3 : index
    %c0_257 = arith.constant 0 : index
    %c112_258 = arith.constant 112 : index
    %248 = vector.load %arg6[%c3_256, %c0_257, %c112_258] : memref<10x8x512xf32, #tpu.memory_space<vmem>>, vector<1x8x256xf32>
    %249 = vector.shape_cast %248 : vector<1x8x256xf32> to vector<8x256xf32>
    %c8_259 = arith.constant 8 : index
    %c0_260 = arith.constant 0 : index
    %250 = vector.load %arg7[%c8_259, %c0_260] : memref<72x256xf32, #tpu.memory_space<vmem>>, vector<8x256xf32>
    tpu.vector_store %arg7[%c8_259, %c0_260], %249 {strides = array<i32>} : memref<72x256xf32, #tpu.memory_space<vmem>>, vector<8x256xf32>,
    %c3_261 = arith.constant 3 : index
    %c0_262 = arith.constant 0 : index
    %c113_263 = arith.constant 113 : index
    %251 = vector.load %arg6[%c3_261, %c0_262, %c113_263] : memref<10x8x512xf32, #tpu.memory_space<vmem>>, vector<1x8x256xf32>
    %252 = vector.shape_cast %251 : vector<1x8x256xf32> to vector<8x256xf32>
    %253 = arith.mulf %252, %5 : vector<8x256xf32>
    %c16_264 = arith.constant 16 : index
    %c0_265 = arith.constant 0 : index
    %254 = vector.load %arg7[%c16_264, %c0_265] : memref<72x256xf32, #tpu.memory_space<vmem>>, vector<8x256xf32>
    tpu.vector_store %arg7[%c16_264, %c0_265], %253 {strides = array<i32>} : memref<72x256xf32, #tpu.memory_space<vmem>>, vector<8x256xf32>,
    %c3_266 = arith.constant 3 : index
    %c0_267 = arith.constant 0 : index
    %c127_268 = arith.constant 127 : index
    %255 = vector.load %arg6[%c3_266, %c0_267, %c127_268] : memref<10x8x512xf32, #tpu.memory_space<vmem>>, vector<1x8x256xf32>
    %256 = vector.shape_cast %255 : vector<1x8x256xf32> to vector<8x256xf32>
    %257 = arith.mulf %256, %2 : vector<8x256xf32>
    %c24_269 = arith.constant 24 : index
    %c0_270 = arith.constant 0 : index
    %258 = vector.load %arg7[%c24_269, %c0_270] : memref<72x256xf32, #tpu.memory_space<vmem>>, vector<8x256xf32>
    tpu.vector_store %arg7[%c24_269, %c0_270], %257 {strides = array<i32>} : memref<72x256xf32, #tpu.memory_space<vmem>>, vector<8x256xf32>,
    %c3_271 = arith.constant 3 : index
    %c0_272 = arith.constant 0 : index
    %c128_273 = arith.constant 128 : index
    %259 = vector.load %arg6[%c3_271, %c0_272, %c128_273] : memref<10x8x512xf32, #tpu.memory_space<vmem>>, vector<1x8x256xf32>
    %260 = vector.shape_cast %259 : vector<1x8x256xf32> to vector<8x256xf32>
    %c32_274 = arith.constant 32 : index
    %c0_275 = arith.constant 0 : index
    %261 = vector.load %arg7[%c32_274, %c0_275] : memref<72x256xf32, #tpu.memory_space<vmem>>, vector<8x256xf32>
    tpu.vector_store %arg7[%c32_274, %c0_275], %260 {strides = array<i32>} : memref<72x256xf32, #tpu.memory_space<vmem>>, vector<8x256xf32>,
    %c3_276 = arith.constant 3 : index
    %c0_277 = arith.constant 0 : index
    %c129_278 = arith.constant 129 : index
    %262 = vector.load %arg6[%c3_276, %c0_277, %c129_278] : memref<10x8x512xf32, #tpu.memory_space<vmem>>, vector<1x8x256xf32>
    %263 = vector.shape_cast %262 : vector<1x8x256xf32> to vector<8x256xf32>
    %264 = arith.mulf %263, %5 : vector<8x256xf32>
    %c40_279 = arith.constant 40 : index
    %c0_280 = arith.constant 0 : index
    %265 = vector.load %arg7[%c40_279, %c0_280] : memref<72x256xf32, #tpu.memory_space<vmem>>, vector<8x256xf32>
    tpu.vector_store %arg7[%c40_279, %c0_280], %264 {strides = array<i32>} : memref<72x256xf32, #tpu.memory_space<vmem>>, vector<8x256xf32>,
    %c3_281 = arith.constant 3 : index
    %c0_282 = arith.constant 0 : index
    %c143_283 = arith.constant 143 : index
    %266 = vector.load %arg6[%c3_281, %c0_282, %c143_283] : memref<10x8x512xf32, #tpu.memory_space<vmem>>, vector<1x8x256xf32>
    %267 = vector.shape_cast %266 : vector<1x8x256xf32> to vector<8x256xf32>
    %268 = arith.mulf %267, %2 : vector<8x256xf32>
    %c48_284 = arith.constant 48 : index
    %c0_285 = arith.constant 0 : index
    %269 = vector.load %arg7[%c48_284, %c0_285] : memref<72x256xf32, #tpu.memory_space<vmem>>, vector<8x256xf32>
    tpu.vector_store %arg7[%c48_284, %c0_285], %268 {strides = array<i32>} : memref<72x256xf32, #tpu.memory_space<vmem>>, vector<8x256xf32>,
    %c3_286 = arith.constant 3 : index
    %c0_287 = arith.constant 0 : index
    %c144_288 = arith.constant 144 : index
    %270 = vector.load %arg6[%c3_286, %c0_287, %c144_288] : memref<10x8x512xf32, #tpu.memory_space<vmem>>, vector<1x8x256xf32>
    %271 = vector.shape_cast %270 : vector<1x8x256xf32> to vector<8x256xf32>
    %c56_289 = arith.constant 56 : index
    %c0_290 = arith.constant 0 : index
    %272 = vector.load %arg7[%c56_289, %c0_290] : memref<72x256xf32, #tpu.memory_space<vmem>>, vector<8x256xf32>
    tpu.vector_store %arg7[%c56_289, %c0_290], %271 {strides = array<i32>} : memref<72x256xf32, #tpu.memory_space<vmem>>, vector<8x256xf32>,
    %c3_291 = arith.constant 3 : index
    %c0_292 = arith.constant 0 : index
    %c145_293 = arith.constant 145 : index
    %273 = vector.load %arg6[%c3_291, %c0_292, %c145_293] : memref<10x8x512xf32, #tpu.memory_space<vmem>>, vector<1x8x256xf32>
    %274 = vector.shape_cast %273 : vector<1x8x256xf32> to vector<8x256xf32>
    %275 = arith.mulf %274, %5 : vector<8x256xf32>
    %c64_294 = arith.constant 64 : index
    %c0_295 = arith.constant 0 : index
    %276 = vector.load %arg7[%c64_294, %c0_295] : memref<72x256xf32, #tpu.memory_space<vmem>>, vector<8x256xf32>
    tpu.vector_store %arg7[%c64_294, %c0_295], %275 {strides = array<i32>} : memref<72x256xf32, #tpu.memory_space<vmem>>, vector<8x256xf32>,
    %c3_296 = arith.constant 3 : index
    %c0_297 = arith.constant 0 : index
    %c0_298 = arith.constant 0 : index
    %277 = vector.load %arg2[%c3_296, %c0_297, %c0_298] : memref<10x4x72xf32, #tpu.memory_space<vmem>>, vector<1x4x72xf32>
    %278 = vector.shape_cast %277 : vector<1x4x72xf32> to vector<4x72xf32>
    %c0_299 = arith.constant 0 : index
    %c0_300 = arith.constant 0 : index
    %279 = vector.load %arg7[%c0_299, %c0_300] : memref<72x256xf32, #tpu.memory_space<vmem>>, vector<72x256xf32>
    %cst_301 = arith.constant dense<0.000000e+00> : vector<4x256xf32>
    %280 = tpu.matmul %278, %279, %cst_301 {dimension_numbers = #tpu.dot_dimension_numbers<[1], [0], [0], [1], [0, 0, 1, 1], [], []>} : vector<4x72xf32>, vector<72x256xf32>, vector<4x256xf32> -> vector<4x256xf32>
    %c3_302 = arith.constant 3 : index
    %c0_303 = arith.constant 0 : index
    %c128_304 = arith.constant 128 : index
    %281 = vector.load %arg6[%c3_302, %c0_303, %c128_304] : memref<10x8x512xf32, #tpu.memory_space<vmem>>, vector<1x4x256xf32>
    %282 = vector.shape_cast %281 : vector<1x4x256xf32> to vector<4x256xf32>
    %c3_305 = arith.constant 3 : index
    %c0_306 = arith.constant 0 : index
    %c0_307 = arith.constant 0 : index
    %283 = vector.load %arg3[%c3_305, %c0_306, %c0_307] : memref<10x4x1xf32, #tpu.memory_space<vmem>>, vector<1x4x1xf32>
    %284 = vector.shape_cast %283 : vector<1x4x1xf32> to vector<4x1xf32>
    %285 = vector.broadcast %284 : vector<4x1xf32> to vector<4x256xf32>
    %286 = arith.addf %280, %285 : vector<4x256xf32>
    %287 = arith.addf %286, %282 : vector<4x256xf32>
    %cst_308 = arith.constant 0.000000e+00 : f32
    %288 = vector.broadcast %cst_308 : f32 to vector<4x256xf32>
    %289 = arith.maximumf %287, %288 : vector<4x256xf32>
    %c4_309 = arith.constant 4 : index
    %c0_310 = arith.constant 0 : index
    %c128_311 = arith.constant 128 : index
    %290 = vector.load %arg6[%c4_309, %c0_310, %c128_311] : memref<10x8x512xf32, #tpu.memory_space<vmem>>, vector<1x4x256xf32>
    %291 = vector.shape_cast %290 : vector<1x4x256xf32> to vector<4x256xf32>
    %292 = vector.shape_cast %289 : vector<4x256xf32> to vector<1x4x256xf32>
    tpu.vector_store %arg6[%c4_309, %c0_310, %c128_311], %292 {strides = array<i32>} : memref<10x8x512xf32, #tpu.memory_space<vmem>>, vector<1x4x256xf32>,
    %c7_312 = arith.constant 7 : index
    %c4_313 = arith.constant 4 : index
    %c128_314 = arith.constant 128 : index
    %293 = vector.load %arg6[%c7_312, %c4_313, %c128_314] : memref<10x8x512xf32, #tpu.memory_space<vmem>>, vector<1x4x256xf32>
    %294 = vector.shape_cast %293 : vector<1x4x256xf32> to vector<4x256xf32>
    %295 = vector.shape_cast %289 : vector<4x256xf32> to vector<1x4x256xf32>
    tpu.vector_store %arg6[%c7_312, %c4_313, %c128_314], %295 {strides = array<i32>} : memref<10x8x512xf32, #tpu.memory_space<vmem>>, vector<1x4x256xf32>,
    %c4_315 = arith.constant 4 : index
    %c0_316 = arith.constant 0 : index
    %c111_317 = arith.constant 111 : index
    %296 = vector.load %arg6[%c4_315, %c0_316, %c111_317] : memref<10x8x512xf32, #tpu.memory_space<vmem>>, vector<1x8x256xf32>
    %297 = vector.shape_cast %296 : vector<1x8x256xf32> to vector<8x256xf32>
    %298 = arith.mulf %297, %2 : vector<8x256xf32>
    %c0_318 = arith.constant 0 : index
    %c0_319 = arith.constant 0 : index
    %299 = vector.load %arg7[%c0_318, %c0_319] : memref<72x256xf32, #tpu.memory_space<vmem>>, vector<8x256xf32>
    tpu.vector_store %arg7[%c0_318, %c0_319], %298 {strides = array<i32>} : memref<72x256xf32, #tpu.memory_space<vmem>>, vector<8x256xf32>,
    %c4_320 = arith.constant 4 : index
    %c0_321 = arith.constant 0 : index
    %c112_322 = arith.constant 112 : index
    %300 = vector.load %arg6[%c4_320, %c0_321, %c112_322] : memref<10x8x512xf32, #tpu.memory_space<vmem>>, vector<1x8x256xf32>
    %301 = vector.shape_cast %300 : vector<1x8x256xf32> to vector<8x256xf32>
    %c8_323 = arith.constant 8 : index
    %c0_324 = arith.constant 0 : index
    %302 = vector.load %arg7[%c8_323, %c0_324] : memref<72x256xf32, #tpu.memory_space<vmem>>, vector<8x256xf32>
    tpu.vector_store %arg7[%c8_323, %c0_324], %301 {strides = array<i32>} : memref<72x256xf32, #tpu.memory_space<vmem>>, vector<8x256xf32>,
    %c4_325 = arith.constant 4 : index
    %c0_326 = arith.constant 0 : index
    %c113_327 = arith.constant 113 : index
    %303 = vector.load %arg6[%c4_325, %c0_326, %c113_327] : memref<10x8x512xf32, #tpu.memory_space<vmem>>, vector<1x8x256xf32>
    %304 = vector.shape_cast %303 : vector<1x8x256xf32> to vector<8x256xf32>
    %305 = arith.mulf %304, %5 : vector<8x256xf32>
    %c16_328 = arith.constant 16 : index
    %c0_329 = arith.constant 0 : index
    %306 = vector.load %arg7[%c16_328, %c0_329] : memref<72x256xf32, #tpu.memory_space<vmem>>, vector<8x256xf32>
    tpu.vector_store %arg7[%c16_328, %c0_329], %305 {strides = array<i32>} : memref<72x256xf32, #tpu.memory_space<vmem>>, vector<8x256xf32>,
    %c4_330 = arith.constant 4 : index
    %c0_331 = arith.constant 0 : index
    %c127_332 = arith.constant 127 : index
    %307 = vector.load %arg6[%c4_330, %c0_331, %c127_332] : memref<10x8x512xf32, #tpu.memory_space<vmem>>, vector<1x8x256xf32>
    %308 = vector.shape_cast %307 : vector<1x8x256xf32> to vector<8x256xf32>
    %309 = arith.mulf %308, %2 : vector<8x256xf32>
    %c24_333 = arith.constant 24 : index
    %c0_334 = arith.constant 0 : index
    %310 = vector.load %arg7[%c24_333, %c0_334] : memref<72x256xf32, #tpu.memory_space<vmem>>, vector<8x256xf32>
    tpu.vector_store %arg7[%c24_333, %c0_334], %309 {strides = array<i32>} : memref<72x256xf32, #tpu.memory_space<vmem>>, vector<8x256xf32>,
    %c4_335 = arith.constant 4 : index
    %c0_336 = arith.constant 0 : index
    %c128_337 = arith.constant 128 : index
    %311 = vector.load %arg6[%c4_335, %c0_336, %c128_337] : memref<10x8x512xf32, #tpu.memory_space<vmem>>, vector<1x8x256xf32>
    %312 = vector.shape_cast %311 : vector<1x8x256xf32> to vector<8x256xf32>
    %c32_338 = arith.constant 32 : index
    %c0_339 = arith.constant 0 : index
    %313 = vector.load %arg7[%c32_338, %c0_339] : memref<72x256xf32, #tpu.memory_space<vmem>>, vector<8x256xf32>
    tpu.vector_store %arg7[%c32_338, %c0_339], %312 {strides = array<i32>} : memref<72x256xf32, #tpu.memory_space<vmem>>, vector<8x256xf32>,
    %c4_340 = arith.constant 4 : index
    %c0_341 = arith.constant 0 : index
    %c129_342 = arith.constant 129 : index
    %314 = vector.load %arg6[%c4_340, %c0_341, %c129_342] : memref<10x8x512xf32, #tpu.memory_space<vmem>>, vector<1x8x256xf32>
    %315 = vector.shape_cast %314 : vector<1x8x256xf32> to vector<8x256xf32>
    %316 = arith.mulf %315, %5 : vector<8x256xf32>
    %c40_343 = arith.constant 40 : index
    %c0_344 = arith.constant 0 : index
    %317 = vector.load %arg7[%c40_343, %c0_344] : memref<72x256xf32, #tpu.memory_space<vmem>>, vector<8x256xf32>
    tpu.vector_store %arg7[%c40_343, %c0_344], %316 {strides = array<i32>} : memref<72x256xf32, #tpu.memory_space<vmem>>, vector<8x256xf32>,
    %c4_345 = arith.constant 4 : index
    %c0_346 = arith.constant 0 : index
    %c143_347 = arith.constant 143 : index
    %318 = vector.load %arg6[%c4_345, %c0_346, %c143_347] : memref<10x8x512xf32, #tpu.memory_space<vmem>>, vector<1x8x256xf32>
    %319 = vector.shape_cast %318 : vector<1x8x256xf32> to vector<8x256xf32>
    %320 = arith.mulf %319, %2 : vector<8x256xf32>
    %c48_348 = arith.constant 48 : index
    %c0_349 = arith.constant 0 : index
    %321 = vector.load %arg7[%c48_348, %c0_349] : memref<72x256xf32, #tpu.memory_space<vmem>>, vector<8x256xf32>
    tpu.vector_store %arg7[%c48_348, %c0_349], %320 {strides = array<i32>} : memref<72x256xf32, #tpu.memory_space<vmem>>, vector<8x256xf32>,
    %c4_350 = arith.constant 4 : index
    %c0_351 = arith.constant 0 : index
    %c144_352 = arith.constant 144 : index
    %322 = vector.load %arg6[%c4_350, %c0_351, %c144_352] : memref<10x8x512xf32, #tpu.memory_space<vmem>>, vector<1x8x256xf32>
    %323 = vector.shape_cast %322 : vector<1x8x256xf32> to vector<8x256xf32>
    %c56_353 = arith.constant 56 : index
    %c0_354 = arith.constant 0 : index
    %324 = vector.load %arg7[%c56_353, %c0_354] : memref<72x256xf32, #tpu.memory_space<vmem>>, vector<8x256xf32>
    tpu.vector_store %arg7[%c56_353, %c0_354], %323 {strides = array<i32>} : memref<72x256xf32, #tpu.memory_space<vmem>>, vector<8x256xf32>,
    %c4_355 = arith.constant 4 : index
    %c0_356 = arith.constant 0 : index
    %c145_357 = arith.constant 145 : index
    %325 = vector.load %arg6[%c4_355, %c0_356, %c145_357] : memref<10x8x512xf32, #tpu.memory_space<vmem>>, vector<1x8x256xf32>
    %326 = vector.shape_cast %325 : vector<1x8x256xf32> to vector<8x256xf32>
    %327 = arith.mulf %326, %5 : vector<8x256xf32>
    %c64_358 = arith.constant 64 : index
    %c0_359 = arith.constant 0 : index
    %328 = vector.load %arg7[%c64_358, %c0_359] : memref<72x256xf32, #tpu.memory_space<vmem>>, vector<8x256xf32>
    tpu.vector_store %arg7[%c64_358, %c0_359], %327 {strides = array<i32>} : memref<72x256xf32, #tpu.memory_space<vmem>>, vector<8x256xf32>,
    %c4_360 = arith.constant 4 : index
    %c0_361 = arith.constant 0 : index
    %c0_362 = arith.constant 0 : index
    %329 = vector.load %arg2[%c4_360, %c0_361, %c0_362] : memref<10x4x72xf32, #tpu.memory_space<vmem>>, vector<1x4x72xf32>
    %330 = vector.shape_cast %329 : vector<1x4x72xf32> to vector<4x72xf32>
    %c0_363 = arith.constant 0 : index
    %c0_364 = arith.constant 0 : index
    %331 = vector.load %arg7[%c0_363, %c0_364] : memref<72x256xf32, #tpu.memory_space<vmem>>, vector<72x256xf32>
    %cst_365 = arith.constant dense<0.000000e+00> : vector<4x256xf32>
    %332 = tpu.matmul %330, %331, %cst_365 {dimension_numbers = #tpu.dot_dimension_numbers<[1], [0], [0], [1], [0, 0, 1, 1], [], []>} : vector<4x72xf32>, vector<72x256xf32>, vector<4x256xf32> -> vector<4x256xf32>
    %c4_366 = arith.constant 4 : index
    %c0_367 = arith.constant 0 : index
    %c128_368 = arith.constant 128 : index
    %333 = vector.load %arg6[%c4_366, %c0_367, %c128_368] : memref<10x8x512xf32, #tpu.memory_space<vmem>>, vector<1x4x256xf32>
    %334 = vector.shape_cast %333 : vector<1x4x256xf32> to vector<4x256xf32>
    %c4_369 = arith.constant 4 : index
    %c0_370 = arith.constant 0 : index
    %c0_371 = arith.constant 0 : index
    %335 = vector.load %arg3[%c4_369, %c0_370, %c0_371] : memref<10x4x1xf32, #tpu.memory_space<vmem>>, vector<1x4x1xf32>
    %336 = vector.shape_cast %335 : vector<1x4x1xf32> to vector<4x1xf32>
    %337 = vector.broadcast %336 : vector<4x1xf32> to vector<4x256xf32>
    %338 = arith.addf %332, %337 : vector<4x256xf32>
    %339 = arith.addf %338, %334 : vector<4x256xf32>
    %cst_372 = arith.constant 0.000000e+00 : f32
    %340 = vector.broadcast %cst_372 : f32 to vector<4x256xf32>
    %341 = arith.maximumf %339, %340 : vector<4x256xf32>
    %c5_373 = arith.constant 5 : index
    %c0_374 = arith.constant 0 : index
    %c128_375 = arith.constant 128 : index
    %342 = vector.load %arg6[%c5_373, %c0_374, %c128_375] : memref<10x8x512xf32, #tpu.memory_space<vmem>>, vector<1x4x256xf32>
    %343 = vector.shape_cast %342 : vector<1x4x256xf32> to vector<4x256xf32>
    %344 = vector.shape_cast %341 : vector<4x256xf32> to vector<1x4x256xf32>
    tpu.vector_store %arg6[%c5_373, %c0_374, %c128_375], %344 {strides = array<i32>} : memref<10x8x512xf32, #tpu.memory_space<vmem>>, vector<1x4x256xf32>,
    %c6_376 = arith.constant 6 : index
    %c4_377 = arith.constant 4 : index
    %c128_378 = arith.constant 128 : index
    %345 = vector.load %arg6[%c6_376, %c4_377, %c128_378] : memref<10x8x512xf32, #tpu.memory_space<vmem>>, vector<1x4x256xf32>
    %346 = vector.shape_cast %345 : vector<1x4x256xf32> to vector<4x256xf32>
    %347 = vector.shape_cast %341 : vector<4x256xf32> to vector<1x4x256xf32>
    tpu.vector_store %arg6[%c6_376, %c4_377, %c128_378], %347 {strides = array<i32>} : memref<10x8x512xf32, #tpu.memory_space<vmem>>, vector<1x4x256xf32>,
    %c5_379 = arith.constant 5 : index
    %c0_380 = arith.constant 0 : index
    %c111_381 = arith.constant 111 : index
    %348 = vector.load %arg6[%c5_379, %c0_380, %c111_381] : memref<10x8x512xf32, #tpu.memory_space<vmem>>, vector<1x8x256xf32>
    %349 = vector.shape_cast %348 : vector<1x8x256xf32> to vector<8x256xf32>
    %350 = arith.mulf %349, %2 : vector<8x256xf32>
    %c0_382 = arith.constant 0 : index
    %c0_383 = arith.constant 0 : index
    %351 = vector.load %arg7[%c0_382, %c0_383] : memref<72x256xf32, #tpu.memory_space<vmem>>, vector<8x256xf32>
    tpu.vector_store %arg7[%c0_382, %c0_383], %350 {strides = array<i32>} : memref<72x256xf32, #tpu.memory_space<vmem>>, vector<8x256xf32>,
    %c5_384 = arith.constant 5 : index
    %c0_385 = arith.constant 0 : index
    %c112_386 = arith.constant 112 : index
    %352 = vector.load %arg6[%c5_384, %c0_385, %c112_386] : memref<10x8x512xf32, #tpu.memory_space<vmem>>, vector<1x8x256xf32>
    %353 = vector.shape_cast %352 : vector<1x8x256xf32> to vector<8x256xf32>
    %c8_387 = arith.constant 8 : index
    %c0_388 = arith.constant 0 : index
    %354 = vector.load %arg7[%c8_387, %c0_388] : memref<72x256xf32, #tpu.memory_space<vmem>>, vector<8x256xf32>
    tpu.vector_store %arg7[%c8_387, %c0_388], %353 {strides = array<i32>} : memref<72x256xf32, #tpu.memory_space<vmem>>, vector<8x256xf32>,
    %c5_389 = arith.constant 5 : index
    %c0_390 = arith.constant 0 : index
    %c113_391 = arith.constant 113 : index
    %355 = vector.load %arg6[%c5_389, %c0_390, %c113_391] : memref<10x8x512xf32, #tpu.memory_space<vmem>>, vector<1x8x256xf32>
    %356 = vector.shape_cast %355 : vector<1x8x256xf32> to vector<8x256xf32>
    %357 = arith.mulf %356, %5 : vector<8x256xf32>
    %c16_392 = arith.constant 16 : index
    %c0_393 = arith.constant 0 : index
    %358 = vector.load %arg7[%c16_392, %c0_393] : memref<72x256xf32, #tpu.memory_space<vmem>>, vector<8x256xf32>
    tpu.vector_store %arg7[%c16_392, %c0_393], %357 {strides = array<i32>} : memref<72x256xf32, #tpu.memory_space<vmem>>, vector<8x256xf32>,
    %c5_394 = arith.constant 5 : index
    %c0_395 = arith.constant 0 : index
    %c127_396 = arith.constant 127 : index
    %359 = vector.load %arg6[%c5_394, %c0_395, %c127_396] : memref<10x8x512xf32, #tpu.memory_space<vmem>>, vector<1x8x256xf32>
    %360 = vector.shape_cast %359 : vector<1x8x256xf32> to vector<8x256xf32>
    %361 = arith.mulf %360, %2 : vector<8x256xf32>
    %c24_397 = arith.constant 24 : index
    %c0_398 = arith.constant 0 : index
    %362 = vector.load %arg7[%c24_397, %c0_398] : memref<72x256xf32, #tpu.memory_space<vmem>>, vector<8x256xf32>
    tpu.vector_store %arg7[%c24_397, %c0_398], %361 {strides = array<i32>} : memref<72x256xf32, #tpu.memory_space<vmem>>, vector<8x256xf32>,
    %c5_399 = arith.constant 5 : index
    %c0_400 = arith.constant 0 : index
    %c128_401 = arith.constant 128 : index
    %363 = vector.load %arg6[%c5_399, %c0_400, %c128_401] : memref<10x8x512xf32, #tpu.memory_space<vmem>>, vector<1x8x256xf32>
    %364 = vector.shape_cast %363 : vector<1x8x256xf32> to vector<8x256xf32>
    %c32_402 = arith.constant 32 : index
    %c0_403 = arith.constant 0 : index
    %365 = vector.load %arg7[%c32_402, %c0_403] : memref<72x256xf32, #tpu.memory_space<vmem>>, vector<8x256xf32>
    tpu.vector_store %arg7[%c32_402, %c0_403], %364 {strides = array<i32>} : memref<72x256xf32, #tpu.memory_space<vmem>>, vector<8x256xf32>,
    %c5_404 = arith.constant 5 : index
    %c0_405 = arith.constant 0 : index
    %c129_406 = arith.constant 129 : index
    %366 = vector.load %arg6[%c5_404, %c0_405, %c129_406] : memref<10x8x512xf32, #tpu.memory_space<vmem>>, vector<1x8x256xf32>
    %367 = vector.shape_cast %366 : vector<1x8x256xf32> to vector<8x256xf32>
    %368 = arith.mulf %367, %5 : vector<8x256xf32>
    %c40_407 = arith.constant 40 : index
    %c0_408 = arith.constant 0 : index
    %369 = vector.load %arg7[%c40_407, %c0_408] : memref<72x256xf32, #tpu.memory_space<vmem>>, vector<8x256xf32>
    tpu.vector_store %arg7[%c40_407, %c0_408], %368 {strides = array<i32>} : memref<72x256xf32, #tpu.memory_space<vmem>>, vector<8x256xf32>,
    %c5_409 = arith.constant 5 : index
    %c0_410 = arith.constant 0 : index
    %c143_411 = arith.constant 143 : index
    %370 = vector.load %arg6[%c5_409, %c0_410, %c143_411] : memref<10x8x512xf32, #tpu.memory_space<vmem>>, vector<1x8x256xf32>
    %371 = vector.shape_cast %370 : vector<1x8x256xf32> to vector<8x256xf32>
    %372 = arith.mulf %371, %2 : vector<8x256xf32>
    %c48_412 = arith.constant 48 : index
    %c0_413 = arith.constant 0 : index
    %373 = vector.load %arg7[%c48_412, %c0_413] : memref<72x256xf32, #tpu.memory_space<vmem>>, vector<8x256xf32>
    tpu.vector_store %arg7[%c48_412, %c0_413], %372 {strides = array<i32>} : memref<72x256xf32, #tpu.memory_space<vmem>>, vector<8x256xf32>,
    %c5_414 = arith.constant 5 : index
    %c0_415 = arith.constant 0 : index
    %c144_416 = arith.constant 144 : index
    %374 = vector.load %arg6[%c5_414, %c0_415, %c144_416] : memref<10x8x512xf32, #tpu.memory_space<vmem>>, vector<1x8x256xf32>
    %375 = vector.shape_cast %374 : vector<1x8x256xf32> to vector<8x256xf32>
    %c56_417 = arith.constant 56 : index
    %c0_418 = arith.constant 0 : index
    %376 = vector.load %arg7[%c56_417, %c0_418] : memref<72x256xf32, #tpu.memory_space<vmem>>, vector<8x256xf32>
    tpu.vector_store %arg7[%c56_417, %c0_418], %375 {strides = array<i32>} : memref<72x256xf32, #tpu.memory_space<vmem>>, vector<8x256xf32>,
    %c5_419 = arith.constant 5 : index
    %c0_420 = arith.constant 0 : index
    %c145_421 = arith.constant 145 : index
    %377 = vector.load %arg6[%c5_419, %c0_420, %c145_421] : memref<10x8x512xf32, #tpu.memory_space<vmem>>, vector<1x8x256xf32>
    %378 = vector.shape_cast %377 : vector<1x8x256xf32> to vector<8x256xf32>
    %379 = arith.mulf %378, %5 : vector<8x256xf32>
    %c64_422 = arith.constant 64 : index
    %c0_423 = arith.constant 0 : index
    %380 = vector.load %arg7[%c64_422, %c0_423] : memref<72x256xf32, #tpu.memory_space<vmem>>, vector<8x256xf32>
    tpu.vector_store %arg7[%c64_422, %c0_423], %379 {strides = array<i32>} : memref<72x256xf32, #tpu.memory_space<vmem>>, vector<8x256xf32>,
    %c5_424 = arith.constant 5 : index
    %c0_425 = arith.constant 0 : index
    %c0_426 = arith.constant 0 : index
    %381 = vector.load %arg2[%c5_424, %c0_425, %c0_426] : memref<10x4x72xf32, #tpu.memory_space<vmem>>, vector<1x4x72xf32>
    %382 = vector.shape_cast %381 : vector<1x4x72xf32> to vector<4x72xf32>
    %c0_427 = arith.constant 0 : index
    %c0_428 = arith.constant 0 : index
    %383 = vector.load %arg7[%c0_427, %c0_428] : memref<72x256xf32, #tpu.memory_space<vmem>>, vector<72x256xf32>
    %cst_429 = arith.constant dense<0.000000e+00> : vector<4x256xf32>
    %384 = tpu.matmul %382, %383, %cst_429 {dimension_numbers = #tpu.dot_dimension_numbers<[1], [0], [0], [1], [0, 0, 1, 1], [], []>} : vector<4x72xf32>, vector<72x256xf32>, vector<4x256xf32> -> vector<4x256xf32>
    %c5_430 = arith.constant 5 : index
    %c0_431 = arith.constant 0 : index
    %c128_432 = arith.constant 128 : index
    %385 = vector.load %arg6[%c5_430, %c0_431, %c128_432] : memref<10x8x512xf32, #tpu.memory_space<vmem>>, vector<1x4x256xf32>
    %386 = vector.shape_cast %385 : vector<1x4x256xf32> to vector<4x256xf32>
    %c5_433 = arith.constant 5 : index
    %c0_434 = arith.constant 0 : index
    %c0_435 = arith.constant 0 : index
    %387 = vector.load %arg3[%c5_433, %c0_434, %c0_435] : memref<10x4x1xf32, #tpu.memory_space<vmem>>, vector<1x4x1xf32>
    %388 = vector.shape_cast %387 : vector<1x4x1xf32> to vector<4x1xf32>
    %389 = vector.broadcast %388 : vector<4x1xf32> to vector<4x256xf32>
    %390 = arith.addf %384, %389 : vector<4x256xf32>
    %391 = arith.addf %390, %386 : vector<4x256xf32>
    %cst_436 = arith.constant 0.000000e+00 : f32
    %392 = vector.broadcast %cst_436 : f32 to vector<4x256xf32>
    %393 = arith.maximumf %391, %392 : vector<4x256xf32>
    %c6_437 = arith.constant 6 : index
    %c0_438 = arith.constant 0 : index
    %c128_439 = arith.constant 128 : index
    %394 = vector.load %arg6[%c6_437, %c0_438, %c128_439] : memref<10x8x512xf32, #tpu.memory_space<vmem>>, vector<1x4x256xf32>
    %395 = vector.shape_cast %394 : vector<1x4x256xf32> to vector<4x256xf32>
    %396 = vector.shape_cast %393 : vector<4x256xf32> to vector<1x4x256xf32>
    tpu.vector_store %arg6[%c6_437, %c0_438, %c128_439], %396 {strides = array<i32>} : memref<10x8x512xf32, #tpu.memory_space<vmem>>, vector<1x4x256xf32>,
    %c6_440 = arith.constant 6 : index
    %c0_441 = arith.constant 0 : index
    %c111_442 = arith.constant 111 : index
    %397 = vector.load %arg6[%c6_440, %c0_441, %c111_442] : memref<10x8x512xf32, #tpu.memory_space<vmem>>, vector<1x8x256xf32>
    %398 = vector.shape_cast %397 : vector<1x8x256xf32> to vector<8x256xf32>
    %399 = arith.mulf %398, %2 : vector<8x256xf32>
    %c0_443 = arith.constant 0 : index
    %c0_444 = arith.constant 0 : index
    %400 = vector.load %arg7[%c0_443, %c0_444] : memref<72x256xf32, #tpu.memory_space<vmem>>, vector<8x256xf32>
    tpu.vector_store %arg7[%c0_443, %c0_444], %399 {strides = array<i32>} : memref<72x256xf32, #tpu.memory_space<vmem>>, vector<8x256xf32>,
    %c6_445 = arith.constant 6 : index
    %c0_446 = arith.constant 0 : index
    %c112_447 = arith.constant 112 : index
    %401 = vector.load %arg6[%c6_445, %c0_446, %c112_447] : memref<10x8x512xf32, #tpu.memory_space<vmem>>, vector<1x8x256xf32>
    %402 = vector.shape_cast %401 : vector<1x8x256xf32> to vector<8x256xf32>
    %c8_448 = arith.constant 8 : index
    %c0_449 = arith.constant 0 : index
    %403 = vector.load %arg7[%c8_448, %c0_449] : memref<72x256xf32, #tpu.memory_space<vmem>>, vector<8x256xf32>
    tpu.vector_store %arg7[%c8_448, %c0_449], %402 {strides = array<i32>} : memref<72x256xf32, #tpu.memory_space<vmem>>, vector<8x256xf32>,
    %c6_450 = arith.constant 6 : index
    %c0_451 = arith.constant 0 : index
    %c113_452 = arith.constant 113 : index
    %404 = vector.load %arg6[%c6_450, %c0_451, %c113_452] : memref<10x8x512xf32, #tpu.memory_space<vmem>>, vector<1x8x256xf32>
    %405 = vector.shape_cast %404 : vector<1x8x256xf32> to vector<8x256xf32>
    %406 = arith.mulf %405, %5 : vector<8x256xf32>
    %c16_453 = arith.constant 16 : index
    %c0_454 = arith.constant 0 : index
    %407 = vector.load %arg7[%c16_453, %c0_454] : memref<72x256xf32, #tpu.memory_space<vmem>>, vector<8x256xf32>
    tpu.vector_store %arg7[%c16_453, %c0_454], %406 {strides = array<i32>} : memref<72x256xf32, #tpu.memory_space<vmem>>, vector<8x256xf32>,
    %c6_455 = arith.constant 6 : index
    %c0_456 = arith.constant 0 : index
    %c127_457 = arith.constant 127 : index
    %408 = vector.load %arg6[%c6_455, %c0_456, %c127_457] : memref<10x8x512xf32, #tpu.memory_space<vmem>>, vector<1x8x256xf32>
    %409 = vector.shape_cast %408 : vector<1x8x256xf32> to vector<8x256xf32>
    %410 = arith.mulf %409, %2 : vector<8x256xf32>
    %c24_458 = arith.constant 24 : index
    %c0_459 = arith.constant 0 : index
    %411 = vector.load %arg7[%c24_458, %c0_459] : memref<72x256xf32, #tpu.memory_space<vmem>>, vector<8x256xf32>
    tpu.vector_store %arg7[%c24_458, %c0_459], %410 {strides = array<i32>} : memref<72x256xf32, #tpu.memory_space<vmem>>, vector<8x256xf32>,
    %c6_460 = arith.constant 6 : index
    %c0_461 = arith.constant 0 : index
    %c128_462 = arith.constant 128 : index
    %412 = vector.load %arg6[%c6_460, %c0_461, %c128_462] : memref<10x8x512xf32, #tpu.memory_space<vmem>>, vector<1x8x256xf32>
    %413 = vector.shape_cast %412 : vector<1x8x256xf32> to vector<8x256xf32>
    %c32_463 = arith.constant 32 : index
    %c0_464 = arith.constant 0 : index
    %414 = vector.load %arg7[%c32_463, %c0_464] : memref<72x256xf32, #tpu.memory_space<vmem>>, vector<8x256xf32>
    tpu.vector_store %arg7[%c32_463, %c0_464], %413 {strides = array<i32>} : memref<72x256xf32, #tpu.memory_space<vmem>>, vector<8x256xf32>,
    %c6_465 = arith.constant 6 : index
    %c0_466 = arith.constant 0 : index
    %c129_467 = arith.constant 129 : index
    %415 = vector.load %arg6[%c6_465, %c0_466, %c129_467] : memref<10x8x512xf32, #tpu.memory_space<vmem>>, vector<1x8x256xf32>
    %416 = vector.shape_cast %415 : vector<1x8x256xf32> to vector<8x256xf32>
    %417 = arith.mulf %416, %5 : vector<8x256xf32>
    %c40_468 = arith.constant 40 : index
    %c0_469 = arith.constant 0 : index
    %418 = vector.load %arg7[%c40_468, %c0_469] : memref<72x256xf32, #tpu.memory_space<vmem>>, vector<8x256xf32>
    tpu.vector_store %arg7[%c40_468, %c0_469], %417 {strides = array<i32>} : memref<72x256xf32, #tpu.memory_space<vmem>>, vector<8x256xf32>,
    %c6_470 = arith.constant 6 : index
    %c0_471 = arith.constant 0 : index
    %c143_472 = arith.constant 143 : index
    %419 = vector.load %arg6[%c6_470, %c0_471, %c143_472] : memref<10x8x512xf32, #tpu.memory_space<vmem>>, vector<1x8x256xf32>
    %420 = vector.shape_cast %419 : vector<1x8x256xf32> to vector<8x256xf32>
    %421 = arith.mulf %420, %2 : vector<8x256xf32>
    %c48_473 = arith.constant 48 : index
    %c0_474 = arith.constant 0 : index
    %422 = vector.load %arg7[%c48_473, %c0_474] : memref<72x256xf32, #tpu.memory_space<vmem>>, vector<8x256xf32>
    tpu.vector_store %arg7[%c48_473, %c0_474], %421 {strides = array<i32>} : memref<72x256xf32, #tpu.memory_space<vmem>>, vector<8x256xf32>,
    %c6_475 = arith.constant 6 : index
    %c0_476 = arith.constant 0 : index
    %c144_477 = arith.constant 144 : index
    %423 = vector.load %arg6[%c6_475, %c0_476, %c144_477] : memref<10x8x512xf32, #tpu.memory_space<vmem>>, vector<1x8x256xf32>
    %424 = vector.shape_cast %423 : vector<1x8x256xf32> to vector<8x256xf32>
    %c56_478 = arith.constant 56 : index
    %c0_479 = arith.constant 0 : index
    %425 = vector.load %arg7[%c56_478, %c0_479] : memref<72x256xf32, #tpu.memory_space<vmem>>, vector<8x256xf32>
    tpu.vector_store %arg7[%c56_478, %c0_479], %424 {strides = array<i32>} : memref<72x256xf32, #tpu.memory_space<vmem>>, vector<8x256xf32>,
    %c6_480 = arith.constant 6 : index
    %c0_481 = arith.constant 0 : index
    %c145_482 = arith.constant 145 : index
    %426 = vector.load %arg6[%c6_480, %c0_481, %c145_482] : memref<10x8x512xf32, #tpu.memory_space<vmem>>, vector<1x8x256xf32>
    %427 = vector.shape_cast %426 : vector<1x8x256xf32> to vector<8x256xf32>
    %428 = arith.mulf %427, %5 : vector<8x256xf32>
    %c64_483 = arith.constant 64 : index
    %c0_484 = arith.constant 0 : index
    %429 = vector.load %arg7[%c64_483, %c0_484] : memref<72x256xf32, #tpu.memory_space<vmem>>, vector<8x256xf32>
    tpu.vector_store %arg7[%c64_483, %c0_484], %428 {strides = array<i32>} : memref<72x256xf32, #tpu.memory_space<vmem>>, vector<8x256xf32>,
    %c6_485 = arith.constant 6 : index
    %c0_486 = arith.constant 0 : index
    %c0_487 = arith.constant 0 : index
    %430 = vector.load %arg2[%c6_485, %c0_486, %c0_487] : memref<10x4x72xf32, #tpu.memory_space<vmem>>, vector<1x4x72xf32>
    %431 = vector.shape_cast %430 : vector<1x4x72xf32> to vector<4x72xf32>
    %c0_488 = arith.constant 0 : index
    %c0_489 = arith.constant 0 : index
    %432 = vector.load %arg7[%c0_488, %c0_489] : memref<72x256xf32, #tpu.memory_space<vmem>>, vector<72x256xf32>
    %cst_490 = arith.constant dense<0.000000e+00> : vector<4x256xf32>
    %433 = tpu.matmul %431, %432, %cst_490 {dimension_numbers = #tpu.dot_dimension_numbers<[1], [0], [0], [1], [0, 0, 1, 1], [], []>} : vector<4x72xf32>, vector<72x256xf32>, vector<4x256xf32> -> vector<4x256xf32>
    %c6_491 = arith.constant 6 : index
    %c0_492 = arith.constant 0 : index
    %c128_493 = arith.constant 128 : index
    %434 = vector.load %arg6[%c6_491, %c0_492, %c128_493] : memref<10x8x512xf32, #tpu.memory_space<vmem>>, vector<1x4x256xf32>
    %435 = vector.shape_cast %434 : vector<1x4x256xf32> to vector<4x256xf32>
    %c6_494 = arith.constant 6 : index
    %c0_495 = arith.constant 0 : index
    %c0_496 = arith.constant 0 : index
    %436 = vector.load %arg3[%c6_494, %c0_495, %c0_496] : memref<10x4x1xf32, #tpu.memory_space<vmem>>, vector<1x4x1xf32>
    %437 = vector.shape_cast %436 : vector<1x4x1xf32> to vector<4x1xf32>
    %438 = vector.broadcast %437 : vector<4x1xf32> to vector<4x256xf32>
    %439 = arith.addf %433, %438 : vector<4x256xf32>
    %440 = arith.addf %439, %435 : vector<4x256xf32>
    %cst_497 = arith.constant 0.000000e+00 : f32
    %441 = vector.broadcast %cst_497 : f32 to vector<4x256xf32>
    %442 = arith.maximumf %440, %441 : vector<4x256xf32>
    %c7_498 = arith.constant 7 : index
    %c0_499 = arith.constant 0 : index
    %c128_500 = arith.constant 128 : index
    %443 = vector.load %arg6[%c7_498, %c0_499, %c128_500] : memref<10x8x512xf32, #tpu.memory_space<vmem>>, vector<1x4x256xf32>
    %444 = vector.shape_cast %443 : vector<1x4x256xf32> to vector<4x256xf32>
    %445 = vector.shape_cast %442 : vector<4x256xf32> to vector<1x4x256xf32>
    tpu.vector_store %arg6[%c7_498, %c0_499, %c128_500], %445 {strides = array<i32>} : memref<10x8x512xf32, #tpu.memory_space<vmem>>, vector<1x4x256xf32>,
    %c7_501 = arith.constant 7 : index
    %c0_502 = arith.constant 0 : index
    %c111_503 = arith.constant 111 : index
    %446 = vector.load %arg6[%c7_501, %c0_502, %c111_503] : memref<10x8x512xf32, #tpu.memory_space<vmem>>, vector<1x8x256xf32>
    %447 = vector.shape_cast %446 : vector<1x8x256xf32> to vector<8x256xf32>
    %448 = arith.mulf %447, %2 : vector<8x256xf32>
    %c0_504 = arith.constant 0 : index
    %c0_505 = arith.constant 0 : index
    %449 = vector.load %arg7[%c0_504, %c0_505] : memref<72x256xf32, #tpu.memory_space<vmem>>, vector<8x256xf32>
    tpu.vector_store %arg7[%c0_504, %c0_505], %448 {strides = array<i32>} : memref<72x256xf32, #tpu.memory_space<vmem>>, vector<8x256xf32>,
    %c7_506 = arith.constant 7 : index
    %c0_507 = arith.constant 0 : index
    %c112_508 = arith.constant 112 : index
    %450 = vector.load %arg6[%c7_506, %c0_507, %c112_508] : memref<10x8x512xf32, #tpu.memory_space<vmem>>, vector<1x8x256xf32>
    %451 = vector.shape_cast %450 : vector<1x8x256xf32> to vector<8x256xf32>
    %c8_509 = arith.constant 8 : index
    %c0_510 = arith.constant 0 : index
    %452 = vector.load %arg7[%c8_509, %c0_510] : memref<72x256xf32, #tpu.memory_space<vmem>>, vector<8x256xf32>
    tpu.vector_store %arg7[%c8_509, %c0_510], %451 {strides = array<i32>} : memref<72x256xf32, #tpu.memory_space<vmem>>, vector<8x256xf32>,
    %c7_511 = arith.constant 7 : index
    %c0_512 = arith.constant 0 : index
    %c113_513 = arith.constant 113 : index
    %453 = vector.load %arg6[%c7_511, %c0_512, %c113_513] : memref<10x8x512xf32, #tpu.memory_space<vmem>>, vector<1x8x256xf32>
    %454 = vector.shape_cast %453 : vector<1x8x256xf32> to vector<8x256xf32>
    %455 = arith.mulf %454, %5 : vector<8x256xf32>
    %c16_514 = arith.constant 16 : index
    %c0_515 = arith.constant 0 : index
    %456 = vector.load %arg7[%c16_514, %c0_515] : memref<72x256xf32, #tpu.memory_space<vmem>>, vector<8x256xf32>
    tpu.vector_store %arg7[%c16_514, %c0_515], %455 {strides = array<i32>} : memref<72x256xf32, #tpu.memory_space<vmem>>, vector<8x256xf32>,
    %c7_516 = arith.constant 7 : index
    %c0_517 = arith.constant 0 : index
    %c127_518 = arith.constant 127 : index
    %457 = vector.load %arg6[%c7_516, %c0_517, %c127_518] : memref<10x8x512xf32, #tpu.memory_space<vmem>>, vector<1x8x256xf32>
    %458 = vector.shape_cast %457 : vector<1x8x256xf32> to vector<8x256xf32>
    %459 = arith.mulf %458, %2 : vector<8x256xf32>
    %c24_519 = arith.constant 24 : index
    %c0_520 = arith.constant 0 : index
    %460 = vector.load %arg7[%c24_519, %c0_520] : memref<72x256xf32, #tpu.memory_space<vmem>>, vector<8x256xf32>
    tpu.vector_store %arg7[%c24_519, %c0_520], %459 {strides = array<i32>} : memref<72x256xf32, #tpu.memory_space<vmem>>, vector<8x256xf32>,
    %c7_521 = arith.constant 7 : index
    %c0_522 = arith.constant 0 : index
    %c128_523 = arith.constant 128 : index
    %461 = vector.load %arg6[%c7_521, %c0_522, %c128_523] : memref<10x8x512xf32, #tpu.memory_space<vmem>>, vector<1x8x256xf32>
    %462 = vector.shape_cast %461 : vector<1x8x256xf32> to vector<8x256xf32>
    %c32_524 = arith.constant 32 : index
    %c0_525 = arith.constant 0 : index
    %463 = vector.load %arg7[%c32_524, %c0_525] : memref<72x256xf32, #tpu.memory_space<vmem>>, vector<8x256xf32>
    tpu.vector_store %arg7[%c32_524, %c0_525], %462 {strides = array<i32>} : memref<72x256xf32, #tpu.memory_space<vmem>>, vector<8x256xf32>,
    %c7_526 = arith.constant 7 : index
    %c0_527 = arith.constant 0 : index
    %c129_528 = arith.constant 129 : index
    %464 = vector.load %arg6[%c7_526, %c0_527, %c129_528] : memref<10x8x512xf32, #tpu.memory_space<vmem>>, vector<1x8x256xf32>
    %465 = vector.shape_cast %464 : vector<1x8x256xf32> to vector<8x256xf32>
    %466 = arith.mulf %465, %5 : vector<8x256xf32>
    %c40_529 = arith.constant 40 : index
    %c0_530 = arith.constant 0 : index
    %467 = vector.load %arg7[%c40_529, %c0_530] : memref<72x256xf32, #tpu.memory_space<vmem>>, vector<8x256xf32>
    tpu.vector_store %arg7[%c40_529, %c0_530], %466 {strides = array<i32>} : memref<72x256xf32, #tpu.memory_space<vmem>>, vector<8x256xf32>,
    %c7_531 = arith.constant 7 : index
    %c0_532 = arith.constant 0 : index
    %c143_533 = arith.constant 143 : index
    %468 = vector.load %arg6[%c7_531, %c0_532, %c143_533] : memref<10x8x512xf32, #tpu.memory_space<vmem>>, vector<1x8x256xf32>
    %469 = vector.shape_cast %468 : vector<1x8x256xf32> to vector<8x256xf32>
    %470 = arith.mulf %469, %2 : vector<8x256xf32>
    %c48_534 = arith.constant 48 : index
    %c0_535 = arith.constant 0 : index
    %471 = vector.load %arg7[%c48_534, %c0_535] : memref<72x256xf32, #tpu.memory_space<vmem>>, vector<8x256xf32>
    tpu.vector_store %arg7[%c48_534, %c0_535], %470 {strides = array<i32>} : memref<72x256xf32, #tpu.memory_space<vmem>>, vector<8x256xf32>,
    %c7_536 = arith.constant 7 : index
    %c0_537 = arith.constant 0 : index
    %c144_538 = arith.constant 144 : index
    %472 = vector.load %arg6[%c7_536, %c0_537, %c144_538] : memref<10x8x512xf32, #tpu.memory_space<vmem>>, vector<1x8x256xf32>
    %473 = vector.shape_cast %472 : vector<1x8x256xf32> to vector<8x256xf32>
    %c56_539 = arith.constant 56 : index
    %c0_540 = arith.constant 0 : index
    %474 = vector.load %arg7[%c56_539, %c0_540] : memref<72x256xf32, #tpu.memory_space<vmem>>, vector<8x256xf32>
    tpu.vector_store %arg7[%c56_539, %c0_540], %473 {strides = array<i32>} : memref<72x256xf32, #tpu.memory_space<vmem>>, vector<8x256xf32>,
    %c7_541 = arith.constant 7 : index
    %c0_542 = arith.constant 0 : index
    %c145_543 = arith.constant 145 : index
    %475 = vector.load %arg6[%c7_541, %c0_542, %c145_543] : memref<10x8x512xf32, #tpu.memory_space<vmem>>, vector<1x8x256xf32>
    %476 = vector.shape_cast %475 : vector<1x8x256xf32> to vector<8x256xf32>
    %477 = arith.mulf %476, %5 : vector<8x256xf32>
    %c64_544 = arith.constant 64 : index
    %c0_545 = arith.constant 0 : index
    %478 = vector.load %arg7[%c64_544, %c0_545] : memref<72x256xf32, #tpu.memory_space<vmem>>, vector<8x256xf32>
    tpu.vector_store %arg7[%c64_544, %c0_545], %477 {strides = array<i32>} : memref<72x256xf32, #tpu.memory_space<vmem>>, vector<8x256xf32>,
    %c7_546 = arith.constant 7 : index
    %c0_547 = arith.constant 0 : index
    %c0_548 = arith.constant 0 : index
    %479 = vector.load %arg2[%c7_546, %c0_547, %c0_548] : memref<10x4x72xf32, #tpu.memory_space<vmem>>, vector<1x4x72xf32>
    %480 = vector.shape_cast %479 : vector<1x4x72xf32> to vector<4x72xf32>
    %c0_549 = arith.constant 0 : index
    %c0_550 = arith.constant 0 : index
    %481 = vector.load %arg7[%c0_549, %c0_550] : memref<72x256xf32, #tpu.memory_space<vmem>>, vector<72x256xf32>
    %cst_551 = arith.constant dense<0.000000e+00> : vector<4x256xf32>
    %482 = tpu.matmul %480, %481, %cst_551 {dimension_numbers = #tpu.dot_dimension_numbers<[1], [0], [0], [1], [0, 0, 1, 1], [], []>} : vector<4x72xf32>, vector<72x256xf32>, vector<4x256xf32> -> vector<4x256xf32>
    %c7_552 = arith.constant 7 : index
    %c0_553 = arith.constant 0 : index
    %c128_554 = arith.constant 128 : index
    %483 = vector.load %arg6[%c7_552, %c0_553, %c128_554] : memref<10x8x512xf32, #tpu.memory_space<vmem>>, vector<1x4x256xf32>
    %484 = vector.shape_cast %483 : vector<1x4x256xf32> to vector<4x256xf32>
    %c7_555 = arith.constant 7 : index
    %c0_556 = arith.constant 0 : index
    %c0_557 = arith.constant 0 : index
    %485 = vector.load %arg3[%c7_555, %c0_556, %c0_557] : memref<10x4x1xf32, #tpu.memory_space<vmem>>, vector<1x4x1xf32>
    %486 = vector.shape_cast %485 : vector<1x4x1xf32> to vector<4x1xf32>
    %487 = vector.broadcast %486 : vector<4x1xf32> to vector<4x256xf32>
    %488 = arith.addf %482, %487 : vector<4x256xf32>
    %489 = arith.addf %488, %484 : vector<4x256xf32>
    %cst_558 = arith.constant 0.000000e+00 : f32
    %490 = vector.broadcast %cst_558 : f32 to vector<4x256xf32>
    %491 = arith.maximumf %489, %490 : vector<4x256xf32>
    %c8_559 = arith.constant 8 : index
    %c0_560 = arith.constant 0 : index
    %c128_561 = arith.constant 128 : index
    %492 = vector.load %arg6[%c8_559, %c0_560, %c128_561] : memref<10x8x512xf32, #tpu.memory_space<vmem>>, vector<1x4x256xf32>
    %493 = vector.shape_cast %492 : vector<1x4x256xf32> to vector<4x256xf32>
    %494 = vector.shape_cast %491 : vector<4x256xf32> to vector<1x4x256xf32>
    tpu.vector_store %arg6[%c8_559, %c0_560, %c128_561], %494 {strides = array<i32>} : memref<10x8x512xf32, #tpu.memory_space<vmem>>, vector<1x4x256xf32>,
    %c8_562 = arith.constant 8 : index
    %c0_563 = arith.constant 0 : index
    %c111_564 = arith.constant 111 : index
    %495 = vector.load %arg6[%c8_562, %c0_563, %c111_564] : memref<10x8x512xf32, #tpu.memory_space<vmem>>, vector<1x8x256xf32>
    %496 = vector.shape_cast %495 : vector<1x8x256xf32> to vector<8x256xf32>
    %497 = arith.mulf %496, %2 : vector<8x256xf32>
    %c0_565 = arith.constant 0 : index
    %c0_566 = arith.constant 0 : index
    %498 = vector.load %arg7[%c0_565, %c0_566] : memref<72x256xf32, #tpu.memory_space<vmem>>, vector<8x256xf32>
    tpu.vector_store %arg7[%c0_565, %c0_566], %497 {strides = array<i32>} : memref<72x256xf32, #tpu.memory_space<vmem>>, vector<8x256xf32>,
    %c8_567 = arith.constant 8 : index
    %c0_568 = arith.constant 0 : index
    %c112_569 = arith.constant 112 : index
    %499 = vector.load %arg6[%c8_567, %c0_568, %c112_569] : memref<10x8x512xf32, #tpu.memory_space<vmem>>, vector<1x8x256xf32>
    %500 = vector.shape_cast %499 : vector<1x8x256xf32> to vector<8x256xf32>
    %c8_570 = arith.constant 8 : index
    %c0_571 = arith.constant 0 : index
    %501 = vector.load %arg7[%c8_570, %c0_571] : memref<72x256xf32, #tpu.memory_space<vmem>>, vector<8x256xf32>
    tpu.vector_store %arg7[%c8_570, %c0_571], %500 {strides = array<i32>} : memref<72x256xf32, #tpu.memory_space<vmem>>, vector<8x256xf32>,
    %c8_572 = arith.constant 8 : index
    %c0_573 = arith.constant 0 : index
    %c113_574 = arith.constant 113 : index
    %502 = vector.load %arg6[%c8_572, %c0_573, %c113_574] : memref<10x8x512xf32, #tpu.memory_space<vmem>>, vector<1x8x256xf32>
    %503 = vector.shape_cast %502 : vector<1x8x256xf32> to vector<8x256xf32>
    %504 = arith.mulf %503, %5 : vector<8x256xf32>
    %c16_575 = arith.constant 16 : index
    %c0_576 = arith.constant 0 : index
    %505 = vector.load %arg7[%c16_575, %c0_576] : memref<72x256xf32, #tpu.memory_space<vmem>>, vector<8x256xf32>
    tpu.vector_store %arg7[%c16_575, %c0_576], %504 {strides = array<i32>} : memref<72x256xf32, #tpu.memory_space<vmem>>, vector<8x256xf32>,
    %c8_577 = arith.constant 8 : index
    %c0_578 = arith.constant 0 : index
    %c127_579 = arith.constant 127 : index
    %506 = vector.load %arg6[%c8_577, %c0_578, %c127_579] : memref<10x8x512xf32, #tpu.memory_space<vmem>>, vector<1x8x256xf32>
    %507 = vector.shape_cast %506 : vector<1x8x256xf32> to vector<8x256xf32>
    %508 = arith.mulf %507, %2 : vector<8x256xf32>
    %c24_580 = arith.constant 24 : index
    %c0_581 = arith.constant 0 : index
    %509 = vector.load %arg7[%c24_580, %c0_581] : memref<72x256xf32, #tpu.memory_space<vmem>>, vector<8x256xf32>
    tpu.vector_store %arg7[%c24_580, %c0_581], %508 {strides = array<i32>} : memref<72x256xf32, #tpu.memory_space<vmem>>, vector<8x256xf32>,
    %c8_582 = arith.constant 8 : index
    %c0_583 = arith.constant 0 : index
    %c128_584 = arith.constant 128 : index
    %510 = vector.load %arg6[%c8_582, %c0_583, %c128_584] : memref<10x8x512xf32, #tpu.memory_space<vmem>>, vector<1x8x256xf32>
    %511 = vector.shape_cast %510 : vector<1x8x256xf32> to vector<8x256xf32>
    %c32_585 = arith.constant 32 : index
    %c0_586 = arith.constant 0 : index
    %512 = vector.load %arg7[%c32_585, %c0_586] : memref<72x256xf32, #tpu.memory_space<vmem>>, vector<8x256xf32>
    tpu.vector_store %arg7[%c32_585, %c0_586], %511 {strides = array<i32>} : memref<72x256xf32, #tpu.memory_space<vmem>>, vector<8x256xf32>,
    %c8_587 = arith.constant 8 : index
    %c0_588 = arith.constant 0 : index
    %c129_589 = arith.constant 129 : index
    %513 = vector.load %arg6[%c8_587, %c0_588, %c129_589] : memref<10x8x512xf32, #tpu.memory_space<vmem>>, vector<1x8x256xf32>
    %514 = vector.shape_cast %513 : vector<1x8x256xf32> to vector<8x256xf32>
    %515 = arith.mulf %514, %5 : vector<8x256xf32>
    %c40_590 = arith.constant 40 : index
    %c0_591 = arith.constant 0 : index
    %516 = vector.load %arg7[%c40_590, %c0_591] : memref<72x256xf32, #tpu.memory_space<vmem>>, vector<8x256xf32>
    tpu.vector_store %arg7[%c40_590, %c0_591], %515 {strides = array<i32>} : memref<72x256xf32, #tpu.memory_space<vmem>>, vector<8x256xf32>,
    %c8_592 = arith.constant 8 : index
    %c0_593 = arith.constant 0 : index
    %c143_594 = arith.constant 143 : index
    %517 = vector.load %arg6[%c8_592, %c0_593, %c143_594] : memref<10x8x512xf32, #tpu.memory_space<vmem>>, vector<1x8x256xf32>
    %518 = vector.shape_cast %517 : vector<1x8x256xf32> to vector<8x256xf32>
    %519 = arith.mulf %518, %2 : vector<8x256xf32>
    %c48_595 = arith.constant 48 : index
    %c0_596 = arith.constant 0 : index
    %520 = vector.load %arg7[%c48_595, %c0_596] : memref<72x256xf32, #tpu.memory_space<vmem>>, vector<8x256xf32>
    tpu.vector_store %arg7[%c48_595, %c0_596], %519 {strides = array<i32>} : memref<72x256xf32, #tpu.memory_space<vmem>>, vector<8x256xf32>,
    %c8_597 = arith.constant 8 : index
    %c0_598 = arith.constant 0 : index
    %c144_599 = arith.constant 144 : index
    %521 = vector.load %arg6[%c8_597, %c0_598, %c144_599] : memref<10x8x512xf32, #tpu.memory_space<vmem>>, vector<1x8x256xf32>
    %522 = vector.shape_cast %521 : vector<1x8x256xf32> to vector<8x256xf32>
    %c56_600 = arith.constant 56 : index
    %c0_601 = arith.constant 0 : index
    %523 = vector.load %arg7[%c56_600, %c0_601] : memref<72x256xf32, #tpu.memory_space<vmem>>, vector<8x256xf32>
    tpu.vector_store %arg7[%c56_600, %c0_601], %522 {strides = array<i32>} : memref<72x256xf32, #tpu.memory_space<vmem>>, vector<8x256xf32>,
    %c8_602 = arith.constant 8 : index
    %c0_603 = arith.constant 0 : index
    %c145_604 = arith.constant 145 : index
    %524 = vector.load %arg6[%c8_602, %c0_603, %c145_604] : memref<10x8x512xf32, #tpu.memory_space<vmem>>, vector<1x8x256xf32>
    %525 = vector.shape_cast %524 : vector<1x8x256xf32> to vector<8x256xf32>
    %526 = arith.mulf %525, %5 : vector<8x256xf32>
    %c64_605 = arith.constant 64 : index
    %c0_606 = arith.constant 0 : index
    %527 = vector.load %arg7[%c64_605, %c0_606] : memref<72x256xf32, #tpu.memory_space<vmem>>, vector<8x256xf32>
    tpu.vector_store %arg7[%c64_605, %c0_606], %526 {strides = array<i32>} : memref<72x256xf32, #tpu.memory_space<vmem>>, vector<8x256xf32>,
    %c8_607 = arith.constant 8 : index
    %c0_608 = arith.constant 0 : index
    %c0_609 = arith.constant 0 : index
    %528 = vector.load %arg2[%c8_607, %c0_608, %c0_609] : memref<10x4x72xf32, #tpu.memory_space<vmem>>, vector<1x4x72xf32>
    %529 = vector.shape_cast %528 : vector<1x4x72xf32> to vector<4x72xf32>
    %c0_610 = arith.constant 0 : index
    %c0_611 = arith.constant 0 : index
    %530 = vector.load %arg7[%c0_610, %c0_611] : memref<72x256xf32, #tpu.memory_space<vmem>>, vector<72x256xf32>
    %cst_612 = arith.constant dense<0.000000e+00> : vector<4x256xf32>
    %531 = tpu.matmul %529, %530, %cst_612 {dimension_numbers = #tpu.dot_dimension_numbers<[1], [0], [0], [1], [0, 0, 1, 1], [], []>} : vector<4x72xf32>, vector<72x256xf32>, vector<4x256xf32> -> vector<4x256xf32>
    %c8_613 = arith.constant 8 : index
    %c0_614 = arith.constant 0 : index
    %c128_615 = arith.constant 128 : index
    %532 = vector.load %arg6[%c8_613, %c0_614, %c128_615] : memref<10x8x512xf32, #tpu.memory_space<vmem>>, vector<1x4x256xf32>
    %533 = vector.shape_cast %532 : vector<1x4x256xf32> to vector<4x256xf32>
    %c8_616 = arith.constant 8 : index
    %c0_617 = arith.constant 0 : index
    %c0_618 = arith.constant 0 : index
    %534 = vector.load %arg3[%c8_616, %c0_617, %c0_618] : memref<10x4x1xf32, #tpu.memory_space<vmem>>, vector<1x4x1xf32>
    %535 = vector.shape_cast %534 : vector<1x4x1xf32> to vector<4x1xf32>
    %536 = vector.broadcast %535 : vector<4x1xf32> to vector<4x256xf32>
    %537 = arith.addf %531, %536 : vector<4x256xf32>
    %538 = arith.addf %537, %533 : vector<4x256xf32>
    %cst_619 = arith.constant 0.000000e+00 : f32
    %539 = vector.broadcast %cst_619 : f32 to vector<4x256xf32>
    %540 = arith.maximumf %538, %539 : vector<4x256xf32>
    %c9_620 = arith.constant 9 : index
    %c0_621 = arith.constant 0 : index
    %c128_622 = arith.constant 128 : index
    %541 = vector.load %arg6[%c9_620, %c0_621, %c128_622] : memref<10x8x512xf32, #tpu.memory_space<vmem>>, vector<1x4x256xf32>
    %542 = vector.shape_cast %541 : vector<1x4x256xf32> to vector<4x256xf32>
    %543 = vector.shape_cast %540 : vector<4x256xf32> to vector<1x4x256xf32>
    tpu.vector_store %arg6[%c9_620, %c0_621, %c128_622], %543 {strides = array<i32>} : memref<10x8x512xf32, #tpu.memory_space<vmem>>, vector<1x4x256xf32>,
    %c9_623 = arith.constant 9 : index
    %c0_624 = arith.constant 0 : index
    %c111_625 = arith.constant 111 : index
    %544 = vector.load %arg6[%c9_623, %c0_624, %c111_625] : memref<10x8x512xf32, #tpu.memory_space<vmem>>, vector<1x8x256xf32>
    %545 = vector.shape_cast %544 : vector<1x8x256xf32> to vector<8x256xf32>
    %546 = arith.mulf %545, %2 : vector<8x256xf32>
    %c0_626 = arith.constant 0 : index
    %c0_627 = arith.constant 0 : index
    %547 = vector.load %arg7[%c0_626, %c0_627] : memref<72x256xf32, #tpu.memory_space<vmem>>, vector<8x256xf32>
    tpu.vector_store %arg7[%c0_626, %c0_627], %546 {strides = array<i32>} : memref<72x256xf32, #tpu.memory_space<vmem>>, vector<8x256xf32>,
    %c9_628 = arith.constant 9 : index
    %c0_629 = arith.constant 0 : index
    %c112_630 = arith.constant 112 : index
    %548 = vector.load %arg6[%c9_628, %c0_629, %c112_630] : memref<10x8x512xf32, #tpu.memory_space<vmem>>, vector<1x8x256xf32>
    %549 = vector.shape_cast %548 : vector<1x8x256xf32> to vector<8x256xf32>
    %c8_631 = arith.constant 8 : index
    %c0_632 = arith.constant 0 : index
    %550 = vector.load %arg7[%c8_631, %c0_632] : memref<72x256xf32, #tpu.memory_space<vmem>>, vector<8x256xf32>
    tpu.vector_store %arg7[%c8_631, %c0_632], %549 {strides = array<i32>} : memref<72x256xf32, #tpu.memory_space<vmem>>, vector<8x256xf32>,
    %c9_633 = arith.constant 9 : index
    %c0_634 = arith.constant 0 : index
    %c113_635 = arith.constant 113 : index
    %551 = vector.load %arg6[%c9_633, %c0_634, %c113_635] : memref<10x8x512xf32, #tpu.memory_space<vmem>>, vector<1x8x256xf32>
    %552 = vector.shape_cast %551 : vector<1x8x256xf32> to vector<8x256xf32>
    %553 = arith.mulf %552, %5 : vector<8x256xf32>
    %c16_636 = arith.constant 16 : index
    %c0_637 = arith.constant 0 : index
    %554 = vector.load %arg7[%c16_636, %c0_637] : memref<72x256xf32, #tpu.memory_space<vmem>>, vector<8x256xf32>
    tpu.vector_store %arg7[%c16_636, %c0_637], %553 {strides = array<i32>} : memref<72x256xf32, #tpu.memory_space<vmem>>, vector<8x256xf32>,
    %c9_638 = arith.constant 9 : index
    %c0_639 = arith.constant 0 : index
    %c127_640 = arith.constant 127 : index
    %555 = vector.load %arg6[%c9_638, %c0_639, %c127_640] : memref<10x8x512xf32, #tpu.memory_space<vmem>>, vector<1x8x256xf32>
    %556 = vector.shape_cast %555 : vector<1x8x256xf32> to vector<8x256xf32>
    %557 = arith.mulf %556, %2 : vector<8x256xf32>
    %c24_641 = arith.constant 24 : index
    %c0_642 = arith.constant 0 : index
    %558 = vector.load %arg7[%c24_641, %c0_642] : memref<72x256xf32, #tpu.memory_space<vmem>>, vector<8x256xf32>
    tpu.vector_store %arg7[%c24_641, %c0_642], %557 {strides = array<i32>} : memref<72x256xf32, #tpu.memory_space<vmem>>, vector<8x256xf32>,
    %c9_643 = arith.constant 9 : index
    %c0_644 = arith.constant 0 : index
    %c128_645 = arith.constant 128 : index
    %559 = vector.load %arg6[%c9_643, %c0_644, %c128_645] : memref<10x8x512xf32, #tpu.memory_space<vmem>>, vector<1x8x256xf32>
    %560 = vector.shape_cast %559 : vector<1x8x256xf32> to vector<8x256xf32>
    %c32_646 = arith.constant 32 : index
    %c0_647 = arith.constant 0 : index
    %561 = vector.load %arg7[%c32_646, %c0_647] : memref<72x256xf32, #tpu.memory_space<vmem>>, vector<8x256xf32>
    tpu.vector_store %arg7[%c32_646, %c0_647], %560 {strides = array<i32>} : memref<72x256xf32, #tpu.memory_space<vmem>>, vector<8x256xf32>,
    %c9_648 = arith.constant 9 : index
    %c0_649 = arith.constant 0 : index
    %c129_650 = arith.constant 129 : index
    %562 = vector.load %arg6[%c9_648, %c0_649, %c129_650] : memref<10x8x512xf32, #tpu.memory_space<vmem>>, vector<1x8x256xf32>
    %563 = vector.shape_cast %562 : vector<1x8x256xf32> to vector<8x256xf32>
    %564 = arith.mulf %563, %5 : vector<8x256xf32>
    %c40_651 = arith.constant 40 : index
    %c0_652 = arith.constant 0 : index
    %565 = vector.load %arg7[%c40_651, %c0_652] : memref<72x256xf32, #tpu.memory_space<vmem>>, vector<8x256xf32>
    tpu.vector_store %arg7[%c40_651, %c0_652], %564 {strides = array<i32>} : memref<72x256xf32, #tpu.memory_space<vmem>>, vector<8x256xf32>,
    %c9_653 = arith.constant 9 : index
    %c0_654 = arith.constant 0 : index
    %c143_655 = arith.constant 143 : index
    %566 = vector.load %arg6[%c9_653, %c0_654, %c143_655] : memref<10x8x512xf32, #tpu.memory_space<vmem>>, vector<1x8x256xf32>
    %567 = vector.shape_cast %566 : vector<1x8x256xf32> to vector<8x256xf32>
    %568 = arith.mulf %567, %2 : vector<8x256xf32>
    %c48_656 = arith.constant 48 : index
    %c0_657 = arith.constant 0 : index
    %569 = vector.load %arg7[%c48_656, %c0_657] : memref<72x256xf32, #tpu.memory_space<vmem>>, vector<8x256xf32>
    tpu.vector_store %arg7[%c48_656, %c0_657], %568 {strides = array<i32>} : memref<72x256xf32, #tpu.memory_space<vmem>>, vector<8x256xf32>,
    %c9_658 = arith.constant 9 : index
    %c0_659 = arith.constant 0 : index
    %c144_660 = arith.constant 144 : index
    %570 = vector.load %arg6[%c9_658, %c0_659, %c144_660] : memref<10x8x512xf32, #tpu.memory_space<vmem>>, vector<1x8x256xf32>
    %571 = vector.shape_cast %570 : vector<1x8x256xf32> to vector<8x256xf32>
    %c56_661 = arith.constant 56 : index
    %c0_662 = arith.constant 0 : index
    %572 = vector.load %arg7[%c56_661, %c0_662] : memref<72x256xf32, #tpu.memory_space<vmem>>, vector<8x256xf32>
    tpu.vector_store %arg7[%c56_661, %c0_662], %571 {strides = array<i32>} : memref<72x256xf32, #tpu.memory_space<vmem>>, vector<8x256xf32>,
    %c9_663 = arith.constant 9 : index
    %c0_664 = arith.constant 0 : index
    %c145_665 = arith.constant 145 : index
    %573 = vector.load %arg6[%c9_663, %c0_664, %c145_665] : memref<10x8x512xf32, #tpu.memory_space<vmem>>, vector<1x8x256xf32>
    %574 = vector.shape_cast %573 : vector<1x8x256xf32> to vector<8x256xf32>
    %575 = arith.mulf %574, %5 : vector<8x256xf32>
    %c64_666 = arith.constant 64 : index
    %c0_667 = arith.constant 0 : index
    %576 = vector.load %arg7[%c64_666, %c0_667] : memref<72x256xf32, #tpu.memory_space<vmem>>, vector<8x256xf32>
    tpu.vector_store %arg7[%c64_666, %c0_667], %575 {strides = array<i32>} : memref<72x256xf32, #tpu.memory_space<vmem>>, vector<8x256xf32>,
    %c9_668 = arith.constant 9 : index
    %c0_669 = arith.constant 0 : index
    %c0_670 = arith.constant 0 : index
    %577 = vector.load %arg2[%c9_668, %c0_669, %c0_670] : memref<10x4x72xf32, #tpu.memory_space<vmem>>, vector<1x4x72xf32>
    %578 = vector.shape_cast %577 : vector<1x4x72xf32> to vector<4x72xf32>
    %c0_671 = arith.constant 0 : index
    %c0_672 = arith.constant 0 : index
    %579 = vector.load %arg7[%c0_671, %c0_672] : memref<72x256xf32, #tpu.memory_space<vmem>>, vector<72x256xf32>
    %cst_673 = arith.constant dense<0.000000e+00> : vector<4x256xf32>
    %580 = tpu.matmul %578, %579, %cst_673 {dimension_numbers = #tpu.dot_dimension_numbers<[1], [0], [0], [1], [0, 0, 1, 1], [], []>} : vector<4x72xf32>, vector<72x256xf32>, vector<4x256xf32> -> vector<4x256xf32>
    %c9_674 = arith.constant 9 : index
    %c0_675 = arith.constant 0 : index
    %c128_676 = arith.constant 128 : index
    %581 = vector.load %arg6[%c9_674, %c0_675, %c128_676] : memref<10x8x512xf32, #tpu.memory_space<vmem>>, vector<1x4x256xf32>
    %582 = vector.shape_cast %581 : vector<1x4x256xf32> to vector<4x256xf32>
    %c9_677 = arith.constant 9 : index
    %c0_678 = arith.constant 0 : index
    %c0_679 = arith.constant 0 : index
    %583 = vector.load %arg3[%c9_677, %c0_678, %c0_679] : memref<10x4x1xf32, #tpu.memory_space<vmem>>, vector<1x4x1xf32>
    %584 = vector.shape_cast %583 : vector<1x4x1xf32> to vector<4x1xf32>
    %585 = vector.broadcast %584 : vector<4x1xf32> to vector<4x256xf32>
    %586 = arith.addf %580, %585 : vector<4x256xf32>
    %587 = arith.addf %586, %582 : vector<4x256xf32>
    %cst_680 = arith.constant 0.000000e+00 : f32
    %588 = vector.broadcast %cst_680 : f32 to vector<4x256xf32>
    %589 = arith.maximumf %587, %588 : vector<4x256xf32>
    %c0_681 = arith.constant 0 : index
    %c0_682 = arith.constant 0 : index
    %c0_683 = arith.constant 0 : index
    %590 = vector.load %arg5[%c0_681, %c0_682, %c0_683] : memref<1x8x256xf32, #tpu.memory_space<vmem>>, vector<1x4x256xf32>
    %591 = vector.shape_cast %590 : vector<1x4x256xf32> to vector<4x256xf32>
    %592 = vector.shape_cast %589 : vector<4x256xf32> to vector<1x4x256xf32>
    tpu.vector_store %arg5[%c0_681, %c0_682, %c0_683], %592 {strides = array<i32>} : memref<1x8x256xf32, #tpu.memory_space<vmem>>, vector<1x4x256xf32>,
    %c1_684 = arith.constant 1 : index
    %c0_685 = arith.constant 0 : index
    %c128_686 = arith.constant 128 : index
    %593 = vector.load %arg6[%c1_684, %c0_685, %c128_686] : memref<10x8x512xf32, #tpu.memory_space<vmem>>, vector<1x4x256xf32>
    %594 = vector.shape_cast %593 : vector<1x4x256xf32> to vector<4x256xf32>
    %c0_687 = arith.constant 0 : index
    %c4_688 = arith.constant 4 : index
    %c0_689 = arith.constant 0 : index
    %595 = vector.load %arg5[%c0_687, %c4_688, %c0_689] : memref<1x8x256xf32, #tpu.memory_space<vmem>>, vector<1x4x256xf32>
    %596 = vector.shape_cast %595 : vector<1x4x256xf32> to vector<4x256xf32>
    %597 = vector.shape_cast %594 : vector<4x256xf32> to vector<1x4x256xf32>
    tpu.vector_store %arg5[%c0_687, %c4_688, %c0_689], %597 {strides = array<i32>} : memref<1x8x256xf32, #tpu.memory_space<vmem>>, vector<1x4x256xf32>,
    return
  }
  func.func @transform_0(%arg0: i32) -> (i32, i32, i32) {
    %c0_i32 = arith.constant 0 : i32
    %c0_i32_0 = arith.constant 0 : i32
    %c0_i32_1 = arith.constant 0 : i32
    return %arg0, %c0_i32, %c0_i32_0 : i32, i32, i32
  }
  func.func @transform_1(%arg0: i32) -> (i32, i32, i32) {
    %c0_i32 = arith.constant 0 : i32
    %c0_i32_0 = arith.constant 0 : i32
    %c0_i32_1 = arith.constant 0 : i32
    %c0_i32_2 = arith.constant 0 : i32
    return %c0_i32, %c0_i32_0, %c0_i32_1 : i32, i32, i32
  }
  func.func @transform_2(%arg0: i32) -> (i32, i32, i32) {
    %c0_i32 = arith.constant 0 : i32
    %c0_i32_0 = arith.constant 0 : i32
    %c0_i32_1 = arith.constant 0 : i32
    %c0_i32_2 = arith.constant 0 : i32
    return %c0_i32, %c0_i32_0, %c0_i32_1 : i32, i32, i32
  }
  func.func @transform_3(%arg0: i32) -> (i32, i32) {
    %c0_i32 = arith.constant 0 : i32
    %c0_i32_0 = arith.constant 0 : i32
    %c0_i32_1 = arith.constant 0 : i32
    return %c0_i32, %c0_i32_0 : i32, i32
  }
  func.func @transform_4(%arg0: i32) -> (i32, i32, i32) {
    %c0_i32 = arith.constant 0 : i32
    %c0_i32_0 = arith.constant 0 : i32
    %c0_i32_1 = arith.constant 0 : i32
    return %arg0, %c0_i32, %c0_i32_0 : i32, i32, i32
  }
}

</mosaic_0001>

<bundles_post_ra>
// kernel: block_forward.1
= control target key start
LH: loop header
LB: loop body
LE: loop exit
PB: predicated region body
PF: predicated region fallthrough
CT: control target
= control target key end

     0   :  { %s3786_s15 = smov 0   ;;  %s4780_s0 = inlined_call_operand.vmem [shape: f32[2,4,256], index: 0, kind: input, shape index: {}]   ;;  %s4781_s1 = inlined_call_operand.vmem [shape: f32[10,4,72], index: 1, kind: input, shape index: {}]   ;;  %s4782_s2 = inlined_call_operand.vmem [shape: f32[10,4,1], index: 2, kind: input, shape index: {}]   ;;  %s4783_s3 = inlined_call_operand.vmem [shape: f32[2,256], index: 3, kind: input, shape index: {}]   ;;  %s4784_s4 = inlined_call_operand.vmem [shape: f32[2,8,256], index: 4, kind: output, shape index: {}]  }
   0x1 LB: > { %s3168_s16 = sadd.s32 4294967295, %s3749_s15   ;;  %p3172_p0 = scmp.ge.s32.totalorder %s3749_s15, 1  ;;  %s3749_s15 = sphi %s3786_s15, %s14_s15  }
   0x2   : > { %p162_p1 = scmp.lt.s32.totalorder %s3749_s15, 3 }
   0x4   : > { %p163_p2 = pnand %p3172_p0, %p162_p1 }
   0x5   : > { %v200_v0 = vlaneseq (!%p163_p2)  ;;  %v3751_v1 = vmov (!%p163_p2), 0.0   ;;  %v3177_v3 = vld [vmem:[%s4783_s3 + $0x1] ss:$2 sm:$0x3] (!%p163_p2)  ;;  %p188_p3 = scmp.lt.s32.totalorder (!%p163_p2), %s3168_s16, 1  ;;  %s3752_s22 = smov (!%p163_p2), 113  }
   0x6   : > { %166 = sbr.rel (%p163_p2) target bundleno = 3859 (0xf13), region = 36  ;;  %219 = vst [vmem:[#allocation2] sm:$0xff] (!%p163_p2), %v3751_v1  ;;  %248 = vst [vmem:[#allocation2 + $0x8] sm:$0xf0] (!%p163_p2), %v3751_v1  ;;  %583 = vmatprep.mubr.f32.mxu0 (!%p163_p2), %v3751_v1  ;;  %858 = vmatprep.mubr.f32.mxu1 (!%p163_p2), %v3751_v1  ;;  %s3753_s23 = smov (!%p163_p2), 111   ;;  %v3757_v15 = vmov (!%p163_p2), 0  }
   0x7   : > { %249 = vst [vmem:[#allocation2 + $0x10] sm:$0xf0] (!%p163_p2), %v3751_v1  ;;  %250 = vst [vmem:[#allocation2 + $0x28] sm:$0xf0] (!%p163_p2), %v3751_v1  ;;  %v201_v2 = vshrl.u32 (!%p163_p2), %v200_v0, 7  ;;  %s3754_s27 = smov (!%p163_p2), 127   ;;  %3423 = vset.pattern.permute.xlu1 (!%p163_p2), %v3757_v15  ;;  %3739 = vset.pattern.permute.xlu0 (!%p163_p2), %v3757_v15 }
   0x8   : > { %251 = vst [vmem:[#allocation2 + $0x30] sm:$0xf0] (!%p163_p2), %v3751_v1  ;;  %252 = vst [vmem:[#allocation2 + $0x48] sm:$0xf0] (!%p163_p2), %v3751_v1  ;;  %s3755_s28 = smov (!%p163_p2), 1   ;;  %s3756_s29 = smov (!%p163_p2), 15  }
   0x9   : > { %253 = vst [vmem:[#allocation2 + $0x50] sm:$0xf0] (!%p163_p2), %v3751_v1  ;;  %254 = vst [vmem:[#allocation2 + $0x68] sm:$0xf0] (!%p163_p2), %v3751_v1  ;;  %v202_v5 = vsub.s32 (!%p163_p2), 0, %v201_v2  ;;  %v206_v6 = vsub.s32 (!%p163_p2), 1, %v201_v2 }
   0xa   : > { %255 = vst [vmem:[#allocation2 + $0x70] sm:$0xf0] (!%p163_p2), %v3751_v1  ;;  %256 = vst [vmem:[#allocation2 + $0x88] sm:$0xf0] (!%p163_p2), %v3751_v1  ;;  %s3758_s30 = smov (!%p163_p2), 17   ;;  %s3759_s5 = smov (!%p163_p2), 16  }
   0xb   : > { %257 = vst [vmem:[#allocation2 + $0x90] sm:$0xf0] (!%p163_p2), %v3751_v1  ;;  %258 = vst [vmem:[#allocation2 + $0xa8] sm:$0xf0] (!%p163_p2), %v3751_v1  ;;  %v214_v7 = vrot.slane (!%p163_p2), %v3177_v3, %v202_v5  ;;  %v218_v9 = vrot.slane (!%p163_p2), %v3177_v3, %v206_v6  ;;  %vm273_vm0 = vcmask (!%p163_p2), 908288   ;;  %vm323_vm1 = vcmask (!%p163_p2), 924672  }
   0xc   : > { %259 = vst [vmem:[#allocation2 + $0xb0] sm:$0xf0] (!%p163_p2), %v3751_v1  ;;  %v198_v4 = vld [vmem:[%s4783_s3] ss:$2 sm:$0x3] (!%p163_p2)  ;;  %vm354_vm2 = vcmask (!%p163_p2), 1039360  }
   0xd   : > { %s4786_s16 = smov (!%p188_p3, %s3168_s16), 1  ;;  %v203_v8 = vrot.slane %v198_v4, %v202_v5  ;;  %319 = vrot.lane.b32.xlu1 %v214_v7, %s3752_s22  ;;  %v207_v10 = vrot.slane %v198_v4, %v206_v6  ;;  %vm371_vm3 = vcmask 7168   ;;  %vm340_vm4 = vcmask 121856   ;;  %s3760_s6 = smov 112   ;;  %v509_v58 = vld [vmem:[%s4782_s2] sm:$0xf] }
   0xe   : > { %s3208_s21 = sshll.u32 %s4786_s16, 3  ;;  %vm290_vm5 = vcmask 138240   ;;  %vm309_vm6 = vcmask 130048   ;;  %vm452_vm7 = vcmask 916480   ;;  %vm515_vm8 = vcmask 588800   ;;  %s3209_s11 = sshll.u32 %s4786_s16, 4 }
   0xf   : > { %269 = vrot.lane.b32.xlu0 %v203_v8, %s3753_s23  ;;  %s192_s26 = scalar_lea.vmem %s4780_s0, %s3208_s21  ;;  %s4019_s14 = scalar_lea.vmem %s4784_s4, %s3209_s11 }
  0x10   : > { %v260_v11 = vld [vmem:[%s192_s26] sm:$0xff] }
  0x11   : > { %v262_v12 = vcombine.high %v260_v11, %v260_v11  ;;  %264 = vst [vmem:[#allocation2 + $0x8] sm:$0xf] %v260_v11  ;;  %321 = vrot.lane.b32.xlu1 %v218_v9, %s3752_s22 }
  0x13   : > { %271 = vrot.lane.b32.xlu0 %v207_v10, %s3753_s23  ;;  %265 = vst [vmem:[#allocation2 + $0x10] sm:$0xf] %v262_v12 }
  0x15   : > { %352 = vrot.lane.b32.xlu1 %v207_v10, %s3754_s27 }
  0x17   : > { %350 = vrot.lane.b32.xlu0 %v203_v8, %s3754_s27 }
  0x18   : > { %v3831_v13 = vld [vmem:[#allocation2 + $0x8] sm:$0xff] }
  0x19   : > { %387 = vrot.lane.b32.xlu1 %v218_v9, %s3755_s28 }
  0x1a   : > { %v3833_v14 = vld [vmem:[#allocation2 + $0x10] sm:$0xff] }
  0x1b   : > { %385 = vrot.lane.b32.xlu0 %v214_v7, %s3755_s28  ;;  %v3388_v16 = vpack.i.bf16 %v3833_v14, %v3831_v13  ;;  %v3408_v48 = vpack.i.bf16 %v3751_v1, %v3833_v14 }
  0x1d   : > { %416 = vrot.lane.b32.xlu1 %v207_v10, %s3756_s29 }
  0x1f   : > { %414 = vrot.lane.b32.xlu0 %v203_v8, %s3756_s29 }
  0x21   : > { %464 = vrot.lane.b32.xlu1 %v218_v9, %s3758_s30 }
  0x23   : > { %462 = vrot.lane.b32.xlu0 %v214_v7, %s3758_s30 }
  0x25   : > { %3389 = vrot.lane.b32.xlu1 %v3388_v16, %s3759_s5 }
  0x29   : > { %303 = vrot.lane.b32.xlu1 %v3751_v1, %s3759_s5 }
  0x7f   : > { %v3842_v17 = vpop.permute.xlu1 %319 }
  0x80   : > { %v3852_v20 = vmul.f32 0.0, %v3842_v17 }
  0x81   : > { %v3844_v18 = vpop.permute.xlu0 %269 }
  0x82   : > { %v3847_v19 = vmul.f32 0.0, %v3844_v18 }
  0x83   : > { %v3854_v21 = vpop.permute.xlu1 %321 }
  0x84   : > { %284 = vrot.lane.b32.xlu0 %v3847_v19, %s3758_s30  ;;  %v3870_v26 = vsel %vm323_vm1, %v3842_v17, %v3854_v21  ;;  %v330_v30 = vmul.f32 %v3854_v21, %v3833_v14 }
  0x85   : > { %v3856_v22 = vpop.permute.xlu0 %271  ;;  %v329_v34 = vmul.f32 %v3870_v26, %v3831_v13 }
  0x86   : > { %v3861_v23 = vsel %vm273_vm0, %v3844_v18, %v3856_v22  ;;  %v280_v24 = vmul.f32 %v3833_v14, %v3856_v22 }
  0x87   : > { %v279_v25 = vmul.f32 %v3831_v13, %v3861_v23  ;;  %v3874_v27 = vpop.permute.xlu1 %352  ;;  %v3398_v39 = vpack.i.bf16 %v330_v30, %v329_v34 }
  0x88   : > { %334 = vrot.lane.b32.xlu0 %v3852_v20, %s3756_s29  ;;  %v361_v33 = vmul.f32 %v3874_v27, %v3833_v14 }
  0x89   : > { %v3876_v28 = vpop.permute.xlu0 %350  ;;  %v3393_v29 = vpack.i.bf16 %v280_v24, %v279_v25 }
  0x8a   : > { %v3881_v31 = vmul.f32 0.0, %v3876_v28  ;;  %v3886_v32 = vsel %vm354_vm2, %v3876_v28, %v3874_v27 }
  0x8b   : > { %v360_v35 = vmul.f32 %v3886_v32, %v3831_v13  ;;  %v3897_v36 = vpop.permute.xlu1 %387 }
  0x8c   : > { %365 = vrot.lane.b32.xlu1 %v3881_v31, %s3755_s28  ;;  %3394 = vrot.lane.b32.xlu0 %v3393_v29, %s3758_s30  ;;  %v3919_v46 = vmul.f32 0.0, %v3897_v36 }
  0x8d   : > { %v3899_v37 = vpop.permute.xlu0 %385  ;;  %v3403_v38 = vpack.i.bf16 %v361_v33, %v360_v35 }
  0x8e   : > { %v3904_v40 = vsel %vm371_vm3, %v3899_v37, %v3897_v36  ;;  %v393_v43 = vmul.f32 %v3899_v37, %v3831_v13 }
  0x8f   : > { %v3908_v41 = vpop.permute.xlu1 %416  ;;  %v394_v45 = vmul.f32 %v3904_v40, %v3833_v14 }
  0x90   : > { %3404 = vrot.lane.b32.xlu1 %v3403_v38, %s3755_s28  ;;  %3399 = vrot.lane.b32.xlu0 %v3398_v39, %s3756_s29  ;;  %v3938_v53 = vmul.f32 0.0, %v3908_v41 }
  0x91   : > { %v3910_v42 = vpop.permute.xlu0 %414  ;;  %v3413_v49 = vpack.i.bf16 %v3919_v46, %v394_v45 }
  0x92   : > { %v422_v44 = vmul.f32 %v3910_v42, %v3831_v13  ;;  %v3924_v47 = vsel %vm340_vm4, %v3910_v42, %v3908_v41 }
  0x93   : > { %v3931_v50 = vpop.permute.xlu1 %464  ;;  %v423_v52 = vmul.f32 %v3924_v47, %v3833_v14 }
  0x94   : > { %399 = vrot.lane.b32.xlu1 %v393_v43, %s3754_s27  ;;  %428 = vrot.lane.b32.xlu0 %v422_v44, %s3752_s22  ;;  %v3952_v56 = vmul.f32 0.0, %v3931_v50 }
  0x95   : > { %v3933_v51 = vpop.permute.xlu0 %462  ;;  %v3418_v55 = vpack.i.bf16 %v3938_v53, %v423_v52 }
  0x96   : > { %v3945_v54 = vsel %vm290_vm5, %v3933_v51, %v3931_v50  ;;  %v470_v59 = vmul.f32 %v3933_v51, %v3831_v13 }
  0x97   : > { %v471_v57 = vmul.f32 %v3945_v54, %v3833_v14  ;;  %v3390_v60 = vpop.permute.xlu1 %3389 }
  0x98   : > { %3409 = vrot.lane.b32.xlu1 %v3408_v48, %s3760_s6  ;;  %3414 = vrot.lane.b32.xlu0 %v3413_v49, %s3754_s27  ;;  %v3392_v0 = vunpack.i.h.bf16 %v3390_v60  ;;  %v3391_v2 = vunpack.i.l.bf16 %v3390_v60 }
  0x9a   : > { %v311_v9 = vsel %vm309_vm6, %v3391_v2, %v3392_v0 }
  0x9b   : > { %v304_v62 = vpop.permute.xlu1 %303 }
  0x9c   : > { %446 = vrot.lane.b32.xlu1 %v3831_v13, %s3760_s6  ;;  %3419 = vrot.lane.b32.xlu0 %v3418_v55, %s3752_s22  ;;  %v310_v7 = vsel %vm309_vm6, %v304_v62, %v3391_v2 }
  0xa0   : > { %480 = vrot.lane.b32.xlu1 %v3952_v56, %s3753_s23  ;;  %478 = vrot.lane.b32.xlu0 %v471_v57, %s3753_s23 }
  0xa4   : > { %512 = vperm.xlu1 %3423, %v509_v58   ;;  %476 = vrot.lane.b32.xlu0 %v470_v59, %s3753_s23 }
  0xa8   : > { %623 = vrot.lane.b32.xlu1 %v3751_v1, %s3759_s5  ;;  %605 = vrot.lane.b32.xlu0 %v3847_v19, %s3758_s30 }
  0xac   : > { %665 = vrot.lane.b32.xlu1 %v3881_v31, %s3755_s28  ;;  %644 = vrot.lane.b32.xlu0 %v3852_v20, %s3756_s29 }
  0xf6   : > { %v285_v61 = vpop.permute.xlu0 %284 }
  0xfa   : > { %v335_v63 = vpop.permute.xlu0 %334 }
  0xfe   : > { %v366_v3 = vpop.permute.xlu1 %365  ;;  %v3395_v4 = vpop.permute.xlu0 %3394 }
  0xff   : > { %v3397_v5 = vunpack.i.h.bf16 %v3395_v4  ;;  %v3396_v6 = vunpack.i.l.bf16 %v3395_v4 }
 0x101   : > { %v292_v8 = vsel %vm290_vm5, %v3396_v6, %v3397_v5  ;;  %v291_v10 = vsel %vm290_vm5, %v285_v61, %v3396_v6 }
 0x102   : > { %v3405_v11 = vpop.permute.xlu1 %3404  ;;  %v3400_v12 = vpop.permute.xlu0 %3399  ;;  %v3210_v15 = vpack.c.bf16 %v311_v9, %v292_v8  ;;  %v3212_v16 = vpack.c.bf16 %v310_v7, %v291_v10 }
 0x103   : > { %v3407_v24 = vunpack.i.h.bf16 %v3405_v11  ;;  %v3406_v25 = vunpack.i.l.bf16 %v3405_v11  ;;  %v3402_v29 = vunpack.i.h.bf16 %v3400_v12  ;;  %v3401_v30 = vunpack.i.l.bf16 %v3400_v12 }
 0x104   : > { %3211 = vmatprep.subr.bf16.mxu0 %v3210_v15  ;;  %v488_v15 = vld [vmem:[%s4781_s1] sm:$0xf] }
 0x105   : > { %3213 = vmatpush1.bf16.msra.mxu0 %v3212_v16  ;;  %v342_v33 = vsel %vm340_vm4, %v3401_v30, %v3402_v29  ;;  %v373_v34 = vsel %vm371_vm3, %v3406_v25, %v3407_v24  ;;  %v341_v35 = vsel %vm340_vm4, %v335_v63, %v3401_v30  ;;  %v372_v38 = vsel %vm371_vm3, %v366_v3, %v3406_v25  ;;  %v507_v24 = vld [vmem:[#allocation2 + $0x8] sm:$0xf]  ;;  %v508_v30 = vld [vmem:[#allocation2 + $0x10] sm:$0xf] }
 0x106   : > { %v400_v39 = vpop.permute.xlu1 %399  ;;  %v429_v43 = vpop.permute.xlu0 %428  ;;  %v3214_v44 = vpack.c.bf16 %v373_v34, %v342_v33  ;;  %v3216_v45 = vpack.c.bf16 %v372_v38, %v341_v35 }
 0x108   : > { %3215 = vmatprep.subr.bf16.mxu0 %v3214_v44 }
 0x109   : > { %3217 = vmatpush1.bf16.msra.mxu0 %v3216_v45 }
 0x10a   : > { %v3410_v48 = vpop.permute.xlu1 %3409  ;;  %v3415_v49 = vpop.permute.xlu0 %3414 }
 0x10b   : > { %v3412_v52 = vunpack.i.h.bf16 %v3410_v48  ;;  %v3411_v55 = vunpack.i.l.bf16 %v3410_v48  ;;  %v3417_v57 = vunpack.i.h.bf16 %v3415_v49  ;;  %v3416_v58 = vunpack.i.l.bf16 %v3415_v49 }
 0x10d   : > { %v406_v59 = vsel %vm354_vm2, %v3416_v58, %v3417_v57  ;;  %v405_v60 = vsel %vm354_vm2, %v400_v39, %v3416_v58  ;;  %v454_v5 = vsel %vm452_vm7, %v3411_v55, %v3412_v52 }
 0x10e   : > { %v447_v61 = vpop.permute.xlu1 %446  ;;  %v3420_v62 = vpop.permute.xlu0 %3419  ;;  %v3218_v63 = vpack.c.bf16 %v406_v59, %v3833_v14  ;;  %v3220_v0 = vpack.c.bf16 %v405_v60, %v3831_v13 }
 0x10f   : > { %v453_v2 = vsel %vm452_vm7, %v447_v61, %v3411_v55  ;;  %v3422_v3 = vunpack.i.h.bf16 %v3420_v62  ;;  %v3421_v4 = vunpack.i.l.bf16 %v3420_v62 }
 0x110   : > { %3219 = vmatprep.subr.bf16.mxu0 %v3218_v63 }
 0x111   : > { %3221 = vmatpush1.bf16.msra.mxu0 %v3220_v0  ;;  %v435_v6 = vsel %vm323_vm1, %v3421_v4, %v3422_v3  ;;  %v434_v7 = vsel %vm323_vm1, %v429_v43, %v3421_v4 }
 0x112   : > { %v481_v8 = vpop.permute.xlu1 %480  ;;  %v479_v9 = vpop.permute.xlu0 %478  ;;  %v3222_v10 = vpack.c.bf16 %v454_v5, %v435_v6  ;;  %v3224_v11 = vpack.c.bf16 %v453_v2, %v434_v7 }
 0x113   : > { %v483_v13 = vsel %vm273_vm0, %v479_v9, %v481_v8 }
 0x114   : > { %3223 = vmatprep.subr.bf16.mxu0 %v3222_v10 }
 0x115   : > { %3225 = vmatpush1.bf16.msra.mxu0 %v3224_v11 }
 0x116   : > { %v477_v14 = vpop.permute.xlu0 %476  ;;  %535 = vmatprep.subr.mxu0 %v483_v13  ;;  %v3180_v13 = vld [vmem:[%s4782_s2 + $0x4] sm:$0xf] }
 0x117   : > { %v482_v12 = vsel %vm273_vm0, %v477_v14, %v479_v9 }
 0x119   : > { %536 = vmatpush1.msra.mxu0 %v482_v12 }
 0x11a   : > { %3178 = vmatmul.mubr.msk.f32.vlgmr.msra.gmra.mrb[0].mxu0 %vm515_vm8, %v488_v15  ;;  %v606_v15 = vpop.permute.xlu0 %605 }
 0x11b   : > { %1141 = vmatprep.mubr.f32.mxu0 %v3751_v1 }
 0x123   : > { %v513_v16 = vpop.permute.xlu1 %512 }
 0x127   : > { %v624_v12 = vpop.permute.xlu1 %623 }
 0x1ed   : > { %v585_v25 = vpop.f32.mrb[0].mxu0 }
 0x1ee   : > { %v586_v29 = vadd.f32 %v585_v25, %v513_v16  ;;  %v587_v33 = vpop.f32.mrb[1].mxu0 }
 0x1ef   : > { %v588_v34 = vadd.f32 %v587_v33, %v513_v16  ;;  %v666_v16 = vpop.permute.xlu1 %665 }
 0x1f0   : > { %v590_v35 = vadd.f32 %v586_v29, %v507_v24  ;;  %v645_v24 = vpop.permute.xlu0 %644 }
 0x1f1   : > { %v591_v38 = vadd.f32 %v588_v34, %v508_v30 }
 0x1f2   : > { %v592_v39 = vmax.f32 %v590_v35, 0.0 }
 0x1f3   : > { %v593_v43 = vmax.f32 %v591_v38, 0.0 }
 0x1f4   : > { %594 = vst [vmem:[#allocation2 + $0x28] sm:$0xf] %v592_v39 }
 0x1f5   : > { %595 = vst [vmem:[#allocation2 + $0x30] sm:$0xf] %v593_v43 }
 0x1fb   : > { %v3996_v44 = vld [vmem:[#allocation2 + $0x28] sm:$0xff] }
 0x1fc   : > { %v3998_v45 = vld [vmem:[#allocation2 + $0x30] sm:$0xff]  ;;  %v600_v48 = vmul.f32 %v3996_v44, %v3861_v23  ;;  %v660_v55 = vmul.f32 %v3996_v44, %v3886_v32  ;;  %v3103_v58 = vld [vmem:[#allocation2 + $0x28] sm:$0xf]  ;;  %v639_v61 = vmul.f32 %v3996_v44, %v3870_v26  ;;  %v684_v4 = vmul.f32 %v3996_v44, %v3899_v37 }
 0x1fd   : > { %v3424_v49 = vpack.i.bf16 %v3998_v45, %v3996_v44  ;;  %v601_v52 = vmul.f32 %v3998_v45, %v3856_v22  ;;  %v661_v57 = vmul.f32 %v3998_v45, %v3874_v27  ;;  %v3104_v59 = vld [vmem:[#allocation2 + $0x30] sm:$0xf]  ;;  %v640_v62 = vmul.f32 %v3998_v45, %v3854_v21 }
 0x1fe   : > { %v3107_v63 = vrot.slane %v3103_v58, 4  ;;  %v3108_v2 = vrot.slane %v3104_v59, 4  ;;  %v705_v5 = vmul.f32 %v3996_v44, %v3910_v42  ;;  %v685_v6 = vmul.f32 %v3998_v45, %v3904_v40 }
 0x1ff   : > { %3425 = vrot.lane.b32.xlu1 %v3424_v49, %s3759_s5  ;;  %v3429_v60 = vpack.i.bf16 %v601_v52, %v600_v48  ;;  %v3439_v0 = vpack.i.bf16 %v661_v57, %v660_v55  ;;  %v3434_v3 = vpack.i.bf16 %v640_v62, %v639_v61  ;;  %v3444_v7 = vpack.i.bf16 %v3751_v1, %v3998_v45 }
 0x200   : > { %3111 = vst [vmem:[%s4019_s14] sm:$0xf0] %v3107_v63  ;;  %3112 = vst [vmem:[%s4019_s14 + $0x8] sm:$0xf0] %v3108_v2  ;;  %v3449_v8 = vpack.i.bf16 %v3919_v46, %v685_v6  ;;  %v706_v9 = vmul.f32 %v3998_v45, %v3924_v47  ;;  %v745_v11 = vmul.f32 %v3998_v45, %v3945_v54 }
 0x201   : > { %3430 = vrot.lane.b32.xlu0 %v3429_v60, %s3758_s30  ;;  %v744_v14 = vmul.f32 %v3996_v44, %v3933_v51 }
 0x202   : > { %v3454_v10 = vpack.i.bf16 %v3938_v53, %v706_v9 }
 0x203   : > { %3440 = vrot.lane.b32.xlu1 %v3439_v0, %s3755_s28 }
 0x205   : > { %3435 = vrot.lane.b32.xlu0 %v3434_v3, %s3756_s29 }
 0x207   : > { %690 = vrot.lane.b32.xlu1 %v684_v4, %s3754_s27 }
 0x209   : > { %711 = vrot.lane.b32.xlu0 %v705_v5, %s3752_s22 }
 0x20b   : > { %3445 = vrot.lane.b32.xlu1 %v3444_v7, %s3760_s6 }
 0x20d   : > { %3450 = vrot.lane.b32.xlu0 %v3449_v8, %s3754_s27 }
 0x20f   : > { %729 = vrot.lane.b32.xlu1 %v3996_v44, %s3760_s6 }
 0x211   : > { %3455 = vrot.lane.b32.xlu0 %v3454_v10, %s3752_s22 }
 0x213   : > { %754 = vrot.lane.b32.xlu1 %v3952_v56, %s3753_s23 }
 0x215   : > { %752 = vrot.lane.b32.xlu0 %v745_v11, %s3753_s23 }
 0x217   : > { %788 = vperm.xlu1 %3423, %v3180_v13  }
 0x219   : > { %750 = vrot.lane.b32.xlu0 %v744_v14, %s3753_s23 }
 0x21b   : > { %906 = vrot.lane.b32.xlu1 %v3751_v1, %s3759_s5 }
 0x21d   : > { %888 = vrot.lane.b32.xlu0 %v3847_v19, %s3758_s30 }
 0x21f   : > { %948 = vrot.lane.b32.xlu1 %v3881_v31, %s3755_s28 }
 0x221   : > { %927 = vrot.lane.b32.xlu0 %v3852_v20, %s3756_s29 }
 0x271   : > { %v3426_v25 = vpop.permute.xlu1 %3425 }
 0x272   : > { %v3428_v29 = vunpack.i.h.bf16 %v3426_v25  ;;  %v3427_v30 = vunpack.i.l.bf16 %v3426_v25 }
 0x273   : > { %v3431_v33 = vpop.permute.xlu0 %3430 }
 0x274   : > { %v3433_v34 = vunpack.i.h.bf16 %v3431_v33  ;;  %v3432_v35 = vunpack.i.l.bf16 %v3431_v33  ;;  %v630_v39 = vsel %vm309_vm6, %v3427_v30, %v3428_v29  ;;  %v629_v43 = vsel %vm309_vm6, %v624_v12, %v3427_v30 }
 0x275   : > { %v3441_v38 = vpop.permute.xlu1 %3440 }
 0x276   : > { %v3443_v48 = vunpack.i.h.bf16 %v3441_v38  ;;  %v3442_v49 = vunpack.i.l.bf16 %v3441_v38  ;;  %v612_v52 = vsel %vm290_vm5, %v3432_v35, %v3433_v34  ;;  %v611_v55 = vsel %vm290_vm5, %v606_v15, %v3432_v35 }
 0x277   : > { %v3436_v57 = vpop.permute.xlu0 %3435  ;;  %v3226_v58 = vpack.c.bf16 %v630_v39, %v612_v52  ;;  %v3228_v59 = vpack.c.bf16 %v629_v43, %v611_v55  ;;  %v3179_v55 = vld [vmem:[%s4781_s1 + $0x4] sm:$0xf] }
 0x278   : > { %v3438_v60 = vunpack.i.h.bf16 %v3436_v57  ;;  %v3437_v61 = vunpack.i.l.bf16 %v3436_v57  ;;  %v672_v0 = vsel %vm371_vm3, %v3442_v49, %v3443_v48  ;;  %v671_v3 = vsel %vm371_vm3, %v666_v16, %v3442_v49 }
 0x279   : > { %v691_v62 = vpop.permute.xlu1 %690  ;;  %3227 = vmatprep.subr.bf16.mxu1 %v3226_v58 }
 0x27a   : > { %3229 = vmatpush1.bf16.msra.mxu1 %v3228_v59  ;;  %v651_v63 = vsel %vm340_vm4, %v3437_v61, %v3438_v60  ;;  %v650_v2 = vsel %vm340_vm4, %v645_v24, %v3437_v61  ;;  %v782_v61 = vld [vmem:[#allocation2 + $0x28] sm:$0xf] }
 0x27b   : > { %v712_v4 = vpop.permute.xlu0 %711  ;;  %v3230_v5 = vpack.c.bf16 %v672_v0, %v651_v63  ;;  %v3232_v6 = vpack.c.bf16 %v671_v3, %v650_v2  ;;  %v783_v0 = vld [vmem:[#allocation2 + $0x30] sm:$0xf] }
 0x27d   : > { %v3446_v7 = vpop.permute.xlu1 %3445  ;;  %3231 = vmatprep.subr.bf16.mxu1 %v3230_v5 }
 0x27e   : > { %3233 = vmatpush1.bf16.msra.mxu1 %v3232_v6  ;;  %v3448_v11 = vunpack.i.h.bf16 %v3446_v7  ;;  %v3447_v13 = vunpack.i.l.bf16 %v3446_v7 }
 0x27f   : > { %v3451_v8 = vpop.permute.xlu0 %3450 }
 0x280   : > { %v3453_v9 = vunpack.i.h.bf16 %v3451_v8  ;;  %v3452_v10 = vunpack.i.l.bf16 %v3451_v8  ;;  %v736_v35 = vsel %vm452_vm7, %v3447_v13, %v3448_v11 }
 0x281   : > { %v730_v15 = vpop.permute.xlu1 %729 }
 0x282   : > { %v697_v14 = vsel %vm354_vm2, %v3452_v10, %v3453_v9  ;;  %v696_v12 = vsel %vm354_vm2, %v691_v62, %v3452_v10  ;;  %v735_v33 = vsel %vm452_vm7, %v730_v15, %v3447_v13 }
 0x283   : > { %v3456_v25 = vpop.permute.xlu0 %3455  ;;  %v3234_v24 = vpack.c.bf16 %v697_v14, %v3998_v45  ;;  %v3236_v16 = vpack.c.bf16 %v696_v12, %v3996_v44 }
 0x284   : > { %v3458_v29 = vunpack.i.h.bf16 %v3456_v25  ;;  %v3457_v30 = vunpack.i.l.bf16 %v3456_v25 }
 0x285   : > { %3235 = vmatprep.subr.bf16.mxu1 %v3234_v24  ;;  %v755_v49 = vpop.permute.xlu1 %754 }
 0x286   : > { %3237 = vmatpush1.bf16.msra.mxu1 %v3236_v16  ;;  %v718_v34 = vsel %vm323_vm1, %v3457_v30, %v3458_v29  ;;  %v717_v38 = vsel %vm323_vm1, %v712_v4, %v3457_v30 }
 0x287   : > { %v753_v39 = vpop.permute.xlu0 %752  ;;  %v3238_v43 = vpack.c.bf16 %v736_v35, %v718_v34  ;;  %v3240_v48 = vpack.c.bf16 %v735_v33, %v717_v38 }
 0x288   : > { %v757_v44 = vsel %vm273_vm0, %v753_v39, %v755_v49 }
 0x289   : > { %3239 = vmatprep.subr.bf16.mxu1 %v3238_v43 }
 0x28a   : > { %3241 = vmatpush1.bf16.msra.mxu1 %v3240_v48  ;;  %v3183_v48 = vld [vmem:[%s4782_s2 + $0x8] sm:$0xf] }
 0x28b   : > { %v751_v45 = vpop.permute.xlu0 %750  ;;  %810 = vmatprep.subr.mxu1 %v757_v44 }
 0x28c   : > { %v756_v52 = vsel %vm273_vm0, %v751_v45, %v753_v39 }
 0x28e   : > { %811 = vmatpush1.msra.mxu1 %v756_v52 }
 0x28f   : > { %3181 = vmatmul.mubr.msk.f32.vlgmr.msra.gmra.mrb[0].mxu1 %vm515_vm8, %v3179_v55  ;;  %v889_v45 = vpop.permute.xlu0 %888 }
 0x290   : > { %1424 = vmatprep.mubr.f32.mxu1 %v3751_v1 }
 0x293   : > { %v928_v55 = vpop.permute.xlu0 %927 }
 0x296   : > { %v789_v57 = vpop.permute.xlu1 %788 }
 0x29a   : > { %v907_v44 = vpop.permute.xlu1 %906 }
 0x29e   : > { %v949_v52 = vpop.permute.xlu1 %948 }
 0x362   : > { %v860_v58 = vpop.f32.mrb[0].mxu1 }
 0x363   : > { %v861_v59 = vadd.f32 %v860_v58, %v789_v57  ;;  %v862_v60 = vpop.f32.mrb[1].mxu1 }
 0x364   : > { %v863_v62 = vadd.f32 %v862_v60, %v789_v57 }
 0x365   : > { %v865_v63 = vadd.f32 %v861_v59, %v782_v61 }
 0x366   : > { %v866_v2 = vadd.f32 %v863_v62, %v783_v0 }
 0x367   : > { %v867_v3 = vmax.f32 %v865_v63, 0.0 }
 0x368   : > { %v868_v4 = vmax.f32 %v866_v2, 0.0 }
 0x369   : > { %869 = vst [vmem:[#allocation2 + $0x48] sm:$0xf] %v867_v3  ;;  %v873_v5 = vrot.slane %v867_v3, 4 }
 0x36a   : > { %870 = vst [vmem:[#allocation2 + $0x50] sm:$0xf] %v868_v4  ;;  %v874_v6 = vrot.slane %v868_v4, 4 }
 0x36b   : > { %877 = vst [vmem:[#allocation2 + $0x128] sm:$0xf0] %v873_v5 }
 0x36c   : > { %878 = vst [vmem:[#allocation2 + $0x130] sm:$0xf0] %v874_v6 }
 0x370   : > { %v4087_v7 = vld [vmem:[#allocation2 + $0x48] sm:$0xff] }
 0x371   : > { %v4089_v8 = vld [vmem:[#allocation2 + $0x50] sm:$0xff]  ;;  %v883_v9 = vmul.f32 %v4087_v7, %v3861_v23  ;;  %v943_v13 = vmul.f32 %v4087_v7, %v3886_v32  ;;  %v922_v15 = vmul.f32 %v4087_v7, %v3870_v26  ;;  %v967_v29 = vmul.f32 %v4087_v7, %v3899_v37 }
 0x372   : > { %v3459_v10 = vpack.i.bf16 %v4089_v8, %v4087_v7  ;;  %v884_v11 = vmul.f32 %v4089_v8, %v3856_v22  ;;  %v944_v14 = vmul.f32 %v4089_v8, %v3874_v27  ;;  %v923_v25 = vmul.f32 %v4089_v8, %v3854_v21 }
 0x373   : > { %v988_v30 = vmul.f32 %v4087_v7, %v3910_v42  ;;  %v968_v33 = vmul.f32 %v4089_v8, %v3904_v40  ;;  %v3479_v34 = vpack.i.bf16 %v3751_v1, %v4089_v8  ;;  %v989_v38 = vmul.f32 %v4089_v8, %v3924_v47 }
 0x374   : > { %3460 = vrot.lane.b32.xlu1 %v3459_v10, %s3759_s5  ;;  %v3464_v12 = vpack.i.bf16 %v884_v11, %v883_v9  ;;  %v3474_v24 = vpack.i.bf16 %v944_v14, %v943_v13  ;;  %v3469_v16 = vpack.i.bf16 %v923_v25, %v922_v15  ;;  %v1028_v43 = vmul.f32 %v4089_v8, %v3945_v54 }
 0x375   : > { %v3484_v35 = vpack.i.bf16 %v3919_v46, %v968_v33  ;;  %v3489_v39 = vpack.i.bf16 %v3938_v53, %v989_v38  ;;  %v1027_v49 = vmul.f32 %v4087_v7, %v3933_v51 }
 0x376   : > { %3465 = vrot.lane.b32.xlu0 %v3464_v12, %s3758_s30 }
 0x378   : > { %3475 = vrot.lane.b32.xlu1 %v3474_v24, %s3755_s28 }
 0x37a   : > { %3470 = vrot.lane.b32.xlu0 %v3469_v16, %s3756_s29 }
 0x37c   : > { %973 = vrot.lane.b32.xlu1 %v967_v29, %s3754_s27 }
 0x37e   : > { %994 = vrot.lane.b32.xlu0 %v988_v30, %s3752_s22 }
 0x380   : > { %3480 = vrot.lane.b32.xlu1 %v3479_v34, %s3760_s6 }
 0x382   : > { %3485 = vrot.lane.b32.xlu0 %v3484_v35, %s3754_s27 }
 0x384   : > { %1012 = vrot.lane.b32.xlu1 %v4087_v7, %s3760_s6 }
 0x386   : > { %3490 = vrot.lane.b32.xlu0 %v3489_v39, %s3752_s22 }
 0x388   : > { %1037 = vrot.lane.b32.xlu1 %v3952_v56, %s3753_s23 }
 0x38a   : > { %1035 = vrot.lane.b32.xlu0 %v1028_v43, %s3753_s23 }
 0x38c   : > { %1071 = vperm.xlu1 %3423, %v3183_v48  }
 0x38e   : > { %1033 = vrot.lane.b32.xlu0 %v1027_v49, %s3753_s23 }
 0x390   : > { %1189 = vrot.lane.b32.xlu1 %v3751_v1, %s3759_s5 }
 0x392   : > { %1171 = vrot.lane.b32.xlu0 %v3847_v19, %s3758_s30 }
 0x394   : > { %1231 = vrot.lane.b32.xlu1 %v3881_v31, %s3755_s28 }
 0x396   : > { %1210 = vrot.lane.b32.xlu0 %v3852_v20, %s3756_s29 }
 0x3e6   : > { %v3461_v57 = vpop.permute.xlu1 %3460 }
 0x3e7   : > { %v3463_v58 = vunpack.i.h.bf16 %v3461_v57  ;;  %v3462_v59 = vunpack.i.l.bf16 %v3461_v57 }
 0x3e8   : > { %v3466_v60 = vpop.permute.xlu0 %3465 }
 0x3e9   : > { %v3468_v61 = vunpack.i.h.bf16 %v3466_v60  ;;  %v3467_v62 = vunpack.i.l.bf16 %v3466_v60  ;;  %v912_v63 = vsel %vm309_vm6, %v907_v44, %v3462_v59  ;;  %v913_v2 = vsel %vm309_vm6, %v3462_v59, %v3463_v58 }
 0x3ea   : > { %v3476_v0 = vpop.permute.xlu1 %3475 }
 0x3eb   : > { %v894_v3 = vsel %vm290_vm5, %v889_v45, %v3467_v62  ;;  %v3478_v4 = vunpack.i.h.bf16 %v3476_v0  ;;  %v3477_v5 = vunpack.i.l.bf16 %v3476_v0  ;;  %v895_v6 = vsel %vm290_vm5, %v3467_v62, %v3468_v61 }
 0x3ec   : > { %v3471_v9 = vpop.permute.xlu0 %3470  ;;  %v3242_v10 = vpack.c.bf16 %v913_v2, %v895_v6  ;;  %v3244_v11 = vpack.c.bf16 %v912_v63, %v894_v3  ;;  %v3182_v6 = vld [vmem:[%s4781_s1 + $0x8] sm:$0xf] }
 0x3ed   : > { %v3473_v13 = vunpack.i.h.bf16 %v3471_v9  ;;  %v3472_v14 = vunpack.i.l.bf16 %v3471_v9  ;;  %v954_v15 = vsel %vm371_vm3, %v949_v52, %v3477_v5  ;;  %v955_v16 = vsel %vm371_vm3, %v3477_v5, %v3478_v4 }
 0x3ee   : > { %v974_v12 = vpop.permute.xlu1 %973  ;;  %3243 = vmatprep.subr.bf16.mxu0 %v3242_v10 }
 0x3ef   : > { %v933_v25 = vsel %vm340_vm4, %v928_v55, %v3472_v14  ;;  %3245 = vmatpush1.bf16.msra.mxu0 %v3244_v11  ;;  %v934_v24 = vsel %vm340_vm4, %v3472_v14, %v3473_v13  ;;  %v1065_v14 = vld [vmem:[#allocation2 + $0x48] sm:$0xf] }
 0x3f0   : > { %v995_v29 = vpop.permute.xlu0 %994  ;;  %v3246_v30 = vpack.c.bf16 %v955_v16, %v934_v24  ;;  %v3248_v33 = vpack.c.bf16 %v954_v15, %v933_v25  ;;  %v1066_v25 = vld [vmem:[#allocation2 + $0x50] sm:$0xf] }
 0x3f2   : > { %v3481_v34 = vpop.permute.xlu1 %3480  ;;  %3247 = vmatprep.subr.bf16.mxu0 %v3246_v30 }
 0x3f3   : > { %3249 = vmatpush1.bf16.msra.mxu0 %v3248_v33  ;;  %v3483_v43 = vunpack.i.h.bf16 %v3481_v34  ;;  %v3482_v48 = vunpack.i.l.bf16 %v3481_v34 }
 0x3f4   : > { %v3486_v35 = vpop.permute.xlu0 %3485 }
 0x3f5   : > { %v3488_v38 = vunpack.i.h.bf16 %v3486_v35  ;;  %v3487_v39 = vunpack.i.l.bf16 %v3486_v35  ;;  %v1019_v63 = vsel %vm452_vm7, %v3482_v48, %v3483_v43 }
 0x3f6   : > { %v1013_v45 = vpop.permute.xlu1 %1012 }
 0x3f7   : > { %v979_v49 = vsel %vm354_vm2, %v974_v12, %v3487_v39  ;;  %v980_v44 = vsel %vm354_vm2, %v3487_v39, %v3488_v38  ;;  %v1018_v60 = vsel %vm452_vm7, %v1013_v45, %v3482_v48 }
 0x3f8   : > { %v3491_v52 = vpop.permute.xlu0 %3490  ;;  %v3250_v55 = vpack.c.bf16 %v980_v44, %v4089_v8  ;;  %v3252_v57 = vpack.c.bf16 %v979_v49, %v4087_v7 }
 0x3f9   : > { %v3493_v58 = vunpack.i.h.bf16 %v3491_v52  ;;  %v3492_v59 = vunpack.i.l.bf16 %v3491_v52 }
 0x3fa   : > { %3251 = vmatprep.subr.bf16.mxu0 %v3250_v55  ;;  %v1038_v4 = vpop.permute.xlu1 %1037 }
 0x3fb   : > { %v1000_v61 = vsel %vm323_vm1, %v995_v29, %v3492_v59  ;;  %3253 = vmatpush1.bf16.msra.mxu0 %v3252_v57  ;;  %v1001_v62 = vsel %vm323_vm1, %v3492_v59, %v3493_v58 }
 0x3fc   : > { %v1036_v0 = vpop.permute.xlu0 %1035  ;;  %v3254_v2 = vpack.c.bf16 %v1019_v63, %v1001_v62  ;;  %v3256_v3 = vpack.c.bf16 %v1018_v60, %v1000_v61  ;;  %v4200_v60 = vld [vmem:[#allocation2] sm:$0xff] }
 0x3fd   : > { %v1040_v7 = vsel %vm273_vm0, %v1036_v0, %v1038_v4 }
 0x3fe   : > { %3255 = vmatprep.subr.bf16.mxu0 %v3254_v2 }
 0x3ff   : > { %3257 = vmatpush1.bf16.msra.mxu0 %v3256_v3  ;;  %v3186_v3 = vld [vmem:[%s4782_s2 + $0xc] sm:$0xf] }
 0x400   : > { %v1034_v8 = vpop.permute.xlu0 %1033  ;;  %1093 = vmatprep.subr.mxu0 %v1040_v7 }
 0x401   : > { %v1039_v5 = vsel %vm273_vm0, %v1034_v8, %v1036_v0 }
 0x403   : > { %1094 = vmatpush1.msra.mxu0 %v1039_v5 }
 0x404   : > { %3184 = vmatmul.mubr.msk.f32.vlgmr.msra.gmra.mrb[2].mxu0 %vm515_vm8, %v3182_v6  ;;  %v1172_v8 = vpop.permute.xlu0 %1171 }
 0x405   : > { %1707 = vmatprep.mubr.f32.mxu0 %v3751_v1 }
 0x408   : > { %v1211_v6 = vpop.permute.xlu0 %1210 }
 0x40b   : > { %v1072_v9 = vpop.permute.xlu1 %1071 }
 0x40f   : > { %v1190_v7 = vpop.permute.xlu1 %1189 }
 0x413   : > { %v1232_v5 = vpop.permute.xlu1 %1231 }
 0x4d7   : > { %v1143_v10 = vpop.f32.mrb[2].mxu0 }
 0x4d8   : > { %v1144_v11 = vadd.f32 %v1143_v10, %v1072_v9  ;;  %v1145_v13 = vpop.f32.mrb[3].mxu0 }
 0x4d9   : > { %v1146_v12 = vadd.f32 %v1145_v13, %v1072_v9 }
 0x4da   : > { %v1148_v15 = vadd.f32 %v1144_v11, %v1065_v14 }
 0x4db   : > { %v1149_v24 = vadd.f32 %v1146_v12, %v1066_v25 }
 0x4dc   : > { %v1150_v16 = vmax.f32 %v1148_v15, 0.0 }
 0x4dd   : > { %v1151_v29 = vmax.f32 %v1149_v24, 0.0 }
 0x4de   : > { %1152 = vst [vmem:[#allocation2 + $0x68] sm:$0xf] %v1150_v16  ;;  %v1156_v30 = vrot.slane %v1150_v16, 4 }
 0x4df   : > { %1153 = vst [vmem:[#allocation2 + $0x70] sm:$0xf] %v1151_v29  ;;  %v1157_v33 = vrot.slane %v1151_v29, 4 }
 0x4e0   : > { %1160 = vst [vmem:[#allocation2 + $0x108] sm:$0xf0] %v1156_v30 }
 0x4e1   : > { %1161 = vst [vmem:[#allocation2 + $0x110] sm:$0xf0] %v1157_v33 }
 0x4e5   : > { %v4170_v34 = vld [vmem:[#allocation2 + $0x68] sm:$0xff] }
 0x4e6   : > { %v4172_v1 = vld [vmem:[#allocation2 + $0x70] sm:$0xff]  ;;  %v1166_v35 = vmul.f32 %v4170_v34, %v3861_v23  ;;  %v1226_v43 = vmul.f32 %v4170_v34, %v3886_v32  ;;  %v1205_v44 = vmul.f32 %v4170_v34, %v3870_v26  ;;  %v1250_v57 = vmul.f32 %v4170_v34, %v3899_v37 }
 0x4e7   : > { %v3494_v38 = vpack.i.bf16 %v4172_v1, %v4170_v34  ;;  %v1167_v39 = vmul.f32 %v4172_v1, %v3856_v22  ;;  %v1227_v48 = vmul.f32 %v4172_v1, %v3874_v27  ;;  %v1206_v45 = vmul.f32 %v4172_v1, %v3854_v21 }
 0x4e8   : > { %v1271_v58 = vmul.f32 %v4170_v34, %v3910_v42  ;;  %v1251_v59 = vmul.f32 %v4172_v1, %v3904_v40  ;;  %v3514_v61 = vpack.i.bf16 %v4200_v60, %v4172_v1  ;;  %v1272_v63 = vmul.f32 %v4172_v1, %v3924_v47 }
 0x4e9   : > { %3495 = vrot.lane.b32.xlu1 %v3494_v38, %s3759_s5  ;;  %v3499_v49 = vpack.i.bf16 %v1167_v39, %v1166_v35  ;;  %v3509_v52 = vpack.i.bf16 %v1227_v48, %v1226_v43  ;;  %v3504_v55 = vpack.i.bf16 %v1206_v45, %v1205_v44  ;;  %v1311_v2 = vmul.f32 %v4172_v1, %v3945_v54 }
 0x4ea   : > { %v3519_v62 = vpack.i.bf16 %v3919_v46, %v1251_v59  ;;  %v3524_v0 = vpack.i.bf16 %v3938_v53, %v1272_v63  ;;  %v1310_v4 = vmul.f32 %v4170_v34, %v3933_v51 }
 0x4eb   : > { %3500 = vrot.lane.b32.xlu0 %v3499_v49, %s3758_s30 }
 0x4ed   : > { %3510 = vrot.lane.b32.xlu1 %v3509_v52, %s3755_s28 }
 0x4ef   : > { %3505 = vrot.lane.b32.xlu0 %v3504_v55, %s3756_s29 }
 0x4f1   : > { %1256 = vrot.lane.b32.xlu1 %v1250_v57, %s3754_s27 }
 0x4f3   : > { %1277 = vrot.lane.b32.xlu0 %v1271_v58, %s3752_s22 }
 0x4f5   : > { %3515 = vrot.lane.b32.xlu1 %v3514_v61, %s3760_s6 }
 0x4f7   : > { %3520 = vrot.lane.b32.xlu0 %v3519_v62, %s3754_s27 }
 0x4f9   : > { %1295 = vrot.lane.b32.xlu1 %v4170_v34, %s3760_s6 }
 0x4fb   : > { %3525 = vrot.lane.b32.xlu0 %v3524_v0, %s3752_s22 }
 0x4fd   : > { %1320 = vrot.lane.b32.xlu1 %v3952_v56, %s3753_s23 }
 0x4ff   : > { %1318 = vrot.lane.b32.xlu0 %v1311_v2, %s3753_s23 }
 0x501   : > { %1354 = vperm.xlu1 %3423, %v3186_v3  }
 0x503   : > { %1316 = vrot.lane.b32.xlu0 %v1310_v4, %s3753_s23 }
 0x505   : > { %1472 = vrot.lane.b32.xlu1 %v4200_v60, %s3759_s5 }
 0x507   : > { %1454 = vrot.lane.b32.xlu0 %v3847_v19, %s3758_s30 }
 0x509   : > { %1514 = vrot.lane.b32.xlu1 %v3881_v31, %s3755_s28 }
 0x50b   : > { %1493 = vrot.lane.b32.xlu0 %v3852_v20, %s3756_s29 }
 0x55b   : > { %v3496_v9 = vpop.permute.xlu1 %3495 }
 0x55c   : > { %v3498_v10 = vunpack.i.h.bf16 %v3496_v9  ;;  %v3497_v11 = vunpack.i.l.bf16 %v3496_v9 }
 0x55d   : > { %v3501_v13 = vpop.permute.xlu0 %3500 }
 0x55e   : > { %v3503_v14 = vunpack.i.h.bf16 %v3501_v13  ;;  %v3502_v12 = vunpack.i.l.bf16 %v3501_v13  ;;  %v1195_v15 = vsel %vm309_vm6, %v1190_v7, %v3497_v11  ;;  %v1196_v19 = vsel %vm309_vm6, %v3497_v11, %v3498_v10 }
 0x55f   : > { %v3511_v25 = vpop.permute.xlu1 %3510 }
 0x560   : > { %v1177_v31 = vsel %vm290_vm5, %v1172_v8, %v3502_v12  ;;  %v3513_v24 = vunpack.i.h.bf16 %v3511_v25  ;;  %v3512_v16 = vunpack.i.l.bf16 %v3511_v25  ;;  %v1178_v20 = vsel %vm290_vm5, %v3502_v12, %v3503_v14 }
 0x561   : > { %v3506_v29 = vpop.permute.xlu0 %3505  ;;  %v3258_v30 = vpack.c.bf16 %v1196_v19, %v1178_v20  ;;  %v3260_v33 = vpack.c.bf16 %v1195_v15, %v1177_v31  ;;  %v3185_v31 = vld [vmem:[%s4781_s1 + $0xc] sm:$0xf] }
 0x562   : > { %v3508_v35 = vunpack.i.h.bf16 %v3506_v29  ;;  %v3507_v38 = vunpack.i.l.bf16 %v3506_v29  ;;  %v1237_v43 = vsel %vm371_vm3, %v1232_v5, %v3512_v16  ;;  %v1238_v44 = vsel %vm371_vm3, %v3512_v16, %v3513_v24 }
 0x563   : > { %v1257_v39 = vpop.permute.xlu1 %1256  ;;  %3259 = vmatprep.subr.bf16.mxu1 %v3258_v30  ;;  %v1348_v30 = vld [vmem:[#allocation2 + $0x68] sm:$0xf] }
 0x564   : > { %v1216_v48 = vsel %vm340_vm4, %v1211_v6, %v3507_v38  ;;  %3261 = vmatpush1.bf16.msra.mxu1 %v3260_v33  ;;  %v1217_v49 = vsel %vm340_vm4, %v3507_v38, %v3508_v35  ;;  %v1349_v38 = vld [vmem:[#allocation2 + $0x70] sm:$0xf] }
 0x565   : > { %v1278_v45 = vpop.permute.xlu0 %1277  ;;  %v3262_v52 = vpack.c.bf16 %v1238_v44, %v1217_v49  ;;  %v3264_v55 = vpack.c.bf16 %v1237_v43, %v1216_v48 }
 0x567   : > { %v3516_v57 = vpop.permute.xlu1 %3515  ;;  %3263 = vmatprep.subr.bf16.mxu1 %v3262_v52 }
 0x568   : > { %3265 = vmatpush1.bf16.msra.mxu1 %v3264_v55  ;;  %v3518_v62 = vunpack.i.h.bf16 %v3516_v57  ;;  %v3517_v63 = vunpack.i.l.bf16 %v3516_v57 }
 0x569   : > { %v3521_v58 = vpop.permute.xlu0 %3520 }
 0x56a   : > { %v3523_v59 = vunpack.i.h.bf16 %v3521_v58  ;;  %v3522_v61 = vunpack.i.l.bf16 %v3521_v58  ;;  %v1302_v13 = vsel %vm452_vm7, %v3517_v63, %v3518_v62 }
 0x56b   : > { %v1296_v3 = vpop.permute.xlu1 %1295 }
 0x56c   : > { %v1262_v0 = vsel %vm354_vm2, %v1257_v39, %v3522_v61  ;;  %v1263_v2 = vsel %vm354_vm2, %v3522_v61, %v3523_v59  ;;  %v1301_v9 = vsel %vm452_vm7, %v1296_v3, %v3517_v63 }
 0x56d   : > { %v3526_v4 = vpop.permute.xlu0 %3525  ;;  %v3266_v7 = vpack.c.bf16 %v1263_v2, %v4172_v1  ;;  %v3268_v8 = vpack.c.bf16 %v1262_v0, %v4170_v34 }
 0x56e   : > { %v3528_v5 = vunpack.i.h.bf16 %v3526_v4  ;;  %v3527_v6 = vunpack.i.l.bf16 %v3526_v4 }
 0x56f   : > { %3267 = vmatprep.subr.bf16.mxu1 %v3266_v7  ;;  %v1321_v25 = vpop.permute.xlu1 %1320 }
 0x570   : > { %v1283_v10 = vsel %vm323_vm1, %v1278_v45, %v3527_v6  ;;  %3269 = vmatpush1.bf16.msra.mxu1 %v3268_v8  ;;  %v1284_v11 = vsel %vm323_vm1, %v3527_v6, %v3528_v5 }
 0x571   : > { %v1319_v14 = vpop.permute.xlu0 %1318  ;;  %v3270_v12 = vpack.c.bf16 %v1302_v13, %v1284_v11  ;;  %v3272_v15 = vpack.c.bf16 %v1301_v9, %v1283_v10 }
 0x572   : > { %v1323_v34 = vsel %vm273_vm0, %v1319_v14, %v1321_v25 }
 0x573   : > { %3271 = vmatprep.subr.bf16.mxu1 %v3270_v12 }
 0x574   : > { %3273 = vmatpush1.bf16.msra.mxu1 %v3272_v15 }
 0x575   : > { %v1317_v1 = vpop.permute.xlu0 %1316  ;;  %1376 = vmatprep.subr.mxu1 %v1323_v34 }
 0x576   : > { %v1322_v19 = vsel %vm273_vm0, %v1317_v1, %v1319_v14  ;;  %v4323_v14 = vmul.f32 %v4200_v60, %v3842_v17 }
 0x578   : > { %1377 = vmatpush1.msra.mxu1 %v1322_v19 }
 0x579   : > { %3187 = vmatmul.mubr.msk.f32.vlgmr.msra.gmra.mrb[2].mxu1 %vm515_vm8, %v3185_v31  ;;  %v1455_v15 = vpop.permute.xlu0 %1454 }
 0x57a   : > { %1990 = vmatprep.mubr.f32.mxu1 %v4200_v60 }
 0x57d   : > { %v1494_v34 = vpop.permute.xlu0 %1493 }
 0x580   : > { %v1355_v24 = vpop.permute.xlu1 %1354 }
 0x584   : > { %v1473_v12 = vpop.permute.xlu1 %1472 }
 0x588   : > { %v1515_v25 = vpop.permute.xlu1 %1514 }
 0x64c   : > { %v1426_v16 = vpop.f32.mrb[2].mxu1 }
 0x64d   : > { %v1427_v20 = vadd.f32 %v1426_v16, %v1355_v24  ;;  %v1428_v29 = vpop.f32.mrb[3].mxu1 }
 0x64e   : > { %v1429_v33 = vadd.f32 %v1428_v29, %v1355_v24 }
 0x64f   : > { %v1431_v35 = vadd.f32 %v1427_v20, %v1348_v30 }
 0x650   : > { %v1432_v39 = vadd.f32 %v1429_v33, %v1349_v38 }
 0x651   : > { %v1433_v43 = vmax.f32 %v1431_v35, 0.0 }
 0x652   : > { %v1434_v48 = vmax.f32 %v1432_v39, 0.0 }
 0x653   : > { %1435 = vst [vmem:[#allocation2 + $0x88] sm:$0xf] %v1433_v43  ;;  %v1439_v49 = vrot.slane %v1433_v43, 4 }
 0x654   : > { %1436 = vst [vmem:[#allocation2 + $0x90] sm:$0xf] %v1434_v48  ;;  %v1440_v44 = vrot.slane %v1434_v48, 4 }
 0x655   : > { %1443 = vst [vmem:[#allocation2 + $0xe8] sm:$0xf0] %v1439_v49 }
 0x656   : > { %1444 = vst [vmem:[#allocation2 + $0xf0] sm:$0xf0] %v1440_v44 }
 0x65a   : > { %v4255_v45 = vld [vmem:[#allocation2 + $0x88] sm:$0xff] }
 0x65b   : > { %v4257_v52 = vld [vmem:[#allocation2 + $0x90] sm:$0xff]  ;;  %v1449_v55 = vmul.f32 %v4255_v45, %v3861_v23  ;;  %v1509_v59 = vmul.f32 %v4255_v45, %v3886_v32  ;;  %v1488_v63 = vmul.f32 %v4255_v45, %v3870_v26  ;;  %v1533_v4 = vmul.f32 %v4255_v45, %v3899_v37 }
 0x65c   : > { %v3529_v57 = vpack.i.bf16 %v4257_v52, %v4255_v45  ;;  %v1450_v58 = vmul.f32 %v4257_v52, %v3856_v22  ;;  %v1510_v61 = vmul.f32 %v4257_v52, %v3874_v27  ;;  %v1489_v0 = vmul.f32 %v4257_v52, %v3854_v21 }
 0x65d   : > { %v1554_v7 = vmul.f32 %v4255_v45, %v3910_v42  ;;  %v1534_v8 = vmul.f32 %v4257_v52, %v3904_v40  ;;  %v3549_v5 = vpack.i.bf16 %v4200_v60, %v4257_v52  ;;  %v1555_v9 = vmul.f32 %v4257_v52, %v3924_v47 }
 0x65e   : > { %3530 = vrot.lane.b32.xlu1 %v3529_v57, %s3759_s5  ;;  %v3534_v62 = vpack.i.bf16 %v1450_v58, %v1449_v55  ;;  %v3544_v2 = vpack.i.bf16 %v1510_v61, %v1509_v59  ;;  %v3539_v3 = vpack.i.bf16 %v1489_v0, %v1488_v63  ;;  %v1594_v11 = vmul.f32 %v4257_v52, %v3945_v54 }
 0x65f   : > { %v3554_v6 = vpack.i.bf16 %v3919_v46, %v1534_v8  ;;  %v3559_v10 = vpack.i.bf16 %v3938_v53, %v1555_v9  ;;  %v3189_v46 = vld [vmem:[%s4782_s2 + $0x10] sm:$0xf]  ;;  %v1593_v13 = vmul.f32 %v4255_v45, %v3933_v51  ;;  %v4311_v53 = vmul.f32 %v4200_v60, %v3844_v18 }
 0x660   : > { %3535 = vrot.lane.b32.xlu0 %v3534_v62, %s3758_s30 }
 0x662   : > { %3545 = vrot.lane.b32.xlu1 %v3544_v2, %s3755_s28 }
 0x664   : > { %3540 = vrot.lane.b32.xlu0 %v3539_v3, %s3756_s29 }
 0x666   : > { %1539 = vrot.lane.b32.xlu1 %v1533_v4, %s3754_s27 }
 0x668   : > { %1560 = vrot.lane.b32.xlu0 %v1554_v7, %s3752_s22 }
 0x66a   : > { %3550 = vrot.lane.b32.xlu1 %v3549_v5, %s3760_s6 }
 0x66c   : > { %3555 = vrot.lane.b32.xlu0 %v3554_v6, %s3754_s27 }
 0x66e   : > { %1578 = vrot.lane.b32.xlu1 %v4255_v45, %s3760_s6 }
 0x670   : > { %3560 = vrot.lane.b32.xlu0 %v3559_v10, %s3752_s22 }
 0x672   : > { %1603 = vrot.lane.b32.xlu1 %v3952_v56, %s3753_s23  ;;  %v4317_v56 = vmul.f32 %v4200_v60, %v3876_v28 }
 0x674   : > { %1601 = vrot.lane.b32.xlu0 %v1594_v11, %s3753_s23 }
 0x676   : > { %1637 = vperm.xlu1 %3423, %v3189_v46  }
 0x678   : > { %1599 = vrot.lane.b32.xlu0 %v1593_v13, %s3753_s23 }
 0x67a   : > { %1755 = vrot.lane.b32.xlu1 %v4200_v60, %s3759_s5 }
 0x67c   : > { %1737 = vrot.lane.b32.xlu0 %v4311_v53, %s3758_s30 }
 0x67e   : > { %1797 = vrot.lane.b32.xlu1 %v4317_v56, %s3755_s28 }
 0x680   : > { %1776 = vrot.lane.b32.xlu0 %v4323_v14, %s3756_s29 }
 0x6d0   : > { %v3531_v1 = vpop.permute.xlu1 %3530 }
 0x6d1   : > { %v3533_v19 = vunpack.i.h.bf16 %v3531_v1  ;;  %v3532_v31 = vunpack.i.l.bf16 %v3531_v1 }
 0x6d2   : > { %v3536_v24 = vpop.permute.xlu0 %3535 }
 0x6d3   : > { %v3538_v16 = vunpack.i.h.bf16 %v3536_v24  ;;  %v3537_v20 = vunpack.i.l.bf16 %v3536_v24  ;;  %v1478_v29 = vsel %vm309_vm6, %v1473_v12, %v3532_v31  ;;  %v1479_v33 = vsel %vm309_vm6, %v3532_v31, %v3533_v19 }
 0x6d4   : > { %v3546_v30 = vpop.permute.xlu1 %3545 }
 0x6d5   : > { %v1460_v35 = vsel %vm290_vm5, %v1455_v15, %v3537_v20  ;;  %v3548_v38 = vunpack.i.h.bf16 %v3546_v30  ;;  %v3547_v39 = vunpack.i.l.bf16 %v3546_v30  ;;  %v1461_v43 = vsel %vm290_vm5, %v3537_v20, %v3538_v16 }
 0x6d6   : > { %v3541_v48 = vpop.permute.xlu0 %3540  ;;  %v3274_v49 = vpack.c.bf16 %v1479_v33, %v1461_v43  ;;  %v3276_v44 = vpack.c.bf16 %v1478_v29, %v1460_v35  ;;  %v3188_v35 = vld [vmem:[%s4781_s1 + $0x10] sm:$0xf] }
 0x6d7   : > { %v3543_v55 = vunpack.i.h.bf16 %v3541_v48  ;;  %v3542_v57 = vunpack.i.l.bf16 %v3541_v48  ;;  %v1520_v59 = vsel %vm371_vm3, %v1515_v25, %v3547_v39  ;;  %v1521_v63 = vsel %vm371_vm3, %v3547_v39, %v3548_v38 }
 0x6d8   : > { %v1540_v58 = vpop.permute.xlu1 %1539  ;;  %3275 = vmatprep.subr.bf16.mxu0 %v3274_v49  ;;  %v1631_v49 = vld [vmem:[#allocation2 + $0x88] sm:$0xf] }
 0x6d9   : > { %v1499_v61 = vsel %vm340_vm4, %v1494_v34, %v3542_v57  ;;  %3277 = vmatpush1.bf16.msra.mxu0 %v3276_v44  ;;  %v1500_v62 = vsel %vm340_vm4, %v3542_v57, %v3543_v55  ;;  %v1632_v57 = vld [vmem:[#allocation2 + $0x90] sm:$0xf] }
 0x6da   : > { %v1561_v0 = vpop.permute.xlu0 %1560  ;;  %v3278_v2 = vpack.c.bf16 %v1521_v63, %v1500_v62  ;;  %v3280_v3 = vpack.c.bf16 %v1520_v59, %v1499_v61 }
 0x6dc   : > { %v3551_v4 = vpop.permute.xlu1 %3550  ;;  %3279 = vmatprep.subr.bf16.mxu0 %v3278_v2 }
 0x6dd   : > { %3281 = vmatpush1.bf16.msra.mxu0 %v3280_v3  ;;  %v3553_v6 = vunpack.i.h.bf16 %v3551_v4  ;;  %v3552_v9 = vunpack.i.l.bf16 %v3551_v4 }
 0x6de   : > { %v3556_v7 = vpop.permute.xlu0 %3555 }
 0x6df   : > { %v3558_v8 = vunpack.i.h.bf16 %v3556_v7  ;;  %v3557_v5 = vunpack.i.l.bf16 %v3556_v7  ;;  %v1585_v24 = vsel %vm452_vm7, %v3552_v9, %v3553_v6 }
 0x6e0   : > { %v1579_v13 = vpop.permute.xlu1 %1578 }
 0x6e1   : > { %v1545_v10 = vsel %vm354_vm2, %v1540_v58, %v3557_v5  ;;  %v1546_v11 = vsel %vm354_vm2, %v3557_v5, %v3558_v8  ;;  %v1584_v1 = vsel %vm452_vm7, %v1579_v13, %v3552_v9 }
 0x6e2   : > { %v3284_v46 = vpack.c.bf16 %v1545_v10, %v4255_v45  ;;  %v3561_v12 = vpop.permute.xlu0 %3560  ;;  %v3282_v15 = vpack.c.bf16 %v1546_v11, %v4257_v52 }
 0x6e3   : > { %v3563_v25 = vunpack.i.h.bf16 %v3561_v12  ;;  %v3562_v34 = vunpack.i.l.bf16 %v3561_v12 }
 0x6e4   : > { %3283 = vmatprep.subr.bf16.mxu0 %v3282_v15  ;;  %v1604_v45 = vpop.permute.xlu1 %1603 }
 0x6e5   : > { %v1566_v19 = vsel %vm323_vm1, %v1561_v0, %v3562_v34  ;;  %3285 = vmatpush1.bf16.msra.mxu0 %v3284_v46  ;;  %v1567_v31 = vsel %vm323_vm1, %v3562_v34, %v3563_v25  ;;  %v4384_v34 = vmul.f32 %v4200_v60, %v3897_v36 }
 0x6e6   : > { %v3288_v16 = vpack.c.bf16 %v1584_v1, %v1566_v19  ;;  %v1602_v20 = vpop.permute.xlu0 %1601  ;;  %v3286_v29 = vpack.c.bf16 %v1585_v24, %v1567_v31  ;;  %v4393_v31 = vmul.f32 %v4200_v60, %v3908_v41 }
 0x6e7   : > { %v1606_v52 = vsel %vm273_vm0, %v1602_v20, %v1604_v45 }
 0x6e8   : > { %3287 = vmatprep.subr.bf16.mxu0 %v3286_v29  ;;  %v3192_v29 = vld [vmem:[%s4782_s2 + $0x14] sm:$0xf] }
 0x6e9   : > { %3289 = vmatpush1.bf16.msra.mxu0 %v3288_v16  ;;  %v4401_v16 = vmul.f32 %v4200_v60, %v3931_v50 }
 0x6ea   : > { %v1600_v30 = vpop.permute.xlu0 %1599  ;;  %1659 = vmatprep.subr.mxu0 %v1606_v52 }
 0x6eb   : > { %v1605_v33 = vsel %vm273_vm0, %v1600_v30, %v1602_v20 }
 0x6ed   : > { %1660 = vmatpush1.msra.mxu0 %v1605_v33 }
 0x6ee   : > { %3190 = vmatmul.mubr.msk.f32.vlgmr.msra.gmra.mrb[4].mxu0 %vm515_vm8, %v3188_v35  ;;  %v1738_v30 = vpop.permute.xlu0 %1737 }
 0x6ef   : > { %2265 = vmatprep.mubr.f32.mxu0 %v4200_v60 }
 0x6f2   : > { %v1777_v35 = vpop.permute.xlu0 %1776 }
 0x6f5   : > { %v1638_v38 = vpop.permute.xlu1 %1637 }
 0x6f9   : > { %v1756_v52 = vpop.permute.xlu1 %1755 }
 0x6fd   : > { %v1798_v33 = vpop.permute.xlu1 %1797 }
 0x7c1   : > { %v1709_v39 = vpop.f32.mrb[4].mxu0 }
 0x7c2   : > { %v1710_v43 = vadd.f32 %v1709_v39, %v1638_v38  ;;  %v1711_v48 = vpop.f32.mrb[5].mxu0 }
 0x7c3   : > { %v1712_v44 = vadd.f32 %v1711_v48, %v1638_v38 }
 0x7c4   : > { %v1714_v55 = vadd.f32 %v1710_v43, %v1631_v49 }
 0x7c5   : > { %v1715_v58 = vadd.f32 %v1712_v44, %v1632_v57 }
 0x7c6   : > { %v1716_v59 = vmax.f32 %v1714_v55, 0.0 }
 0x7c7   : > { %v1717_v61 = vmax.f32 %v1715_v58, 0.0 }
 0x7c8   : > { %1718 = vst [vmem:[#allocation2 + $0xa8] sm:$0xf] %v1716_v59  ;;  %v1722_v62 = vrot.slane %v1716_v59, 4 }
 0x7c9   : > { %1719 = vst [vmem:[#allocation2 + $0xb0] sm:$0xf] %v1717_v61  ;;  %v1723_v63 = vrot.slane %v1717_v61, 4 }
 0x7ca   : > { %1726 = vst [vmem:[#allocation2 + $0xc8] sm:$0xf0] %v1722_v62 }
 0x7cb   : > { %1727 = vst [vmem:[#allocation2 + $0xd0] sm:$0xf0] %v1723_v63 }
 0x7cf   : > { %v4350_v0 = vld [vmem:[#allocation2 + $0xa8] sm:$0xff] }
 0x7d0   : > { %v4352_v2 = vld [vmem:[#allocation2 + $0xb0] sm:$0xff]  ;;  %v1732_v3 = vmul.f32 %v4350_v0, %v3861_v23  ;;  %v1792_v8 = vmul.f32 %v4350_v0, %v3886_v32  ;;  %v1771_v9 = vmul.f32 %v4350_v0, %v3870_v26  ;;  %v1816_v13 = vmul.f32 %v4350_v0, %v3899_v37 }
 0x7d1   : > { %v3564_v4 = vpack.i.bf16 %v4352_v2, %v4350_v0  ;;  %v1733_v7 = vmul.f32 %v4352_v2, %v3856_v22  ;;  %v1793_v5 = vmul.f32 %v4352_v2, %v3874_v27  ;;  %v1772_v10 = vmul.f32 %v4352_v2, %v3854_v21 }
 0x7d2   : > { %v1837_v12 = vmul.f32 %v4350_v0, %v3910_v42  ;;  %v1817_v15 = vmul.f32 %v4352_v2, %v3904_v40  ;;  %v3584_v25 = vpack.i.bf16 %v4200_v60, %v4352_v2  ;;  %v1838_v19 = vmul.f32 %v4352_v2, %v3924_v47 }
 0x7d3   : > { %3565 = vrot.lane.b32.xlu1 %v3564_v4, %s3759_s5  ;;  %v3569_v6 = vpack.i.bf16 %v1733_v7, %v1732_v3  ;;  %v3579_v11 = vpack.i.bf16 %v1793_v5, %v1792_v8  ;;  %v3574_v46 = vpack.i.bf16 %v1772_v10, %v1771_v9  ;;  %v1877_v20 = vmul.f32 %v4352_v2, %v3945_v54 }
 0x7d4   : > { %v3589_v1 = vpack.i.bf16 %v4384_v34, %v1817_v15  ;;  %v3594_v24 = vpack.i.bf16 %v4393_v31, %v1838_v19  ;;  %v1876_v45 = vmul.f32 %v4350_v0, %v3933_v51 }
 0x7d5   : > { %3570 = vrot.lane.b32.xlu0 %v3569_v6, %s3758_s30 }
 0x7d7   : > { %3580 = vrot.lane.b32.xlu1 %v3579_v11, %s3755_s28 }
 0x7d9   : > { %3575 = vrot.lane.b32.xlu0 %v3574_v46, %s3756_s29 }
 0x7db   : > { %1822 = vrot.lane.b32.xlu1 %v1816_v13, %s3754_s27 }
 0x7dd   : > { %1843 = vrot.lane.b32.xlu0 %v1837_v12, %s3752_s22 }
 0x7df   : > { %3585 = vrot.lane.b32.xlu1 %v3584_v25, %s3760_s6 }
 0x7e1   : > { %3590 = vrot.lane.b32.xlu0 %v3589_v1, %s3754_s27 }
 0x7e3   : > { %1861 = vrot.lane.b32.xlu1 %v4350_v0, %s3760_s6 }
 0x7e5   : > { %3595 = vrot.lane.b32.xlu0 %v3594_v24, %s3752_s22 }
 0x7e7   : > { %1886 = vrot.lane.b32.xlu1 %v4401_v16, %s3753_s23 }
 0x7e9   : > { %1884 = vrot.lane.b32.xlu0 %v1877_v20, %s3753_s23 }
 0x7eb   : > { %1920 = vperm.xlu1 %3423, %v3192_v29  }
 0x7ed   : > { %1882 = vrot.lane.b32.xlu0 %v1876_v45, %s3753_s23 }
 0x7ef   : > { %2030 = vrot.lane.b32.xlu1 %v4200_v60, %s3759_s5 }
 0x7f1   : > { %2012 = vrot.lane.b32.xlu0 %v4311_v53, %s3758_s30 }
 0x7f3   : > { %2072 = vrot.lane.b32.xlu1 %v4317_v56, %s3755_s28 }
 0x7f5   : > { %2051 = vrot.lane.b32.xlu0 %v4323_v14, %s3756_s29 }
 0x845   : > { %v3566_v38 = vpop.permute.xlu1 %3565 }
 0x846   : > { %v3568_v39 = vunpack.i.h.bf16 %v3566_v38  ;;  %v3567_v43 = vunpack.i.l.bf16 %v3566_v38 }
 0x847   : > { %v3571_v48 = vpop.permute.xlu0 %3570 }
 0x848   : > { %v3573_v49 = vunpack.i.h.bf16 %v3571_v48  ;;  %v3572_v44 = vunpack.i.l.bf16 %v3571_v48  ;;  %v1761_v55 = vsel %vm309_vm6, %v1756_v52, %v3567_v43  ;;  %v1762_v58 = vsel %vm309_vm6, %v3567_v43, %v3568_v39 }
 0x849   : > { %v3581_v57 = vpop.permute.xlu1 %3580 }
 0x84a   : > { %v1743_v59 = vsel %vm290_vm5, %v1738_v30, %v3572_v44  ;;  %v3583_v61 = vunpack.i.h.bf16 %v3581_v57  ;;  %v3582_v62 = vunpack.i.l.bf16 %v3581_v57  ;;  %v1744_v63 = vsel %vm290_vm5, %v3572_v44, %v3573_v49 }
 0x84b   : > { %v3292_v3 = vpack.c.bf16 %v1761_v55, %v1743_v59  ;;  %v3576_v4 = vpop.permute.xlu0 %3575  ;;  %v3290_v7 = vpack.c.bf16 %v1762_v58, %v1744_v63  ;;  %v3191_v63 = vld [vmem:[%s4781_s1 + $0x14] sm:$0xf] }
 0x84c   : > { %v3578_v8 = vunpack.i.h.bf16 %v3576_v4  ;;  %v3577_v5 = vunpack.i.l.bf16 %v3576_v4  ;;  %v1803_v9 = vsel %vm371_vm3, %v1798_v33, %v3582_v62  ;;  %v1804_v46 = vsel %vm371_vm3, %v3582_v62, %v3583_v61 }
 0x84d   : > { %v1823_v6 = vpop.permute.xlu1 %1822  ;;  %3291 = vmatprep.subr.bf16.mxu1 %v3290_v7 }
 0x84e   : > { %v1782_v10 = vsel %vm340_vm4, %v1777_v35, %v3577_v5  ;;  %3293 = vmatpush1.bf16.msra.mxu1 %v3292_v3  ;;  %v1783_v11 = vsel %vm340_vm4, %v3577_v5, %v3578_v8  ;;  %v1914_v5 = vld [vmem:[#allocation2 + $0xa8] sm:$0xf] }
 0x84f   : > { %v3296_v13 = vpack.c.bf16 %v1803_v9, %v1782_v10  ;;  %v1844_v12 = vpop.permute.xlu0 %1843  ;;  %v3294_v15 = vpack.c.bf16 %v1804_v46, %v1783_v11  ;;  %v1915_v10 = vld [vmem:[#allocation2 + $0xb0] sm:$0xf] }
 0x851   : > { %v3586_v25 = vpop.permute.xlu1 %3585  ;;  %3295 = vmatprep.subr.bf16.mxu1 %v3294_v15 }
 0x852   : > { %3297 = vmatpush1.bf16.msra.mxu1 %v3296_v13  ;;  %v3588_v20 = vunpack.i.h.bf16 %v3586_v25  ;;  %v3587_v29 = vunpack.i.l.bf16 %v3586_v25 }
 0x853   : > { %v3591_v1 = vpop.permute.xlu0 %3590 }
 0x854   : > { %v3593_v19 = vunpack.i.h.bf16 %v3591_v1  ;;  %v3592_v24 = vunpack.i.l.bf16 %v3591_v1  ;;  %v1868_v55 = vsel %vm452_vm7, %v3587_v29, %v3588_v20 }
 0x855   : > { %v1862_v33 = vpop.permute.xlu1 %1861 }
 0x856   : > { %v1828_v45 = vsel %vm354_vm2, %v1823_v6, %v3592_v24  ;;  %v1829_v52 = vsel %vm354_vm2, %v3592_v24, %v3593_v19  ;;  %v1867_v48 = vsel %vm452_vm7, %v1862_v33, %v3587_v29 }
 0x857   : > { %v3300_v30 = vpack.c.bf16 %v1828_v45, %v4350_v0  ;;  %v3596_v35 = vpop.permute.xlu0 %3595  ;;  %v3298_v38 = vpack.c.bf16 %v1829_v52, %v4352_v2 }
 0x858   : > { %v3598_v39 = vunpack.i.h.bf16 %v3596_v35  ;;  %v3597_v43 = vunpack.i.l.bf16 %v3596_v35 }
 0x859   : > { %3299 = vmatprep.subr.bf16.mxu1 %v3298_v38  ;;  %v1887_v0 = vpop.permute.xlu1 %1886 }
 0x85a   : > { %v1849_v49 = vsel %vm323_vm1, %v1844_v12, %v3597_v43  ;;  %3301 = vmatpush1.bf16.msra.mxu1 %v3300_v30  ;;  %v1850_v44 = vsel %vm323_vm1, %v3597_v43, %v3598_v39 }
 0x85b   : > { %v3304_v57 = vpack.c.bf16 %v1867_v48, %v1849_v49  ;;  %v1885_v58 = vpop.permute.xlu0 %1884  ;;  %v3302_v59 = vpack.c.bf16 %v1868_v55, %v1850_v44 }
 0x85c   : > { %v1889_v2 = vsel %vm273_vm0, %v1885_v58, %v1887_v0 }
 0x85d   : > { %3303 = vmatprep.subr.bf16.mxu1 %v3302_v59 }
 0x85e   : > { %3305 = vmatpush1.bf16.msra.mxu1 %v3304_v57  ;;  %v3195_v57 = vld [vmem:[%s4782_s2 + $0x18] sm:$0xf] }
 0x85f   : > { %v1883_v61 = vpop.permute.xlu0 %1882  ;;  %1942 = vmatprep.subr.mxu1 %v1889_v2 }
 0x860   : > { %v1888_v62 = vsel %vm273_vm0, %v1883_v61, %v1885_v58 }
 0x862   : > { %1943 = vmatpush1.msra.mxu1 %v1888_v62 }
 0x863   : > { %3193 = vmatmul.mubr.msk.f32.vlgmr.msra.gmra.mrb[4].mxu1 %vm515_vm8, %v3191_v63  ;;  %v2013_v0 = vpop.permute.xlu0 %2012 }
 0x864   : > { %2540 = vmatprep.mubr.f32.mxu1 %v4200_v60 }
 0x867   : > { %v2052_v61 = vpop.permute.xlu0 %2051 }
 0x86a   : > { %v1921_v3 = vpop.permute.xlu1 %1920 }
 0x86e   : > { %v2031_v59 = vpop.permute.xlu1 %2030 }
 0x872   : > { %v2073_v2 = vpop.permute.xlu1 %2072 }
 0x936   : > { %v1992_v4 = vpop.f32.mrb[4].mxu1 }
 0x937   : > { %v1993_v7 = vadd.f32 %v1992_v4, %v1921_v3  ;;  %v1994_v8 = vpop.f32.mrb[5].mxu1 }
 0x938   : > { %v1995_v6 = vadd.f32 %v1994_v8, %v1921_v3 }
 0x939   : > { %v1997_v9 = vadd.f32 %v1993_v7, %v1914_v5 }
 0x93a   : > { %v1998_v11 = vadd.f32 %v1995_v6, %v1915_v10 }
 0x93b   : > { %v1999_v46 = vmax.f32 %v1997_v9, 0.0 }
 0x93c   : > { %v2000_v13 = vmax.f32 %v1998_v11, 0.0 }
 0x93d   : > { %2001 = vst [vmem:[#allocation2 + $0xc8] sm:$0xf] %v1999_v46 }
 0x93e   : > { %2002 = vst [vmem:[#allocation2 + $0xd0] sm:$0xf] %v2000_v13 }
 0x944   : > { %v4445_v12 = vld [vmem:[#allocation2 + $0xc8] sm:$0xff] }
 0x945   : > { %v4447_v15 = vld [vmem:[#allocation2 + $0xd0] sm:$0xff]  ;;  %v2007_v25 = vmul.f32 %v4445_v12, %v3861_v23  ;;  %v2067_v24 = vmul.f32 %v4445_v12, %v3886_v32  ;;  %v2046_v45 = vmul.f32 %v4445_v12, %v3870_v26  ;;  %v2091_v35 = vmul.f32 %v4445_v12, %v3899_v37 }
 0x946   : > { %v3599_v1 = vpack.i.bf16 %v4447_v15, %v4445_v12  ;;  %v2008_v19 = vmul.f32 %v4447_v15, %v3856_v22  ;;  %v2068_v20 = vmul.f32 %v4447_v15, %v3874_v27  ;;  %v2047_v52 = vmul.f32 %v4447_v15, %v3854_v21 }
 0x947   : > { %v2112_v38 = vmul.f32 %v4445_v12, %v3910_v42  ;;  %v2092_v39 = vmul.f32 %v4447_v15, %v3904_v40  ;;  %v3619_v43 = vpack.i.bf16 %v4200_v60, %v4447_v15  ;;  %v2113_v49 = vmul.f32 %v4447_v15, %v3924_v47 }
 0x948   : > { %3600 = vrot.lane.b32.xlu1 %v3599_v1, %s3759_s5  ;;  %v3604_v29 = vpack.i.bf16 %v2008_v19, %v2007_v25  ;;  %v3614_v30 = vpack.i.bf16 %v2068_v20, %v2067_v24  ;;  %v3609_v33 = vpack.i.bf16 %v2047_v52, %v2046_v45  ;;  %v2152_v55 = vmul.f32 %v4447_v15, %v3945_v54 }
 0x949   : > { %v3624_v48 = vpack.i.bf16 %v4384_v34, %v2092_v39  ;;  %v3629_v44 = vpack.i.bf16 %v4393_v31, %v2113_v49  ;;  %v2151_v58 = vmul.f32 %v4445_v12, %v3933_v51 }
 0x94a   : > { %3605 = vrot.lane.b32.xlu0 %v3604_v29, %s3758_s30 }
 0x94c   : > { %3615 = vrot.lane.b32.xlu1 %v3614_v30, %s3755_s28 }
 0x94e   : > { %3610 = vrot.lane.b32.xlu0 %v3609_v33, %s3756_s29 }
 0x950   : > { %2097 = vrot.lane.b32.xlu1 %v2091_v35, %s3754_s27 }
 0x952   : > { %2118 = vrot.lane.b32.xlu0 %v2112_v38, %s3752_s22 }
 0x954   : > { %3620 = vrot.lane.b32.xlu1 %v3619_v43, %s3760_s6 }
 0x956   : > { %3625 = vrot.lane.b32.xlu0 %v3624_v48, %s3754_s27 }
 0x958   : > { %2136 = vrot.lane.b32.xlu1 %v4445_v12, %s3760_s6 }
 0x95a   : > { %3630 = vrot.lane.b32.xlu0 %v3629_v44, %s3752_s22 }
 0x95c   : > { %2161 = vrot.lane.b32.xlu1 %v4401_v16, %s3753_s23 }
 0x95e   : > { %2159 = vrot.lane.b32.xlu0 %v2152_v55, %s3753_s23 }
 0x960   : > { %2195 = vperm.xlu1 %3423, %v3195_v57  }
 0x962   : > { %2157 = vrot.lane.b32.xlu0 %v2151_v58, %s3753_s23 }
 0x964   : > { %2305 = vrot.lane.b32.xlu1 %v4200_v60, %s3759_s5 }
 0x966   : > { %2287 = vrot.lane.b32.xlu0 %v4311_v53, %s3758_s30 }
 0x968   : > { %2347 = vrot.lane.b32.xlu1 %v4317_v56, %s3755_s28 }
 0x96a   : > { %2326 = vrot.lane.b32.xlu0 %v4323_v14, %s3756_s29 }
 0x9ba   : > { %v3601_v62 = vpop.permute.xlu1 %3600 }
 0x9bb   : > { %v3603_v63 = vunpack.i.h.bf16 %v3601_v62  ;;  %v3602_v3 = vunpack.i.l.bf16 %v3601_v62 }
 0x9bc   : > { %v3606_v4 = vpop.permute.xlu0 %3605 }
 0x9bd   : > { %v3608_v7 = vunpack.i.h.bf16 %v3606_v4  ;;  %v3607_v8 = vunpack.i.l.bf16 %v3606_v4  ;;  %v2036_v5 = vsel %vm309_vm6, %v2031_v59, %v3602_v3  ;;  %v2037_v9 = vsel %vm309_vm6, %v3602_v3, %v3603_v63 }
 0x9be   : > { %v3616_v6 = vpop.permute.xlu1 %3615 }
 0x9bf   : > { %v2018_v10 = vsel %vm290_vm5, %v2013_v0, %v3607_v8  ;;  %v3618_v11 = vunpack.i.h.bf16 %v3616_v6  ;;  %v3617_v46 = vunpack.i.l.bf16 %v3616_v6  ;;  %v2019_v13 = vsel %vm290_vm5, %v3607_v8, %v3608_v7 }
 0x9c0   : > { %v3308_v25 = vpack.c.bf16 %v2036_v5, %v2018_v10  ;;  %v3611_v1 = vpop.permute.xlu0 %3610  ;;  %v3306_v19 = vpack.c.bf16 %v2037_v9, %v2019_v13  ;;  %v3194_v13 = vld [vmem:[%s4781_s1 + $0x18] sm:$0xf] }
 0x9c1   : > { %v3613_v24 = vunpack.i.h.bf16 %v3611_v1  ;;  %v3612_v20 = vunpack.i.l.bf16 %v3611_v1  ;;  %v2078_v45 = vsel %vm371_vm3, %v2073_v2, %v3617_v46  ;;  %v2079_v33 = vsel %vm371_vm3, %v3617_v46, %v3618_v11 }
 0x9c2   : > { %v2098_v29 = vpop.permute.xlu1 %2097  ;;  %3307 = vmatprep.subr.bf16.mxu0 %v3306_v19 }
 0x9c3   : > { %v2057_v52 = vsel %vm340_vm4, %v2052_v61, %v3612_v20  ;;  %3309 = vmatpush1.bf16.msra.mxu0 %v3308_v25  ;;  %v2058_v30 = vsel %vm340_vm4, %v3612_v20, %v3613_v24  ;;  %v2189_v20 = vld [vmem:[#allocation2 + $0xc8] sm:$0xf] }
 0x9c4   : > { %v3312_v35 = vpack.c.bf16 %v2078_v45, %v2057_v52  ;;  %v2119_v38 = vpop.permute.xlu0 %2118  ;;  %v3310_v39 = vpack.c.bf16 %v2079_v33, %v2058_v30  ;;  %v2190_v52 = vld [vmem:[#allocation2 + $0xd0] sm:$0xf] }
 0x9c6   : > { %v3621_v43 = vpop.permute.xlu1 %3620  ;;  %3311 = vmatprep.subr.bf16.mxu0 %v3310_v39 }
 0x9c7   : > { %3313 = vmatpush1.bf16.msra.mxu0 %v3312_v35  ;;  %v3623_v55 = vunpack.i.h.bf16 %v3621_v43  ;;  %v3622_v57 = vunpack.i.l.bf16 %v3621_v43 }
 0x9c8   : > { %v3626_v48 = vpop.permute.xlu0 %3625 }
 0x9c9   : > { %v3628_v49 = vunpack.i.h.bf16 %v3626_v48  ;;  %v3627_v44 = vunpack.i.l.bf16 %v3626_v48  ;;  %v2143_v5 = vsel %vm452_vm7, %v3622_v57, %v3623_v55 }
 0x9ca   : > { %v2137_v2 = vpop.permute.xlu1 %2136 }
 0x9cb   : > { %v2103_v58 = vsel %vm354_vm2, %v2098_v29, %v3627_v44  ;;  %v2104_v59 = vsel %vm354_vm2, %v3627_v44, %v3628_v49  ;;  %v2142_v4 = vsel %vm452_vm7, %v2137_v2, %v3622_v57 }
 0x9cc   : > { %v3316_v0 = vpack.c.bf16 %v2103_v58, %v4445_v12  ;;  %v3631_v61 = vpop.permute.xlu0 %3630  ;;  %v3314_v62 = vpack.c.bf16 %v2104_v59, %v4447_v15 }
 0x9cd   : > { %v3633_v63 = vunpack.i.h.bf16 %v3631_v61  ;;  %v3632_v3 = vunpack.i.l.bf16 %v3631_v61 }
 0x9ce   : > { %3315 = vmatprep.subr.bf16.mxu0 %v3314_v62  ;;  %v2162_v12 = vpop.permute.xlu1 %2161 }
 0x9cf   : > { %v2124_v7 = vsel %vm323_vm1, %v2119_v38, %v3632_v3  ;;  %3317 = vmatpush1.bf16.msra.mxu0 %v3316_v0  ;;  %v2125_v8 = vsel %vm323_vm1, %v3632_v3, %v3633_v63 }
 0x9d0   : > { %v3320_v6 = vpack.c.bf16 %v2142_v4, %v2124_v7  ;;  %v2160_v9 = vpop.permute.xlu0 %2159  ;;  %v3318_v10 = vpack.c.bf16 %v2143_v5, %v2125_v8  ;;  %v3198_v5 = vld [vmem:[%s4782_s2 + $0x1c] sm:$0xf] }
 0x9d1   : > { %v2164_v15 = vsel %vm273_vm0, %v2160_v9, %v2162_v12 }
 0x9d2   : > { %3319 = vmatprep.subr.bf16.mxu0 %v3318_v10 }
 0x9d3   : > { %3321 = vmatpush1.bf16.msra.mxu0 %v3320_v6 }
 0x9d4   : > { %v2158_v11 = vpop.permute.xlu0 %2157  ;;  %2217 = vmatprep.subr.mxu0 %v2164_v15 }
 0x9d5   : > { %v2163_v46 = vsel %vm273_vm0, %v2158_v11, %v2160_v9  ;;  %v4580_v9 = vld [vmem:[#allocation2] sm:$0xff] }
 0x9d7   : > { %2218 = vmatpush1.msra.mxu0 %v2163_v46 }
 0x9d8   : > { %3196 = vmatmul.mubr.msk.f32.vlgmr.msra.gmra.mrb[6].mxu0 %vm515_vm8, %v3194_v13  ;;  %v2288_v12 = vpop.permute.xlu0 %2287 }
 0x9d9   : > { %2815 = vmatprep.mubr.f32.mxu0 %v4200_v60 }
 0x9dc   : > { %v2327_v11 = vpop.permute.xlu0 %2326 }
 0x9df   : > { %v2196_v25 = vpop.permute.xlu1 %2195 }
 0x9e3   : > { %v2306_v10 = vpop.permute.xlu1 %2305 }
 0x9e7   : > { %v2348_v15 = vpop.permute.xlu1 %2347 }
 0xaab   : > { %v2267_v1 = vpop.f32.mrb[6].mxu0 }
 0xaac   : > { %v2268_v19 = vadd.f32 %v2267_v1, %v2196_v25  ;;  %v2269_v24 = vpop.f32.mrb[7].mxu0 }
 0xaad   : > { %v2270_v29 = vadd.f32 %v2269_v24, %v2196_v25 }
 0xaae   : > { %v2272_v45 = vadd.f32 %v2268_v19, %v2189_v20 }
 0xaaf   : > { %v2273_v30 = vadd.f32 %v2270_v29, %v2190_v52 }
 0xab0   : > { %v2274_v33 = vmax.f32 %v2272_v45, 0.0 }
 0xab1   : > { %v2275_v35 = vmax.f32 %v2273_v30, 0.0 }
 0xab2   : > { %2276 = vst [vmem:[#allocation2 + $0xe8] sm:$0xf] %v2274_v33 }
 0xab3   : > { %2277 = vst [vmem:[#allocation2 + $0xf0] sm:$0xf] %v2275_v35 }
 0xab9   : > { %v4528_v38 = vld [vmem:[#allocation2 + $0xe8] sm:$0xff] }
 0xaba   : > { %v4530_v39 = vld [vmem:[#allocation2 + $0xf0] sm:$0xff]  ;;  %v2282_v43 = vmul.f32 %v4528_v38, %v3861_v23  ;;  %v2342_v44 = vmul.f32 %v4528_v38, %v3886_v32  ;;  %v2321_v58 = vmul.f32 %v4528_v38, %v3870_v26  ;;  %v2366_v61 = vmul.f32 %v4528_v38, %v3899_v37 }
 0xabb   : > { %v3634_v48 = vpack.i.bf16 %v4530_v39, %v4528_v38  ;;  %v2283_v49 = vmul.f32 %v4530_v39, %v3856_v22  ;;  %v2343_v55 = vmul.f32 %v4530_v39, %v3874_v27  ;;  %v2322_v59 = vmul.f32 %v4530_v39, %v3854_v21 }
 0xabc   : > { %v2387_v62 = vmul.f32 %v4528_v38, %v3910_v42  ;;  %v2367_v63 = vmul.f32 %v4530_v39, %v3904_v40  ;;  %v3654_v3 = vpack.i.bf16 %v4200_v60, %v4530_v39  ;;  %v2388_v7 = vmul.f32 %v4530_v39, %v3924_v47 }
 0xabd   : > { %3635 = vrot.lane.b32.xlu1 %v3634_v48, %s3759_s5  ;;  %v3639_v57 = vpack.i.bf16 %v2283_v49, %v2282_v43  ;;  %v3649_v0 = vpack.i.bf16 %v2343_v55, %v2342_v44  ;;  %v3644_v2 = vpack.i.bf16 %v2322_v59, %v2321_v58  ;;  %v2427_v60 = vmul.f32 %v4530_v39, %v3945_v54 }
 0xabe   : > { %v3659_v4 = vpack.i.bf16 %v4384_v34, %v2367_v63  ;;  %v3664_v8 = vpack.i.bf16 %v4393_v31, %v2388_v7  ;;  %v2426_v6 = vmul.f32 %v4528_v38, %v3933_v51 }
 0xabf   : > { %3640 = vrot.lane.b32.xlu0 %v3639_v57, %s3758_s30 }
 0xac1   : > { %3650 = vrot.lane.b32.xlu1 %v3649_v0, %s3755_s28 }
 0xac3   : > { %3645 = vrot.lane.b32.xlu0 %v3644_v2, %s3756_s29 }
 0xac5   : > { %2372 = vrot.lane.b32.xlu1 %v2366_v61, %s3754_s27 }
 0xac7   : > { %2393 = vrot.lane.b32.xlu0 %v2387_v62, %s3752_s22 }
 0xac9   : > { %3655 = vrot.lane.b32.xlu1 %v3654_v3, %s3760_s6 }
 0xacb   : > { %3660 = vrot.lane.b32.xlu0 %v3659_v4, %s3754_s27 }
 0xacd   : > { %2411 = vrot.lane.b32.xlu1 %v4528_v38, %s3760_s6 }
 0xacf   : > { %3665 = vrot.lane.b32.xlu0 %v3664_v8, %s3752_s22 }
 0xad1   : > { %2436 = vrot.lane.b32.xlu1 %v4401_v16, %s3753_s23 }
 0xad3   : > { %2434 = vrot.lane.b32.xlu0 %v2427_v60, %s3753_s23 }
 0xad5   : > { %2470 = vperm.xlu1 %3423, %v3198_v5  }
 0xad7   : > { %2432 = vrot.lane.b32.xlu0 %v2426_v6, %s3753_s23 }
 0xad9   : > { %2580 = vrot.lane.b32.xlu1 %v4580_v9, %s3759_s5 }
 0xadb   : > { %2562 = vrot.lane.b32.xlu0 %v4311_v53, %s3758_s30 }
 0xadd   : > { %2622 = vrot.lane.b32.xlu1 %v4317_v56, %s3755_s28 }
 0xadf   : > { %2601 = vrot.lane.b32.xlu0 %v4323_v14, %s3756_s29 }
 0xb2f   : > { %v3636_v46 = vpop.permute.xlu1 %3635 }
 0xb30   : > { %v3638_v13 = vunpack.i.h.bf16 %v3636_v46  ;;  %v3637_v25 = vunpack.i.l.bf16 %v3636_v46 }
 0xb31   : > { %v3641_v1 = vpop.permute.xlu0 %3640 }
 0xb32   : > { %v3643_v19 = vunpack.i.h.bf16 %v3641_v1  ;;  %v3642_v24 = vunpack.i.l.bf16 %v3641_v1  ;;  %v2311_v20 = vsel %vm309_vm6, %v2306_v10, %v3637_v25  ;;  %v2312_v53 = vsel %vm309_vm6, %v3637_v25, %v3638_v13 }
 0xb33   : > { %v3651_v29 = vpop.permute.xlu1 %3650 }
 0xb34   : > { %v2293_v56 = vsel %vm290_vm5, %v2288_v12, %v3642_v24  ;;  %v3653_v45 = vunpack.i.h.bf16 %v3651_v29  ;;  %v3652_v52 = vunpack.i.l.bf16 %v3651_v29  ;;  %v2294_v14 = vsel %vm290_vm5, %v3642_v24, %v3643_v19 }
 0xb35   : > { %v3324_v30 = vpack.c.bf16 %v2311_v20, %v2293_v56  ;;  %v3646_v33 = vpop.permute.xlu0 %3645  ;;  %v3322_v35 = vpack.c.bf16 %v2312_v53, %v2294_v14  ;;  %v3197_v56 = vld [vmem:[%s4781_s1 + $0x1c] sm:$0xf] }
 0xb36   : > { %v3648_v43 = vunpack.i.h.bf16 %v3646_v33  ;;  %v3647_v48 = vunpack.i.l.bf16 %v3646_v33  ;;  %v2353_v44 = vsel %vm371_vm3, %v2348_v15, %v3652_v52  ;;  %v2354_v58 = vsel %vm371_vm3, %v3652_v52, %v3653_v45  ;;  %v2464_v33 = vld [vmem:[#allocation2 + $0xe8] sm:$0xf] }
 0xb37   : > { %v2373_v49 = vpop.permute.xlu1 %2372  ;;  %3323 = vmatprep.subr.bf16.mxu1 %v3322_v35 }
 0xb38   : > { %v2332_v55 = vsel %vm340_vm4, %v2327_v11, %v3647_v48  ;;  %3325 = vmatpush1.bf16.msra.mxu1 %v3324_v30  ;;  %v2333_v57 = vsel %vm340_vm4, %v3647_v48, %v3648_v43  ;;  %v2465_v48 = vld [vmem:[#allocation2 + $0xf0] sm:$0xf] }
 0xb39   : > { %v3328_v59 = vpack.c.bf16 %v2353_v44, %v2332_v55  ;;  %v2394_v0 = vpop.permute.xlu0 %2393  ;;  %v3326_v2 = vpack.c.bf16 %v2354_v58, %v2333_v57 }
 0xb3b   : > { %v3656_v61 = vpop.permute.xlu1 %3655  ;;  %3327 = vmatprep.subr.bf16.mxu1 %v3326_v2 }
 0xb3c   : > { %3329 = vmatpush1.bf16.msra.mxu1 %v3328_v59  ;;  %v3658_v4 = vunpack.i.h.bf16 %v3656_v61  ;;  %v3657_v7 = vunpack.i.l.bf16 %v3656_v61 }
 0xb3d   : > { %v3661_v62 = vpop.permute.xlu0 %3660 }
 0xb3e   : > { %v3663_v63 = vunpack.i.h.bf16 %v3661_v62  ;;  %v3662_v3 = vunpack.i.l.bf16 %v3661_v62  ;;  %v2418_v1 = vsel %vm452_vm7, %v3657_v7, %v3658_v4 }
 0xb3f   : > { %v2412_v6 = vpop.permute.xlu1 %2411 }
 0xb40   : > { %v2378_v8 = vsel %vm354_vm2, %v2373_v49, %v3662_v3  ;;  %v2379_v60 = vsel %vm354_vm2, %v3662_v3, %v3663_v63  ;;  %v2417_v46 = vsel %vm452_vm7, %v2412_v6, %v3657_v7 }
 0xb41   : > { %v3332_v5 = vpack.c.bf16 %v2378_v8, %v4528_v38  ;;  %v3666_v10 = vpop.permute.xlu0 %3665  ;;  %v3330_v12 = vpack.c.bf16 %v2379_v60, %v4530_v39 }
 0xb42   : > { %v3668_v15 = vunpack.i.h.bf16 %v3666_v10  ;;  %v3667_v11 = vunpack.i.l.bf16 %v3666_v10 }
 0xb43   : > { %3331 = vmatprep.subr.bf16.mxu1 %v3330_v12  ;;  %v2437_v38 = vpop.permute.xlu1 %2436 }
 0xb44   : > { %v2399_v13 = vsel %vm323_vm1, %v2394_v0, %v3667_v11  ;;  %3333 = vmatpush1.bf16.msra.mxu1 %v3332_v5  ;;  %v2400_v25 = vsel %vm323_vm1, %v3667_v11, %v3668_v15 }
 0xb45   : > { %v3336_v19 = vpack.c.bf16 %v2417_v46, %v2399_v13  ;;  %v2435_v24 = vpop.permute.xlu0 %2434  ;;  %v3334_v20 = vpack.c.bf16 %v2418_v1, %v2400_v25  ;;  %v2870_v25 = vmul.f32 %v4580_v9, %v3842_v17 }
 0xb46   : > { %v2439_v39 = vsel %vm273_vm0, %v2435_v24, %v2437_v38 }
 0xb47   : > { %3335 = vmatprep.subr.bf16.mxu1 %v3334_v20 }
 0xb48   : > { %3337 = vmatpush1.bf16.msra.mxu1 %v3336_v19 }
 0xb49   : > { %v2433_v29 = vpop.permute.xlu0 %2432  ;;  %2492 = vmatprep.subr.mxu1 %v2439_v39 }
 0xb4a   : > { %v2438_v53 = vsel %vm273_vm0, %v2433_v29, %v2435_v24 }
 0xb4c   : > { %2493 = vmatpush1.msra.mxu1 %v2438_v53 }
 0xb4d   : > { %3199 = vmatmul.mubr.msk.f32.vlgmr.msra.gmra.mrb[6].mxu1 %vm515_vm8, %v3197_v56  ;;  %v2563_v19 = vpop.permute.xlu0 %2562 }
 0xb4e   : > { %3090 = vmatprep.mubr.f32.mxu1 %v4580_v9 }
 0xb51   : > { %v2602_v20 = vpop.permute.xlu0 %2601 }
 0xb54   : > { %v2471_v45 = vpop.permute.xlu1 %2470 }
 0xb58   : > { %v2581_v1 = vpop.permute.xlu1 %2580 }
 0xb5c   : > { %v2623_v24 = vpop.permute.xlu1 %2622 }
 0xc20   : > { %v2542_v52 = vpop.f32.mrb[6].mxu1 }
 0xc21   : > { %v2543_v14 = vadd.f32 %v2542_v52, %v2471_v45  ;;  %v2544_v30 = vpop.f32.mrb[7].mxu1 }
 0xc22   : > { %v2545_v35 = vadd.f32 %v2544_v30, %v2471_v45 }
 0xc23   : > { %v2547_v43 = vadd.f32 %v2543_v14, %v2464_v33 }
 0xc24   : > { %v2548_v49 = vadd.f32 %v2545_v35, %v2465_v48 }
 0xc25   : > { %v2549_v44 = vmax.f32 %v2547_v43, 0.0 }
 0xc26   : > { %v2550_v55 = vmax.f32 %v2548_v49, 0.0 }
 0xc27   : > { %2551 = vst [vmem:[#allocation2 + $0x108] sm:$0xf] %v2549_v44 }
 0xc28   : > { %2552 = vst [vmem:[#allocation2 + $0x110] sm:$0xf] %v2550_v55 }
 0xc2e   : > { %v4613_v57 = vld [vmem:[#allocation2 + $0x108] sm:$0xff] }
 0xc2f   : > { %v4615_v58 = vld [vmem:[#allocation2 + $0x110] sm:$0xff]  ;;  %v2557_v59 = vmul.f32 %v4613_v57, %v3861_v23  ;;  %v2617_v61 = vmul.f32 %v4613_v57, %v3886_v32  ;;  %v2596_v3 = vmul.f32 %v4613_v57, %v3870_v26  ;;  %v2641_v60 = vmul.f32 %v4613_v57, %v3899_v37 }
 0xc30   : > { %v3669_v0 = vpack.i.bf16 %v4615_v58, %v4613_v57  ;;  %v2558_v2 = vmul.f32 %v4615_v58, %v3856_v22  ;;  %v2618_v62 = vmul.f32 %v4615_v58, %v3874_v27  ;;  %v2597_v4 = vmul.f32 %v4615_v58, %v3854_v21 }
 0xc31   : > { %v2662_v5 = vmul.f32 %v4613_v57, %v3910_v42  ;;  %v2642_v6 = vmul.f32 %v4615_v58, %v3904_v40  ;;  %v3689_v10 = vpack.i.bf16 %v4580_v9, %v4615_v58  ;;  %v2663_v15 = vmul.f32 %v4615_v58, %v3924_v47 }
 0xc32   : > { %3670 = vrot.lane.b32.xlu1 %v3669_v0, %s3759_s5  ;;  %v3674_v63 = vpack.i.bf16 %v2558_v2, %v2557_v59  ;;  %v3684_v7 = vpack.i.bf16 %v2618_v62, %v2617_v61  ;;  %v3679_v8 = vpack.i.bf16 %v2597_v4, %v2596_v3  ;;  %v2702_v46 = vmul.f32 %v4615_v58, %v3945_v54 }
 0xc33   : > { %v3694_v12 = vpack.i.bf16 %v4384_v34, %v2642_v6  ;;  %v3699_v11 = vpack.i.bf16 %v4393_v31, %v2663_v15  ;;  %v3201_v34 = vld [vmem:[%s4782_s2 + $0x20] sm:$0xf]  ;;  %v2701_v13 = vmul.f32 %v4613_v57, %v3933_v51  ;;  %v2831_v31 = vmul.f32 %v4580_v9, %v3844_v18 }
 0xc34   : > { %3675 = vrot.lane.b32.xlu0 %v3674_v63, %s3758_s30 }
 0xc36   : > { %3685 = vrot.lane.b32.xlu1 %v3684_v7, %s3755_s28 }
 0xc38   : > { %3680 = vrot.lane.b32.xlu0 %v3679_v8, %s3756_s29 }
 0xc3a   : > { %2647 = vrot.lane.b32.xlu1 %v2641_v60, %s3754_s27 }
 0xc3c   : > { %2668 = vrot.lane.b32.xlu0 %v2662_v5, %s3752_s22 }
 0xc3e   : > { %3690 = vrot.lane.b32.xlu1 %v3689_v10, %s3760_s6 }
 0xc40   : > { %3695 = vrot.lane.b32.xlu0 %v3694_v12, %s3754_s27 }
 0xc42   : > { %2686 = vrot.lane.b32.xlu1 %v4613_v57, %s3760_s6 }
 0xc44   : > { %3700 = vrot.lane.b32.xlu0 %v3699_v11, %s3752_s22 }
 0xc46   : > { %2711 = vrot.lane.b32.xlu1 %v4401_v16, %s3753_s23  ;;  %v2891_v16 = vmul.f32 %v4580_v9, %v3876_v28 }
 0xc48   : > { %2709 = vrot.lane.b32.xlu0 %v2702_v46, %s3753_s23 }
 0xc4a   : > { %2745 = vperm.xlu1 %3423, %v3201_v34  }
 0xc4c   : > { %2707 = vrot.lane.b32.xlu0 %v2701_v13, %s3753_s23 }
 0xc4e   : > { %2855 = vrot.lane.b32.xlu1 %v4580_v9, %s3759_s5 }
 0xc50   : > { %2837 = vrot.lane.b32.xlu0 %v2831_v31, %s3758_s30 }
 0xc52   : > { %2897 = vrot.lane.b32.xlu1 %v2891_v16, %s3755_s28 }
 0xc54   : > { %2876 = vrot.lane.b32.xlu0 %v2870_v25, %s3756_s29 }
 0xca4   : > { %v3671_v38 = vpop.permute.xlu1 %3670 }
 0xca5   : > { %v3673_v39 = vunpack.i.h.bf16 %v3671_v38  ;;  %v3672_v29 = vunpack.i.l.bf16 %v3671_v38 }
 0xca6   : > { %v3676_v18 = vpop.permute.xlu0 %3675 }
 0xca7   : > { %v3678_v53 = vunpack.i.h.bf16 %v3676_v18  ;;  %v3677_v56 = vunpack.i.l.bf16 %v3676_v18  ;;  %v2586_v45 = vsel %vm309_vm6, %v2581_v1, %v3672_v29  ;;  %v2587_v52 = vsel %vm309_vm6, %v3672_v29, %v3673_v39  ;;  %v3200_v18 = vld [vmem:[%s4781_s1 + $0x20] sm:$0xf] }
 0xca8   : > { %v3686_v28 = vpop.permute.xlu1 %3685 }
 0xca9   : > { %v2568_v14 = vsel %vm290_vm5, %v2563_v19, %v3677_v56  ;;  %v3688_v17 = vunpack.i.h.bf16 %v3686_v28  ;;  %v3687_v30 = vunpack.i.l.bf16 %v3686_v28  ;;  %v2569_v33 = vsel %vm290_vm5, %v3677_v56, %v3678_v53 }
 0xcaa   : > { %v3340_v35 = vpack.c.bf16 %v2586_v45, %v2568_v14  ;;  %v3681_v43 = vpop.permute.xlu0 %3680  ;;  %v3338_v48 = vpack.c.bf16 %v2587_v52, %v2569_v33  ;;  %v2739_v52 = vld [vmem:[#allocation2 + $0x108] sm:$0xf] }
 0xcab   : > { %v3683_v49 = vunpack.i.h.bf16 %v3681_v43  ;;  %v3682_v44 = vunpack.i.l.bf16 %v3681_v43  ;;  %v2628_v59 = vsel %vm371_vm3, %v2623_v24, %v3687_v30  ;;  %v2629_v61 = vsel %vm371_vm3, %v3687_v30, %v3688_v17  ;;  %v2740_v30 = vld [vmem:[#allocation2 + $0x110] sm:$0xf] }
 0xcac   : > { %v2648_v55 = vpop.permute.xlu1 %2647  ;;  %3339 = vmatprep.subr.bf16.mxu0 %v3338_v48 }
 0xcad   : > { %v2607_v0 = vsel %vm340_vm4, %v2602_v20, %v3682_v44  ;;  %3341 = vmatpush1.bf16.msra.mxu0 %v3340_v35  ;;  %v2608_v2 = vsel %vm340_vm4, %v3682_v44, %v3683_v49 }
 0xcae   : > { %v3344_v62 = vpack.c.bf16 %v2628_v59, %v2607_v0  ;;  %v2669_v63 = vpop.permute.xlu0 %2668  ;;  %v3342_v3 = vpack.c.bf16 %v2629_v61, %v2608_v2 }
 0xcb0   : > { %v3691_v4 = vpop.permute.xlu1 %3690  ;;  %3343 = vmatprep.subr.bf16.mxu0 %v3342_v3  ;;  %v2918_v3 = vmul.f32 %v4580_v9, %v3897_v36  ;;  %v2978_v36 = vmul.f32 %v4580_v9, %v3931_v50 }
 0xcb1   : > { %3345 = vmatpush1.bf16.msra.mxu0 %v3344_v62  ;;  %v3693_v5 = vunpack.i.h.bf16 %v3691_v4  ;;  %v3692_v6 = vunpack.i.l.bf16 %v3691_v4 }
 0xcb2   : > { %v3696_v7 = vpop.permute.xlu0 %3695 }
 0xcb3   : > { %v3698_v8 = vunpack.i.h.bf16 %v3696_v7  ;;  %v3697_v60 = vunpack.i.l.bf16 %v3696_v7  ;;  %v2693_v19 = vsel %vm452_vm7, %v3692_v6, %v3693_v5 }
 0xcb4   : > { %v2687_v11 = vpop.permute.xlu1 %2686 }
 0xcb5   : > { %v2653_v10 = vsel %vm354_vm2, %v2648_v55, %v3697_v60  ;;  %v2654_v12 = vsel %vm354_vm2, %v3697_v60, %v3698_v8  ;;  %v2692_v16 = vsel %vm452_vm7, %v2687_v11, %v3692_v6 }
 0xcb6   : > { %v3348_v15 = vpack.c.bf16 %v2653_v10, %v4613_v57  ;;  %v3701_v46 = vpop.permute.xlu0 %3700  ;;  %v3346_v34 = vpack.c.bf16 %v2654_v12, %v4615_v58 }
 0xcb7   : > { %v3703_v13 = vunpack.i.h.bf16 %v3701_v46  ;;  %v3702_v31 = vunpack.i.l.bf16 %v3701_v46 }
 0xcb8   : > { %3347 = vmatprep.subr.bf16.mxu0 %v3346_v34  ;;  %v2712_v57 = vpop.permute.xlu1 %2711 }
 0xcb9   : > { %v2674_v25 = vsel %vm323_vm1, %v2669_v63, %v3702_v31  ;;  %3349 = vmatpush1.bf16.msra.mxu0 %v3348_v15  ;;  %v2675_v1 = vsel %vm323_vm1, %v3702_v31, %v3703_v13 }
 0xcba   : > { %v3352_v24 = vpack.c.bf16 %v2692_v16, %v2674_v25  ;;  %v2710_v20 = vpop.permute.xlu0 %2709  ;;  %v3350_v38 = vpack.c.bf16 %v2693_v19, %v2675_v1 }
 0xcbb   : > { %v2714_v58 = vsel %vm273_vm0, %v2710_v20, %v2712_v57 }
 0xcbc   : > { %3351 = vmatprep.subr.bf16.mxu0 %v3350_v38 }
 0xcbd   : > { %3353 = vmatpush1.bf16.msra.mxu0 %v3352_v24 }
 0xcbe   : > { %v2708_v39 = vpop.permute.xlu0 %2707  ;;  %2767 = vmatprep.subr.mxu0 %v2714_v58 }
 0xcbf   : > { %v2713_v29 = vsel %vm273_vm0, %v2708_v39, %v2710_v20 }
 0xcc1   : > { %2768 = vmatpush1.msra.mxu0 %v2713_v29 }
 0xcc2   : > { %3202 = vmatmul.mubr.msk.f32.vlgmr.msra.gmra.mrb[8].mxu0 %vm515_vm8, %v3200_v18  ;;  %v2838_v60 = vpop.permute.xlu0 %2837 }
 0xcc9   : > { %v2746_v53 = vpop.permute.xlu1 %2745 }
 0xccd   : > { %v2856_v8 = vpop.permute.xlu1 %2855 }
 0xcd1   : > { %v2898_v50 = vpop.permute.xlu1 %2897 }
 0xd95   : > { %v2817_v56 = vpop.f32.mrb[8].mxu0 }
 0xd96   : > { %v2818_v45 = vadd.f32 %v2817_v56, %v2746_v53  ;;  %v2819_v28 = vpop.f32.mrb[9].mxu0 }
 0xd97   : > { %v2820_v14 = vadd.f32 %v2819_v28, %v2746_v53 }
 0xd98   : > { %v2822_v17 = vadd.f32 %v2818_v45, %v2739_v52 }
 0xd99   : > { %v2823_v33 = vadd.f32 %v2820_v14, %v2740_v30 }
 0xd9a   : > { %v2824_v35 = vmax.f32 %v2822_v17, 0.0 }
 0xd9b   : > { %v2825_v43 = vmax.f32 %v2823_v33, 0.0 }
 0xd9c   : > { %2826 = vst [vmem:[#allocation2 + $0x128] sm:$0xf] %v2824_v35 }
 0xd9d   : > { %2827 = vst [vmem:[#allocation2 + $0x130] sm:$0xf] %v2825_v43 }
 0xda3   : > { %v4698_v48 = vld [vmem:[#allocation2 + $0x128] sm:$0xff] }
 0xda4   : > { %v4700_v49 = vld [vmem:[#allocation2 + $0x130] sm:$0xff]  ;;  %v2832_v44 = vmul.f32 %v4698_v48, %v3861_v23  ;;  %v2892_v0 = vmul.f32 %v4698_v48, %v3886_v32  ;;  %v2871_v62 = vmul.f32 %v4698_v48, %v3870_v26  ;;  %v2937_v32 = vmul.f32 %v4698_v48, %v3910_v42 }
 0xda5   : > { %v3704_v55 = vpack.i.bf16 %v4700_v49, %v4698_v48  ;;  %v2833_v59 = vmul.f32 %v4700_v49, %v3856_v22  ;;  %v2893_v2 = vmul.f32 %v4700_v49, %v3874_v27  ;;  %v2872_v23 = vmul.f32 %v4700_v49, %v3854_v21 }
 0xda6   : > { %v2916_v27 = vmul.f32 %v4698_v48, %v3899_v37  ;;  %v2917_v26 = vmul.f32 %v4700_v49, %v3904_v40  ;;  %v3724_v21 = vpack.i.bf16 %v4580_v9, %v4700_v49  ;;  %v2938_v37 = vmul.f32 %v4700_v49, %v3924_v47  ;;  %v3204_v47 = vld [vmem:[%s4782_s2 + $0x24] sm:$0xf] }
 0xda7   : > { %3705 = vrot.lane.b32.xlu1 %v3704_v55, %s3759_s5  ;;  %v3709_v61 = vpack.i.bf16 %v2833_v59, %v2832_v44  ;;  %v3719_v63 = vpack.i.bf16 %v2893_v2, %v2892_v0  ;;  %v3714_v22 = vpack.i.bf16 %v2872_v23, %v2871_v62  ;;  %v2939_v42 = vmul.f32 %v4580_v9, %v3908_v41  ;;  %v2877_v9 = vpop.permute.xlu0 %2876 }
 0xda8   : > { %v3729_v4 = vpack.i.bf16 %v2918_v3, %v2917_v26  ;;  %v2977_v7 = vmul.f32 %v4700_v49, %v3945_v54  ;;  %v2976_v41 = vmul.f32 %v4698_v48, %v3933_v51  ;;  %v3203_v3 = vld [vmem:[%s4781_s1 + $0x24] sm:$0xf] }
 0xda9   : > { %3710 = vrot.lane.b32.xlu0 %v3709_v61, %s3758_s30  ;;  %v3734_v40 = vpack.i.bf16 %v2939_v42, %v2938_v37 }
 0xdab   : > { %3720 = vrot.lane.b32.xlu1 %v3719_v63, %s3755_s28 }
 0xdad   : > { %3715 = vrot.lane.b32.xlu0 %v3714_v22, %s3756_s29 }
 0xdaf   : > { %2922 = vrot.lane.b32.xlu1 %v2916_v27, %s3754_s27 }
 0xdb1   : > { %2943 = vrot.lane.b32.xlu0 %v2937_v32, %s3752_s22 }
 0xdb3   : > { %3725 = vrot.lane.b32.xlu1 %v3724_v21, %s3760_s6 }
 0xdb5   : > { %3730 = vrot.lane.b32.xlu0 %v3729_v4, %s3754_s27 }
 0xdb7   : > { %2961 = vrot.lane.b32.xlu1 %v4698_v48, %s3760_s6 }
 0xdb9   : > { %3735 = vrot.lane.b32.xlu0 %v3734_v40, %s3752_s22 }
 0xdbb   : > { %2986 = vrot.lane.b32.xlu1 %v2978_v36, %s3753_s23  ;;  %v3014_v36 = vld [vmem:[#allocation2 + $0x128] sm:$0xf] }
 0xdbd   : > { %2984 = vrot.lane.b32.xlu0 %v2977_v7, %s3753_s23 }
 0xdbf   : > { %3020 = vperm.xlu1 %3423, %v3204_v47  }
 0xdc1   : > { %2982 = vrot.lane.b32.xlu0 %v2976_v41, %s3753_s23  ;;  %v3015_v41 = vld [vmem:[#allocation2 + $0x130] sm:$0xf] }
 0xe19   : > { %v3706_v5 = vpop.permute.xlu1 %3705 }
 0xe1a   : > { %v3708_v6 = vunpack.i.h.bf16 %v3706_v5  ;;  %v3707_v10 = vunpack.i.l.bf16 %v3706_v5 }
 0xe1b   : > { %v3711_v54 = vpop.permute.xlu0 %3710 }
 0xe1c   : > { %v3713_v12 = vunpack.i.h.bf16 %v3711_v54  ;;  %v3712_v15 = vunpack.i.l.bf16 %v3711_v54  ;;  %v2861_v11 = vsel %vm309_vm6, %v2856_v8, %v3707_v10  ;;  %v2862_v34 = vsel %vm309_vm6, %v3707_v10, %v3708_v6 }
 0xe1d   : > { %v3721_v46 = vpop.permute.xlu1 %3720 }
 0xe1e   : > { %v2843_v13 = vsel %vm290_vm5, %v2838_v60, %v3712_v15  ;;  %v3723_v51 = vunpack.i.h.bf16 %v3721_v46  ;;  %v3722_v31 = vunpack.i.l.bf16 %v3721_v46  ;;  %v2844_v16 = vsel %vm290_vm5, %v3712_v15, %v3713_v12 }
 0xe1f   : > { %v3356_v25 = vpack.c.bf16 %v2861_v11, %v2843_v13  ;;  %v3716_v1 = vpop.permute.xlu0 %3715  ;;  %v3354_v19 = vpack.c.bf16 %v2862_v34, %v2844_v16 }
 0xe20   : > { %v3718_v24 = vunpack.i.h.bf16 %v3716_v1  ;;  %v3717_v20 = vunpack.i.l.bf16 %v3716_v1  ;;  %v2903_v57 = vsel %vm371_vm3, %v2898_v50, %v3722_v31  ;;  %v2904_v29 = vsel %vm371_vm3, %v3722_v31, %v3723_v51 }
 0xe21   : > { %v2923_v38 = vpop.permute.xlu1 %2922  ;;  %3355 = vmatprep.subr.bf16.mxu1 %v3354_v19 }
 0xe22   : > { %v2882_v58 = vsel %vm340_vm4, %v2877_v9, %v3717_v20  ;;  %3357 = vmatpush1.bf16.msra.mxu1 %v3356_v25  ;;  %v2883_v39 = vsel %vm340_vm4, %v3717_v20, %v3718_v24 }
 0xe23   : > { %v3360_v18 = vpack.c.bf16 %v2903_v57, %v2882_v58  ;;  %v2944_v53 = vpop.permute.xlu0 %2943  ;;  %v3358_v56 = vpack.c.bf16 %v2904_v29, %v2883_v39 }
 0xe25   : > { %v3726_v45 = vpop.permute.xlu1 %3725  ;;  %3359 = vmatprep.subr.bf16.mxu1 %v3358_v56 }
 0xe26   : > { %3361 = vmatpush1.bf16.msra.mxu1 %v3360_v18  ;;  %v3728_v17 = vunpack.i.h.bf16 %v3726_v45  ;;  %v3727_v30 = vunpack.i.l.bf16 %v3726_v45 }
 0xe27   : > { %v3731_v28 = vpop.permute.xlu0 %3730 }
 0xe28   : > { %v3733_v52 = vunpack.i.h.bf16 %v3731_v28  ;;  %v3732_v14 = vunpack.i.l.bf16 %v3731_v28  ;;  %v2968_v63 = vsel %vm452_vm7, %v3727_v30, %v3728_v17 }
 0xe29   : > { %v2962_v44 = vpop.permute.xlu1 %2961 }
 0xe2a   : > { %v2928_v33 = vsel %vm354_vm2, %v2923_v38, %v3732_v14  ;;  %v2929_v35 = vsel %vm354_vm2, %v3732_v14, %v3733_v52  ;;  %v2967_v61 = vsel %vm452_vm7, %v2962_v44, %v3727_v30 }
 0xe2b   : > { %v3364_v43 = vpack.c.bf16 %v2928_v33, %v4698_v48  ;;  %v3736_v55 = vpop.permute.xlu0 %3735  ;;  %v3362_v59 = vpack.c.bf16 %v2929_v35, %v4700_v49 }
 0xe2c   : > { %v3738_v0 = vunpack.i.h.bf16 %v3736_v55  ;;  %v3737_v2 = vunpack.i.l.bf16 %v3736_v55 }
 0xe2d   : > { %3363 = vmatprep.subr.bf16.mxu1 %v3362_v59  ;;  %v2987_v48 = vpop.permute.xlu1 %2986 }
 0xe2e   : > { %v2949_v62 = vsel %vm323_vm1, %v2944_v53, %v3737_v2  ;;  %3365 = vmatpush1.bf16.msra.mxu1 %v3364_v43  ;;  %v2950_v23 = vsel %vm323_vm1, %v3737_v2, %v3738_v0 }
 0xe2f   : > { %v3368_v22 = vpack.c.bf16 %v2967_v61, %v2949_v62  ;;  %v2985_v27 = vpop.permute.xlu0 %2984  ;;  %v3366_v32 = vpack.c.bf16 %v2968_v63, %v2950_v23 }
 0xe30   : > { %v2989_v49 = vsel %vm273_vm0, %v2985_v27, %v2987_v48 }
 0xe31   : > { %3367 = vmatprep.subr.bf16.mxu1 %v3366_v32 }
 0xe32   : > { %3369 = vmatpush1.bf16.msra.mxu1 %v3368_v22 }
 0xe33   : > { %v2983_v26 = vpop.permute.xlu0 %2982  ;;  %3042 = vmatprep.subr.mxu1 %v2989_v49 }
 0xe34   : > { %v2988_v21 = vsel %vm273_vm0, %v2983_v26, %v2985_v27 }
 0xe36   : > { %3043 = vmatpush1.msra.mxu1 %v2988_v21 }
 0xe37   : > { %3205 = vmatmul.mubr.msk.f32.vlgmr.msra.gmra.mrb[8].mxu1 %vm515_vm8, %v3203_v3 }
 0xe3e   : > { %v3021_v4 = vpop.permute.xlu1 %3020 }
 0xf0a   : > { %v3092_v37 = vpop.f32.mrb[8].mxu1 }
 0xf0b   : > { %v3093_v42 = vadd.f32 %v3092_v37, %v3021_v4  ;;  %v3094_v40 = vpop.f32.mrb[9].mxu1 }
 0xf0c   : > { %v3095_v7 = vadd.f32 %v3094_v40, %v3021_v4 }
 0xf0d   : > { %v3097_v47 = vadd.f32 %v3093_v42, %v3014_v36 }
 0xf0e   : > { %v3098_v8 = vadd.f32 %v3095_v7, %v3015_v41 }
 0xf0f   : > { %v3099_v60 = vmax.f32 %v3097_v47, 0.0 }
 0xf10   : > { %v3100_v50 = vmax.f32 %v3098_v8, 0.0 }
 0xf11   : > { %3101 = vst [vmem:[%s4019_s14] sm:$0xf] %v3099_v60 }
 0xf12   : > { %3102 = vst [vmem:[%s4019_s14 + $0x8] sm:$0xf] %v3100_v50 }
 0xf13 PF: > { %s14_s15 = sadd.s32 1, %s3749_s15  }
 0xf14   : > { %p11_p4 = scmp.ge.s32.totalorder %s14_s15, 4  }
 0xf16   :  { %13 = sbr.rel (!%p11_p4) target bundleno = 1 (0x1), region = 94 }

</bundles_post_ra>
